<compile_context>
chip_gen: v5e
topology: v5e:2x2
jax: 0.10.0
libtpu: 0.0.40
codegen_flags: <defaults>
</compile_context>

<pallas_src>
import functools

import jax
import jax.numpy as jnp
from jax import lax
from jax.experimental import pallas as pl
from jax.experimental.pallas import tpu as pltpu


# ----------------------------------------------------------------------------
# GDN layer kernel (grid over source-row blocks, "arbitrary" semantics):
#   hs = h @ Ws ; ht = h @ Wt
#   e[s, d]   = attn . LeakyReLU(hs[s] + ht[d])         for edges src=s, dst=d
#   alpha[s,:] = masked softmax over destinations       (edge_softmax norm_by='src')
#   agg       += alpha^T @ h_blk                        (message = src features)
#   out        = agg @ Wfc + b_fc   (+ optional fused ReLU), written at last block
# ----------------------------------------------------------------------------
def gdn_kernel(h_ref, adj_ref, ws_ref, wtT_ref, attn_ref, wfc_ref, bfc_ref,
               out_ref, hs_scr, htT_scr, e_scr, agg_scr,
               *, blk_m, neg_slope, apply_relu):
    i = pl.program_id(0)
    nblk = pl.num_programs(0)
    fout = ws_ref.shape[1]

    @pl.when(i == 0)
    def _init():
        # Node projections for ALL nodes, once per layer, kept resident in VMEM.
        hs_scr[...] = jnp.dot(h_ref[...], ws_ref[...],
                              preferred_element_type=jnp.float32)      # (n_pad, fout)
        # ht^T = Wt^T @ h^T computed directly as A @ B^T on the MXU.
        htT_scr[...] = lax.dot_general(
            wtT_ref[...], h_ref[...],
            dimension_numbers=(((1,), (1,)), ((), ())),
            preferred_element_type=jnp.float32)                        # (fout, n_pad)
        agg_scr[...] = jnp.zeros_like(agg_scr)

    row0 = pl.multiple_of(i * blk_m, blk_m)
    hs_blk = hs_scr[pl.ds(row0, blk_m), :]                             # (blk_m, fout)
    adj_blk = adj_ref[...]                                             # (blk_m, n_pad) bf16
    mask = adj_blk > 0                                                 # edge mask (exact)

    # e[s, d] = sum_f attn[f] * LeakyReLU(hs[s, f] + ht[d, f]) accumulated over
    # features; every step touches a full lane-dense (blk_m, n_pad) tile.
    e_scr[...] = jnp.zeros_like(e_scr)
    f_iota = lax.broadcasted_iota(jnp.int32, (fout, 1), 0)             # hoisted

    def feat_body(f, carry):
        onehot = (f_iota == f).astype(jnp.float32)                     # (fout, 1)
        hs_col = jnp.dot(hs_blk, onehot,
                         preferred_element_type=jnp.float32)           # (blk_m, 1)
        ht_row = htT_scr[pl.ds(f, 1), :]                               # (1, n_pad)
        x = hs_col + ht_row                                            # (blk_m, n_pad)
        x = jnp.where(x >= 0.0, x, neg_slope * x)                      # LeakyReLU(0.2)
        e_scr[...] += attn_ref[f] * x
        return carry

    lax.fori_loop(0, fout, feat_body, 0)

    # Masked softmax over destinations for every source row (norm_by='src').
    e = e_scr[...]
    e_m = jnp.where(mask, e, -1e30)
    m = jnp.max(e_m, axis=1, keepdims=True)                            # (blk_m, 1)
    m = jnp.where(m < -1e29, 0.0, m)                                   # isolated sources
    ex = jnp.where(mask, jnp.exp(e - m), 0.0)
    denom = jnp.sum(ex, axis=1, keepdims=True)
    denom = jnp.where(denom > 0.0, denom, 1.0)                         # empty rows -> alpha = 0
    alpha = ex * pl.reciprocal(denom, approx=True)                     # (blk_m, n_pad)

    # agg[d, :] += sum_s alpha[s, d] * h[s, :]   ==   alpha^T @ h_blk  on the MXU.
    h_blk = h_ref[pl.ds(row0, blk_m), :]                               # (blk_m, fin)
    agg_scr[...] += jnp.dot(alpha.T.astype(jnp.bfloat16),
                            h_blk.astype(jnp.bfloat16),
                            preferred_element_type=jnp.float32)

    @pl.when(i == nblk - 1)
    def _fin():
        out = jnp.dot(agg_scr[...], wfc_ref[...],
                      preferred_element_type=jnp.float32) + bfc_ref[...]
        if apply_relu:
            out = jnp.maximum(out, 0.0)
        out_ref[...] = out


# ----------------------------------------------------------------------------
# GCN layer kernel:  out_blk = adj_blk @ (x @ W) + b   (+ optional fused ReLU)
# support = x @ W is computed once (block 0) and kept resident as a bf16 MXU operand.
# ----------------------------------------------------------------------------
def gcn_kernel(x_ref, adj_ref, w_ref, b_ref, out_ref, supp_scr, *, apply_relu):
    @pl.when(pl.program_id(0) == 0)
    def _init():
        supp_scr[...] = jnp.dot(x_ref[...], w_ref[...],
                                preferred_element_type=jnp.float32
                                ).astype(jnp.bfloat16)
    out = jnp.dot(adj_ref[...], supp_scr[...],
                  preferred_element_type=jnp.float32) + b_ref[...]
    if apply_relu:
        out = jnp.maximum(out, 0.0)
    out_ref[...] = out


# Final GCN layer with the DCRS score fusion folded in:
#   score = sigmoid((1 - a) * DiffScore + a * (adj @ (x @ W) + b))
def gcn_fuse_kernel(x_ref, adj_ref, w_ref, b_ref, diff_ref, out_ref, supp_scr, *, a):
    @pl.when(pl.program_id(0) == 0)
    def _init():
        supp_scr[...] = jnp.dot(x_ref[...], w_ref[...],
                                preferred_element_type=jnp.float32
                                ).astype(jnp.bfloat16)
    role = jnp.dot(adj_ref[...], supp_scr[...],
                   preferred_element_type=jnp.float32) + b_ref[...]
    z = (1.0 - a) * diff_ref[...] + a * role
    out_ref[...] = 1.0 / (1.0 + jnp.exp(-z))


# ----------------------------------------------------------------------------
# Wrappers
# ----------------------------------------------------------------------------
_VMEM_LIMIT = 56 * 1024 * 1024      # headroom below v7x's 64 MiB physical VMEM


def gdn_layer(h, adj_bf16, ws, wt_t, attn, wfc, bfc, *, apply_relu,
              neg_slope=0.2, blk_m=128):
    n_pad, fin = h.shape
    fout = ws.shape[1]
    nblk = n_pad // blk_m
    full = lambda i: (0, 0)
    kern = functools.partial(gdn_kernel, blk_m=blk_m, neg_slope=neg_slope,
                             apply_relu=apply_relu)
    return pl.pallas_call(
        kern,
        out_shape=jax.ShapeDtypeStruct((n_pad, fout), jnp.float32),
        grid_spec=pltpu.PrefetchScalarGridSpec(
            num_scalar_prefetch=0,
            grid=(nblk,),
            in_specs=[
                pl.BlockSpec((n_pad, fin), full),                        # h (resident)
                pl.BlockSpec((blk_m, n_pad), lambda i: (i, 0)),          # adj row blocks
                pl.BlockSpec((fin, fout), full),                         # Ws
                pl.BlockSpec((fout, fin), full),                         # Wt^T
                pl.BlockSpec(memory_space=pltpu.MemorySpace.SMEM),       # attn scalars
                pl.BlockSpec((fin, fout), full),                         # Wfc
                pl.BlockSpec((1, fout), full),                           # b_fc
            ],
            out_specs=pl.BlockSpec((n_pad, fout), full),
            scratch_shapes=[
                pltpu.VMEM((n_pad, fout), jnp.float32),                  # hs
                pltpu.VMEM((fout, n_pad), jnp.float32),                  # ht^T
                pltpu.VMEM((blk_m, n_pad), jnp.float32),                 # block logits
                pltpu.VMEM((n_pad, fin), jnp.float32),                   # message accumulator
            ]),
        compiler_params=pltpu.CompilerParams(
            dimension_semantics=("arbitrary",),
            vmem_limit_bytes=_VMEM_LIMIT),
    )(h, adj_bf16, ws, wt_t, attn, wfc, bfc)


def gcn_layer(x, adj_bf16, w, b, *, apply_relu, blk_m=128):
    n_pad, fin = x.shape
    fout = w.shape[1]
    full = lambda i: (0, 0)
    kern = functools.partial(gcn_kernel, apply_relu=apply_relu)
    return pl.pallas_call(
        kern,
        out_shape=jax.ShapeDtypeStruct((n_pad, fout), jnp.float32),
        grid_spec=pltpu.PrefetchScalarGridSpec(
            num_scalar_prefetch=0,
            grid=(n_pad // blk_m,),
            in_specs=[pl.BlockSpec((n_pad, fin), full),
                      pl.BlockSpec((blk_m, n_pad), lambda i: (i, 0)),
                      pl.BlockSpec((fin, fout), full),
                      pl.BlockSpec((1, fout), full)],
            out_specs=pl.BlockSpec((blk_m, fout), lambda i: (i, 0)),
            scratch_shapes=[pltpu.VMEM((n_pad, fout), jnp.bfloat16)]),
        compiler_params=pltpu.CompilerParams(
            dimension_semantics=("arbitrary",),
            vmem_limit_bytes=_VMEM_LIMIT),
    )(x, adj_bf16, w, b)


def gcn_fuse_layer(x, adj_bf16, w, b, diff, *, fuse_a, blk_m=128):
    n_pad, fin = x.shape
    fout = w.shape[1]
    full = lambda i: (0, 0)
    kern = functools.partial(gcn_fuse_kernel, a=fuse_a)
    return pl.pallas_call(
        kern,
        out_shape=jax.ShapeDtypeStruct((n_pad, fout), jnp.float32),
        grid_spec=pltpu.PrefetchScalarGridSpec(
            num_scalar_prefetch=0,
            grid=(n_pad // blk_m,),
            in_specs=[pl.BlockSpec((n_pad, fin), full),
                      pl.BlockSpec((blk_m, n_pad), lambda i: (i, 0)),
                      pl.BlockSpec((fin, fout), full),
                      pl.BlockSpec((1, fout), full),
                      pl.BlockSpec((blk_m, 1), lambda i: (i, 0))],
            out_specs=pl.BlockSpec((blk_m, fout), lambda i: (i, 0)),
            scratch_shapes=[pltpu.VMEM((n_pad, fout), jnp.bfloat16)]),
        compiler_params=pltpu.CompilerParams(
            dimension_semantics=("arbitrary",),
            vmem_limit_bytes=_VMEM_LIMIT),
    )(x, adj_bf16, w, b, diff)


# ----------------------------------------------------------------------------
# Parameter init (deterministic, matches the module's shapes)
# ----------------------------------------------------------------------------
def init_params(key, nfeat, nhid):
    keys = iter(jax.random.split(key, 64))

    def unif(shape, bound):
        return jax.random.uniform(next(keys), shape, jnp.float32, -bound, bound)

    def gdn_params(fin, fout):
        bl = 1.0 / (fin ** 0.5)       # nn.Linear default-style bound
        ba = 1.0 / (fout ** 0.5)
        return dict(ws=unif((fin, fout), bl),       # linear_s.weight^T
                    wt_t=unif((fout, fin), bl),     # linear_t.weight (torch layout)
                    attn=unif((fout,), ba),         # attn.weight
                    wfc=unif((fin, fout), bl),      # fc.weight^T
                    bfc=unif((1, fout), bl))        # fc.bias

    def gcn_params(fin, fout):
        stdv = 1.0 / (fout ** 0.5)                  # GCN.reset_parameters
        return dict(w=unif((fin, fout), stdv), b=unif((1, fout), stdv))

    return dict(gdn1=gdn_params(nfeat, nhid), gdn2=gdn_params(nhid, nhid),
                gdn3=gdn_params(nhid, nhid), gdn4=gdn_params(nhid, 1),
                gcn1=gcn_params(nfeat, nhid), gcn2=gcn_params(nhid, nhid),
                gcn3=gcn_params(nhid, nhid), gcn4=gcn_params(nhid, 1))


# ----------------------------------------------------------------------------
# DCRS forward
# ----------------------------------------------------------------------------
def dcrs_forward(feature, adj, role_adj, params, fuse, *, blk_m=128):
    n = feature.shape[0]
    n_pad = ((n + blk_m - 1) // blk_m) * blk_m
    pad = n_pad - n
    feat_p = jnp.pad(feature.astype(jnp.float32), ((0, pad), (0, 0)))
    # GDN adjacency is a 0/1 edge mask -> exact in bf16 (half the HBM traffic).
    adj_p = jnp.pad(adj, ((0, pad), (0, pad))).astype(jnp.bfloat16)
    # role_adj is a bf16 MXU operand (accumulation stays f32 inside the kernel).
    role_p = jnp.pad(role_adj, ((0, pad), (0, pad))).astype(jnp.bfloat16)

    # Diffusion branch (GDN stack).
    h = feat_p
    for name, relu_flag in (("gdn1", True), ("gdn2", True),
                            ("gdn3", True), ("gdn4", False)):
        p = params[name]
        h = gdn_layer(h, adj_p, p["ws"], p["wt_t"], p["attn"], p["wfc"], p["bfc"],
                      apply_relu=relu_flag, blk_m=blk_m)
    diff_score = h                                                       # (n_pad, 1)

    # Role branch (GCN stack); the last layer fuses the sigmoid blend.
    r = feat_p
    for name in ("gcn1", "gcn2", "gcn3"):
        p = params[name]
        r = gcn_layer(r, role_p, p["w"], p["b"], apply_relu=True, blk_m=blk_m)
    p = params["gcn4"]
    score = gcn_fuse_layer(r, role_p, p["w"], p["b"], diff_score,
                           fuse_a=float(fuse), blk_m=blk_m)              # (n_pad, 1)
    return score[:n]

# TODO(synk): DCRS.loss is training-time only and not part of forward; not ported.


if __name__ == "__main__":
    N, nfeat, nhid = 200, 64, 128        # nhid lane-dense (multiple of 128)
    fuse = 0.6

    key = jax.random.PRNGKey(0)
    k1, k2, k3, kp = jax.random.split(key, 4)

    feature = jax.random.normal(k1, (N, nfeat), jnp.float32)

    # Directed graph adjacency A[src, dst] with self-loops (GDN branch).
    adj = (jax.random.uniform(k2, (N, N)) < 0.1).astype(jnp.float32)
    adj = jnp.maximum(adj, jnp.eye(N, dtype=jnp.float32))

    # Dense, row-normalized role adjacency (GCN / spmm branch).
    role = (jax.random.uniform(k3, (N, N)) < 0.1).astype(jnp.float32)
    role = jnp.maximum(jnp.maximum(role, role.T), jnp.eye(N, dtype=jnp.float32))
    role_adj = role / jnp.sum(role, axis=1, keepdims=True)

    params = init_params(kp, nfeat, nhid)

    score = dcrs_forward(feature, adj, role_adj, params, fuse)
    score = jax.block_until_ready(score)

    assert score.shape == (N, 1)
    assert bool(jnp.all(jnp.isfinite(score)))
    assert bool(jnp.all((score > 0.0) & (score < 1.0)))   # sigmoid output range
    print("KERNEL_OK")
</pallas_src>

<mosaic_0001>
module attributes {stable_mosaic.version = 11 : i64} {
  func.func @gdn_kernel(%arg0: i32, %arg1: memref<256x64xf32, #tpu.memory_space<vmem>>, %arg2: memref<128x256xbf16, #tpu.memory_space<vmem>>, %arg3: memref<64x128xf32, #tpu.memory_space<vmem>>, %arg4: memref<128x64xf32, #tpu.memory_space<vmem>>, %arg5: memref<128xf32, #tpu.memory_space<smem>>, %arg6: memref<64x128xf32, #tpu.memory_space<vmem>>, %arg7: memref<1x128xf32, #tpu.memory_space<vmem>>, %arg8: memref<256x128xf32, #tpu.memory_space<vmem>>, %arg9: memref<256x128xf32, #tpu.memory_space<vmem>>, %arg10: memref<128x256xf32, #tpu.memory_space<vmem>>, %arg11: memref<128x256xf32, #tpu.memory_space<vmem>>, %arg12: memref<256x64xf32, #tpu.memory_space<vmem>>) attributes {dimension_semantics = [#tpu.dimension_semantics<arbitrary>], iteration_bounds = array<i64: 2>, scalar_prefetch = 0 : i64, scratch_operands = 4 : i64, tpu.core_type = #tpu.core_type<tc>, window_params = [{pipeline_mode = #tpu.pipeline_mode<synchronous>, transform_indices = @transform_0, window_bounds = array<i64: 256, 64>}, {transform_indices = @transform_1, window_bounds = array<i64: 128, 256>}, {pipeline_mode = #tpu.pipeline_mode<synchronous>, transform_indices = @transform_2, window_bounds = array<i64: 64, 128>}, {pipeline_mode = #tpu.pipeline_mode<synchronous>, transform_indices = @transform_3, window_bounds = array<i64: 128, 64>}, {transform_indices = @transform_4, window_bounds = array<i64: 128>}, {pipeline_mode = #tpu.pipeline_mode<synchronous>, transform_indices = @transform_5, window_bounds = array<i64: 64, 128>}, {pipeline_mode = #tpu.pipeline_mode<synchronous>, transform_indices = @transform_6, window_bounds = array<i64: 1, 128>}, {pipeline_mode = #tpu.pipeline_mode<synchronous>, transform_indices = @transform_7, window_bounds = array<i64: 256, 128>}]} {
    %c0_i32 = arith.constant 0 : i32
    %0 = arith.cmpi eq, %arg0, %c0_i32 : i32
    %1 = arith.extui %0 : i1 to i32
    %c0_i32_0 = arith.constant 0 : i32
    %2 = arith.cmpi ne, %1, %c0_i32_0 : i32
    scf.if %2 {
      %c0_27 = arith.constant 0 : index
      %c0_28 = arith.constant 0 : index
      %49 = vector.load %arg1[%c0_27, %c0_28] : memref<256x64xf32, #tpu.memory_space<vmem>>, vector<256x64xf32>
      %c0_29 = arith.constant 0 : index
      %c0_30 = arith.constant 0 : index
      %50 = vector.load %arg3[%c0_29, %c0_30] : memref<64x128xf32, #tpu.memory_space<vmem>>, vector<64x128xf32>
      %cst_31 = arith.constant dense<0.000000e+00> : vector<256x128xf32>
      %51 = tpu.matmul %49, %50, %cst_31 {dimension_numbers = #tpu.dot_dimension_numbers<[1], [0], [0], [1], [0, 0, 1, 1], [], []>} : vector<256x64xf32>, vector<64x128xf32>, vector<256x128xf32> -> vector<256x128xf32>
      %c0_32 = arith.constant 0 : index
      %c0_33 = arith.constant 0 : index
      %52 = vector.load %arg9[%c0_32, %c0_33] : memref<256x128xf32, #tpu.memory_space<vmem>>, vector<256x128xf32>
      tpu.vector_store %arg9[%c0_32, %c0_33], %51 {strides = array<i32>} : memref<256x128xf32, #tpu.memory_space<vmem>>, vector<256x128xf32>,
      %c0_34 = arith.constant 0 : index
      %c0_35 = arith.constant 0 : index
      %53 = vector.load %arg4[%c0_34, %c0_35] : memref<128x64xf32, #tpu.memory_space<vmem>>, vector<128x64xf32>
      %c0_36 = arith.constant 0 : index
      %c0_37 = arith.constant 0 : index
      %54 = vector.load %arg1[%c0_36, %c0_37] : memref<256x64xf32, #tpu.memory_space<vmem>>, vector<256x64xf32>
      %cst_38 = arith.constant dense<0.000000e+00> : vector<128x256xf32>
      %55 = tpu.matmul %53, %54, %cst_38 {dimension_numbers = #tpu.dot_dimension_numbers<[1], [1], [0], [0], [0, 0, 1, 0], [], []>} : vector<128x64xf32>, vector<256x64xf32>, vector<128x256xf32> -> vector<128x256xf32>
      %c0_39 = arith.constant 0 : index
      %c0_40 = arith.constant 0 : index
      %56 = vector.load %arg10[%c0_39, %c0_40] : memref<128x256xf32, #tpu.memory_space<vmem>>, vector<128x256xf32>
      tpu.vector_store %arg10[%c0_39, %c0_40], %55 {strides = array<i32>} : memref<128x256xf32, #tpu.memory_space<vmem>>, vector<128x256xf32>,
      %cst_41 = arith.constant 0.000000e+00 : f32
      %57 = vector.broadcast %cst_41 : f32 to vector<256x64xf32>
      %c0_42 = arith.constant 0 : index
      %c0_43 = arith.constant 0 : index
      %58 = vector.load %arg12[%c0_42, %c0_43] : memref<256x64xf32, #tpu.memory_space<vmem>>, vector<256x64xf32>
      tpu.vector_store %arg12[%c0_42, %c0_43], %57 {strides = array<i32>} : memref<256x64xf32, #tpu.memory_space<vmem>>, vector<256x64xf32>,
    } else {
    }
    %c128_i32 = arith.constant 128 : i32
    %3 = arith.muli %arg0, %c128_i32 : i32
    %4 = tpu.assume_multiple %3, 128 : i32
    %5 = arith.index_cast %4 : i32 to index
    %c0 = arith.constant 0 : index
    %6 = vector.load %arg9[%5, %c0] : memref<256x128xf32, #tpu.memory_space<vmem>>, vector<128x128xf32>
    %c0_1 = arith.constant 0 : index
    %c0_2 = arith.constant 0 : index
    %7 = vector.load %arg2[%c0_1, %c0_2] : memref<128x256xbf16, #tpu.memory_space<vmem>>, vector<128x256xbf16>
    %cst = arith.constant 0.000000e+00 : bf16
    %8 = vector.broadcast %cst : bf16 to vector<128x256xbf16>
    %9 = arith.cmpf ogt, %7, %8 : vector<128x256xbf16>
    %cst_3 = arith.constant 0.000000e+00 : f32
    %10 = vector.broadcast %cst_3 : f32 to vector<128x256xf32>
    %c0_4 = arith.constant 0 : index
    %c0_5 = arith.constant 0 : index
    %11 = vector.load %arg11[%c0_4, %c0_5] : memref<128x256xf32, #tpu.memory_space<vmem>>, vector<128x256xf32>
    tpu.vector_store %arg11[%c0_4, %c0_5], %10 {strides = array<i32>} : memref<128x256xf32, #tpu.memory_space<vmem>>, vector<128x256xf32>,
    %12 = tpu.iota {dimensions = array<i32: 0>} : vector<128x1xi32>
    %c0_i32_6 = arith.constant 0 : i32
    %c128_i32_7 = arith.constant 128 : i32
    %13 = arith.addi %c0_i32_6, %c128_i32_7 : i32
    %c1_i32 = arith.constant 1 : i32
    scf.for %arg13 = %c0_i32_6 to %13 step %c1_i32  : i32 {
      %49 = vector.broadcast %arg13 : i32 to vector<128x1xi32>
      %50 = arith.cmpi eq, %12, %49 : vector<128x1xi32>
      %51 = arith.extui %50 : vector<128x1xi1> to vector<128x1xi32>
      %52 = arith.sitofp %51 : vector<128x1xi32> to vector<128x1xf32>
      %cst_27 = arith.constant dense<0.000000e+00> : vector<128x1xf32>
      %53 = tpu.matmul %6, %52, %cst_27 {dimension_numbers = #tpu.dot_dimension_numbers<[1], [0], [0], [1], [0, 0, 1, 1], [], []>} : vector<128x128xf32>, vector<128x1xf32>, vector<128x1xf32> -> vector<128x1xf32>
      %54 = arith.index_cast %arg13 : i32 to index
      %c0_28 = arith.constant 0 : index
      %55 = vector.load %arg10[%54, %c0_28] : memref<128x256xf32, #tpu.memory_space<vmem>>, vector<1x256xf32>
      %56 = vector.broadcast %53 : vector<128x1xf32> to vector<128x256xf32>
      %57 = vector.broadcast %55 : vector<1x256xf32> to vector<128x256xf32>
      %58 = arith.addf %56, %57 : vector<128x256xf32>
      %cst_29 = arith.constant 0.000000e+00 : f32
      %59 = vector.broadcast %cst_29 : f32 to vector<128x256xf32>
      %60 = arith.cmpf oge, %58, %59 : vector<128x256xf32>
      %cst_30 = arith.constant 2.000000e-01 : f32
      %61 = vector.broadcast %cst_30 : f32 to vector<128x256xf32>
      %62 = arith.mulf %61, %58 : vector<128x256xf32>
      %63 = arith.select %60, %58, %62 : vector<128x256xi1>, vector<128x256xf32>
      %c0_31 = arith.constant 0 : index
      %c0_32 = arith.constant 0 : index
      %64 = vector.load %arg11[%c0_31, %c0_32] : memref<128x256xf32, #tpu.memory_space<vmem>>, vector<128x256xf32>
      %65 = arith.index_cast %arg13 : i32 to index
      %66 = memref.load %arg5[%65] : memref<128xf32, #tpu.memory_space<smem>>
      %67 = vector.broadcast %66 : f32 to vector<128x256xf32>
      %68 = arith.mulf %67, %63 : vector<128x256xf32>
      %69 = arith.addf %64, %68 : vector<128x256xf32>
      %c0_33 = arith.constant 0 : index
      %c0_34 = arith.constant 0 : index
      %70 = vector.load %arg11[%c0_33, %c0_34] : memref<128x256xf32, #tpu.memory_space<vmem>>, vector<128x256xf32>
      tpu.vector_store %arg11[%c0_33, %c0_34], %69 {strides = array<i32>} : memref<128x256xf32, #tpu.memory_space<vmem>>, vector<128x256xf32>,
    }
    %c128_i32_8 = arith.constant 128 : i32
    %c0_9 = arith.constant 0 : index
    %c0_10 = arith.constant 0 : index
    %14 = vector.load %arg11[%c0_9, %c0_10] : memref<128x256xf32, #tpu.memory_space<vmem>>, vector<128x256xf32>
    %cst_11 = arith.constant -1.000000e+30 : f32
    %15 = vector.broadcast %cst_11 : f32 to vector<128x256xf32>
    %16 = arith.select %9, %14, %15 : vector<128x256xi1>, vector<128x256xf32>
    %cst_12 = arith.constant dense<0xFF800000> : vector<128xf32>
    %17 = vector.multi_reduction <maximumf>, %16, %cst_12 [1] : vector<128x256xf32> to vector<128xf32>
    %18 = vector.shape_cast %17 : vector<128xf32> to vector<128x1xf32>
    %cst_13 = arith.constant -1.000000e+29 : f32
    %19 = vector.broadcast %cst_13 : f32 to vector<128x1xf32>
    %20 = arith.cmpf olt, %18, %19 : vector<128x1xf32>
    %cst_14 = arith.constant 0.000000e+00 : f32
    %21 = vector.broadcast %cst_14 : f32 to vector<128x1xf32>
    %22 = arith.select %20, %21, %18 : vector<128x1xi1>, vector<128x1xf32>
    %23 = vector.broadcast %22 : vector<128x1xf32> to vector<128x256xf32>
    %24 = arith.subf %14, %23 : vector<128x256xf32>
    %25 = math.exp %24 : vector<128x256xf32>
    %cst_15 = arith.constant 0.000000e+00 : f32
    %26 = vector.broadcast %cst_15 : f32 to vector<128x256xf32>
    %27 = arith.select %9, %25, %26 : vector<128x256xi1>, vector<128x256xf32>
    %cst_16 = arith.constant dense<0.000000e+00> : vector<128xf32>
    %28 = vector.multi_reduction <add>, %27, %cst_16 [1] : vector<128x256xf32> to vector<128xf32>
    %29 = vector.shape_cast %28 : vector<128xf32> to vector<128x1xf32>
    %cst_17 = arith.constant 0.000000e+00 : f32
    %30 = vector.broadcast %cst_17 : f32 to vector<128x1xf32>
    %31 = arith.cmpf ogt, %29, %30 : vector<128x1xf32>
    %cst_18 = arith.constant 1.000000e+00 : f32
    %32 = vector.broadcast %cst_18 : f32 to vector<128x1xf32>
    %33 = arith.select %31, %29, %32 : vector<128x1xi1>, vector<128x1xf32>
    %34 = tpu.reciprocal %33 {approx = true} : vector<128x1xf32> -> vector<128x1xf32>
    %35 = vector.broadcast %34 : vector<128x1xf32> to vector<128x256xf32>
    %36 = arith.mulf %27, %35 : vector<128x256xf32>
    %37 = arith.index_cast %4 : i32 to index
    %c0_19 = arith.constant 0 : index
    %38 = vector.load %arg1[%37, %c0_19] : memref<256x64xf32, #tpu.memory_space<vmem>>, vector<128x64xf32>
    %c0_20 = arith.constant 0 : index
    %c0_21 = arith.constant 0 : index
    %39 = vector.load %arg12[%c0_20, %c0_21] : memref<256x64xf32, #tpu.memory_space<vmem>>, vector<256x64xf32>
    %40 = tpu.transpose %36, [1, 0] : vector<128x256xf32> -> vector<256x128xf32>
    %41 = arith.truncf %40 : vector<256x128xf32> to vector<256x128xbf16>
    %42 = arith.truncf %38 : vector<128x64xf32> to vector<128x64xbf16>
    %cst_22 = arith.constant dense<0.000000e+00> : vector<256x64xf32>
    %43 = tpu.matmul %41, %42, %cst_22 {dimension_numbers = #tpu.dot_dimension_numbers<[1], [0], [0], [1], [0, 0, 1, 1], [], []>} : vector<256x128xbf16>, vector<128x64xbf16>, vector<256x64xf32> -> vector<256x64xf32>
    %44 = arith.addf %39, %43 : vector<256x64xf32>
    %c0_23 = arith.constant 0 : index
    %c0_24 = arith.constant 0 : index
    %45 = vector.load %arg12[%c0_23, %c0_24] : memref<256x64xf32, #tpu.memory_space<vmem>>, vector<256x64xf32>
    tpu.vector_store %arg12[%c0_23, %c0_24], %44 {strides = array<i32>} : memref<256x64xf32, #tpu.memory_space<vmem>>, vector<256x64xf32>,
    %c1_i32_25 = arith.constant 1 : i32
    %46 = arith.cmpi eq, %arg0, %c1_i32_25 : i32
    %47 = arith.extui %46 : i1 to i32
    %c0_i32_26 = arith.constant 0 : i32
    %48 = arith.cmpi ne, %47, %c0_i32_26 : i32
    scf.if %48 {
      %c0_27 = arith.constant 0 : index
      %c0_28 = arith.constant 0 : index
      %49 = vector.load %arg12[%c0_27, %c0_28] : memref<256x64xf32, #tpu.memory_space<vmem>>, vector<256x64xf32>
      %c0_29 = arith.constant 0 : index
      %c0_30 = arith.constant 0 : index
      %50 = vector.load %arg6[%c0_29, %c0_30] : memref<64x128xf32, #tpu.memory_space<vmem>>, vector<64x128xf32>
      %cst_31 = arith.constant dense<0.000000e+00> : vector<256x128xf32>
      %51 = tpu.matmul %49, %50, %cst_31 {dimension_numbers = #tpu.dot_dimension_numbers<[1], [0], [0], [1], [0, 0, 1, 1], [], []>} : vector<256x64xf32>, vector<64x128xf32>, vector<256x128xf32> -> vector<256x128xf32>
      %c0_32 = arith.constant 0 : index
      %c0_33 = arith.constant 0 : index
      %52 = vector.load %arg7[%c0_32, %c0_33] : memref<1x128xf32, #tpu.memory_space<vmem>>, vector<1x128xf32>
      %53 = vector.broadcast %52 : vector<1x128xf32> to vector<256x128xf32>
      %54 = arith.addf %51, %53 : vector<256x128xf32>
      %cst_34 = arith.constant 0.000000e+00 : f32
      %55 = vector.broadcast %cst_34 : f32 to vector<256x128xf32>
      %56 = arith.maximumf %54, %55 : vector<256x128xf32>
      %c0_35 = arith.constant 0 : index
      %c0_36 = arith.constant 0 : index
      %57 = vector.load %arg8[%c0_35, %c0_36] : memref<256x128xf32, #tpu.memory_space<vmem>>, vector<256x128xf32>
      tpu.vector_store %arg8[%c0_35, %c0_36], %56 {strides = array<i32>} : memref<256x128xf32, #tpu.memory_space<vmem>>, vector<256x128xf32>,
    } else {
    }
    return
  }
  func.func @transform_0(%arg0: i32) -> (i32, i32) {
    %c0_i32 = arith.constant 0 : i32
    %c0_i32_0 = arith.constant 0 : i32
    %c0_i32_1 = arith.constant 0 : i32
    return %c0_i32, %c0_i32_0 : i32, i32
  }
  func.func @transform_1(%arg0: i32) -> (i32, i32) {
    %c0_i32 = arith.constant 0 : i32
    %c0_i32_0 = arith.constant 0 : i32
    return %arg0, %c0_i32 : i32, i32
  }
  func.func @transform_2(%arg0: i32) -> (i32, i32) {
    %c0_i32 = arith.constant 0 : i32
    %c0_i32_0 = arith.constant 0 : i32
    %c0_i32_1 = arith.constant 0 : i32
    return %c0_i32, %c0_i32_0 : i32, i32
  }
  func.func @transform_3(%arg0: i32) -> (i32, i32) {
    %c0_i32 = arith.constant 0 : i32
    %c0_i32_0 = arith.constant 0 : i32
    %c0_i32_1 = arith.constant 0 : i32
    return %c0_i32, %c0_i32_0 : i32, i32
  }
  func.func @transform_4(%arg0: i32) -> i32 {
    %c0_i32 = arith.constant 0 : i32
    %c0_i32_0 = arith.constant 0 : i32
    return %c0_i32 : i32
  }
  func.func @transform_5(%arg0: i32) -> (i32, i32) {
    %c0_i32 = arith.constant 0 : i32
    %c0_i32_0 = arith.constant 0 : i32
    %c0_i32_1 = arith.constant 0 : i32
    return %c0_i32, %c0_i32_0 : i32, i32
  }
  func.func @transform_6(%arg0: i32) -> (i32, i32) {
    %c0_i32 = arith.constant 0 : i32
    %c0_i32_0 = arith.constant 0 : i32
    %c0_i32_1 = arith.constant 0 : i32
    return %c0_i32, %c0_i32_0 : i32, i32
  }
  func.func @transform_7(%arg0: i32) -> (i32, i32) {
    %c0_i32 = arith.constant 0 : i32
    %c0_i32_0 = arith.constant 0 : i32
    %c0_i32_1 = arith.constant 0 : i32
    return %c0_i32, %c0_i32_0 : i32, i32
  }
}

</mosaic_0001>

<bundles_post_ra>
// kernel: tpu_custom_call.1
= control target key start
LH: loop header
LB: loop body
LE: loop exit
PB: predicated region body
PF: predicated region fallthrough
CT: control target
= control target key end

     0   :  { %12 = vsyncpa [#allocation8], 0  ;;  %s4765_s0 = inlined_call_operand.vmem [shape: f32[256,64], index: 0, kind: input, shape index: {}]   ;;  %s4766_s1 = inlined_call_operand.vmem [shape: bf16[256,256], index: 1, kind: input, shape index: {}]   ;;  %s4767_s2 = inlined_call_operand.vmem [shape: f32[64,128], index: 2, kind: input, shape index: {}]   ;;  %s4768_s3 = inlined_call_operand.vmem [shape: f32[128,64], index: 3, kind: input, shape index: {}]   ;;  %s4769_s4 = inlined_call_operand.vmem [shape: f32[128], index: 4, kind: input, shape index: {}]   ;;  %s4770_s5 = inlined_call_operand.vmem [shape: f32[64,128], index: 5, kind: input, shape index: {}]   ;;  %s4771_s6 = inlined_call_operand.vmem [shape: f32[1,128], index: 6, kind: input, shape index: {}]   ;;  %s4772_s7 = inlined_call_operand.hbm [shape: f32[256,128], index: 7, kind: output, shape index: {}]  }
   0x1   :  { %13 = vsyncpa [#allocation7], 0  ;;  %s3328_s24 = smov 0  }
   0x2 LB: > { %s3334_s25 = sadd.s32 4294967295, %s3274_s24   ;;  %p2662_p0 = scmp.ge.s32.totalorder %s3274_s24, 1  ;;  %s3274_s24 = sphi %s3328_s24, %s19_s24  }
   0x3   : > { %p197_p1 = scmp.lt.s32.totalorder %s3274_s24, 3  ;;  %p2663_p2 = scmp.ne.s32.totalorder %s3334_s25, 0 }
   0x4   : > { %s218_s28 = sshll.u32 %s4769_s4, 4  ;;  %p2973_p4 = scmp.eq.s32.totalorder %s3334_s25, 0  ;;  %s219_s28 = int_to_ptr.vmem [resolvable:$true] %s218_s28 }
   0x5   : > { %p198_p3 = pnand %p2662_p0, %p197_p1  ;;  %s3280_s29 = smov [#allocation6]  }
   0x7   : > { %p2969_p5 = pneg %p198_p3  ;;  %247 = sbr.rel (%p198_p3) target bundleno = 1649 (0x671), region = 48 }
   0x9   : > { %p2970_p6 = pnand %p2973_p4, %p2969_p5 }
   0xb   : > { %2972 = dma.vmem_to_smem (!%p2970_p6), %s219_s28, 16, %s3280_s29, [#allocation8]  }
   0xc   : > { %3265 = dma.done.wait (%p2973_p4), [#allocation8], 16  }
   0xd   : > { %3267 = vsyncadd (%p2973_p4), [#allocation8], 4294967280 }
   0xe   : > { %254 = sfence }
   0xf   : > { %s2667_s30 = sshll.u32 %s3334_s25, 4 }
  0x10   : > { %p278_p7 = scmp.lt.s32.totalorder %s2667_s30, 31  ;;  %287 = sbr.rel (%p2663_p2) target bundleno = 338 (0x152), region = 56 }
  0x12   : > { %s5012_s30 = smov (!%p278_p7, %s2667_s30), 31 }
  0x13   : > { %s2839_s8 = sshll.u32 %s5012_s30, 3 }
  0x14   : > { %s3347_s11 = scalar_lea.vmem %s4766_s1, %s2839_s8 }
  0x15   : > { %vm328_vm0 = vcmask 523264   ;;  %v3354_v0 = vld [vmem:[%s4765_s0 + $0xf8] sm:$0xff]  ;;  %v3361_v1 = vld [vmem:[%s4765_s0 + $0xf0] sm:$0xff]  ;;  %v325_v5 = vld [vmem:[%s4767_s2 + $0x28] sm:$0xff] }
  0x16   : > { %2735 = vmatpush.xpose.msk.msra.mxu2 %vm328_vm0, %v3354_v0  ;;  %v327_v2 = vld [vmem:[%s4767_s2 + $0x38] sm:$0xff]  ;;  %v326_v4 = vld [vmem:[%s4767_s2 + $0x30] sm:$0xff]  ;;  %v3389_v7 = vld [vmem:[%s4765_s0 + $0xe8] sm:$0xff] }
  0x17   : > { %433 = vmatpush.msra.mxu0 %v327_v2  ;;  %v3369_v3 = vld [vmem:[%s4765_s0 + $0x78] sm:$0xff]  ;;  %2841 = vmatpush.msra.mxu3 %v327_v2  ;;  %v3384_v6 = vld [vmem:[%s4765_s0 + $0x70] sm:$0xff]  ;;  %v324_v8 = vld [vmem:[%s4767_s2 + $0x20] sm:$0xff] }
  0x18   : > { %2703 = vmatpush.xpose.msk.msra.mxu1 %vm328_vm0, %v3369_v3  ;;  %v323_v9 = vld [vmem:[%s4767_s2 + $0x18] sm:$0xff]  ;;  %v3404_v10 = vld [vmem:[%s4765_s0 + $0x68] sm:$0xff]  ;;  %v3409_v11 = vld [vmem:[%s4765_s0 + $0xe0] sm:$0xff] }
  0x19   : > { %434 = vmatpush.msra.mxu0 %v326_v4  ;;  %2842 = vmatpush.msra.mxu3 %v326_v4  ;;  %v322_v12 = vld [vmem:[%s4767_s2 + $0x10] sm:$0xff]  ;;  %v321_v13 = vld [vmem:[%s4767_s2 + $0x8] sm:$0xff]  ;;  %v3424_v14 = vld [vmem:[%s4765_s0 + $0x60] sm:$0xff] }
  0x1a   : > { %2736 = vmatpush.xpose.msk.msra.mxu2 %vm328_vm0, %v3361_v1  ;;  %v3429_v15 = vld [vmem:[%s4765_s0 + $0xd8] sm:$0xff]  ;;  %v320_v16 = vld [vmem:[%s4767_s2] sm:$0xff]  ;;  %v3451_v19 = vld [vmem:[%s4765_s0 + $0xd0] sm:$0xff] }
  0x1b   : > { %435 = vmatpush.msra.mxu0 %v325_v5  ;;  %2843 = vmatpush.msra.mxu3 %v325_v5  ;;  %v3437_v17 = vld [vmem:[%s4765_s0] sm:$0xff]  ;;  %v3446_v18 = vld [vmem:[%s4765_s0 + $0x58] sm:$0xff]  ;;  %v3468_v21 = vld [vmem:[%s4765_s0 + $0x50] sm:$0xff] }
  0x1c   : > { %2704 = vmatpush.xpose.msk.msra.mxu1 %vm328_vm0, %v3384_v6  ;;  %v605_v20 = vld [vmem:[%s4765_s0 + $0x98] sm:$0xff]  ;;  %v3473_v22 = vld [vmem:[%s4765_s0 + $0xc8] sm:$0xff]  ;;  %v610_v25 = vld [vmem:[%s4765_s0 + $0xc0] sm:$0xff] }
  0x1d   : > { %436 = vmatpush.msra.mxu0 %v324_v8  ;;  %2844 = vmatpush.msra.mxu3 %v324_v8  ;;  %v3478_v23 = vld [vmem:[%s4765_s0 + $0x8] sm:$0xff]  ;;  %v606_v26 = vld [vmem:[%s4765_s0 + $0xa0] sm:$0xff]  ;;  %v609_v28 = vld [vmem:[%s4765_s0 + $0xb8] sm:$0xff] }
  0x1e   : > { %2737 = vmatpush.xpose.msk.msra.mxu2 %vm328_vm0, %v3389_v7  ;;  %v3489_v24 = vld [vmem:[%s4765_s0 + $0x48] sm:$0xff]  ;;  %v3508_v27 = vld [vmem:[%s4765_s0 + $0x40] sm:$0xff]  ;;  %v290_v29 = vld [vmem:[%s4765_s0 + $0x10] sm:$0xff] }
  0x1f   : > { %437 = vmatpush.msra.mxu0 %v323_v9  ;;  %2845 = vmatpush.msra.mxu3 %v323_v9  ;;  %v593_v30 = vld [vmem:[%s4765_s0 + $0x38] sm:$0xff]  ;;  %v608_v31 = vld [vmem:[%s4765_s0 + $0xb0] sm:$0xff]  ;;  %v607_v32 = vld [vmem:[%s4765_s0 + $0xa8] sm:$0xff] }
  0x20   : > { %2705 = vmatpush.xpose.msk.msra.mxu1 %vm328_vm0, %v3404_v10  ;;  %v592_v33 = vld [vmem:[%s4765_s0 + $0x30] sm:$0xff]  ;;  %v291_v34 = vld [vmem:[%s4765_s0 + $0x18] sm:$0xff]  ;;  %v591_v35 = vld [vmem:[%s4765_s0 + $0x28] sm:$0xff] }
  0x21   : > { %438 = vmatpush.msra.mxu0 %v322_v12  ;;  %2846 = vmatpush.msra.mxu3 %v322_v12  ;;  %v590_v36 = vld [vmem:[%s4765_s0 + $0x20] sm:$0xff]  ;;  %v3565_v37 = vld [vmem:[%s4765_s0 + $0x90] sm:$0xff]  ;;  %v3576_v38 = vld [vmem:[%s4765_s0 + $0x88] sm:$0xff] }
  0x22   : > { %2738 = vmatpush.xpose.msk.msra.mxu2 %vm328_vm0, %v3409_v11  ;;  %v3585_v39 = vld [vmem:[%s4765_s0 + $0x80] sm:$0xff]  ;;  %v571_v41 = vld [vmem:[%s4768_s3 + $0x8] sm:$0xff]  ;;  %v572_v42 = vld [vmem:[%s4768_s3 + $0x10] sm:$0xff] }
  0x23   : > { %439 = vmatpush.msra.mxu0 %v321_v13  ;;  %2847 = vmatpush.msra.mxu3 %v321_v13  ;;  %v570_v40 = vld [vmem:[%s4768_s3] sm:$0xff]  ;;  %v573_v43 = vld [vmem:[%s4768_s3 + $0x18] sm:$0xff]  ;;  %v575_v45 = vld [vmem:[%s4768_s3 + $0x28] sm:$0xff] }
  0x24   : > { %2706 = vmatpush.xpose.msk.msra.mxu1 %vm328_vm0, %v3424_v14  ;;  %v574_v44 = vld [vmem:[%s4768_s3 + $0x20] sm:$0xff]  ;;  %v576_v46 = vld [vmem:[%s4768_s3 + $0x30] sm:$0xff]  ;;  %v577_v47 = vld [vmem:[%s4768_s3 + $0x38] sm:$0xff] }
  0x25   : > { %440 = vmatpush.msra.mxu0 %v320_v16  ;;  %2848 = vmatpush.msra.mxu3 %v320_v16  ;;  %v578_v48 = vld [vmem:[%s4768_s3 + $0x40] sm:$0xff]  ;;  %v583_v49 = vld [vmem:[%s4768_s3 + $0x68] sm:$0xff]  ;;  %v584_v51 = vld [vmem:[%s4768_s3 + $0x70] sm:$0xff] }
  0x26   : > { %2739 = vmatpush.xpose.msk.msra.mxu2 %vm328_vm0, %v3429_v15  ;;  %2671 = vmatmul.msk.f32.vlgmr.msra.gmra.mxu0 %vm328_vm0, %v3437_v17  ;;  %v579_v50 = vld [vmem:[%s4768_s3 + $0x48] sm:$0xff]  ;;  %v580_v52 = vld [vmem:[%s4768_s3 + $0x50] sm:$0xff]  ;;  %v585_v54 = vld [vmem:[%s4768_s3 + $0x78] sm:$0xff] }
  0x27   : > { %2690 = vmatmul.msk.f32.vlgmr.msra.gmra.mxu3 %vm328_vm0, %v605_v20  ;;  %v581_v55 = vld [vmem:[%s4768_s3 + $0x58] sm:$0xff]  ;;  %v582_v58 = vld [vmem:[%s4768_s3 + $0x60] sm:$0xff] }
  0x28   : > { %2707 = vmatpush.xpose.msk.msra.mxu1 %vm328_vm0, %v3446_v18  ;;  %2849 = vmatpush.xpose.msk.msrb.mxu3 %vm328_vm0, %v3369_v3 }
  0x2a   : > { %2740 = vmatpush.xpose.msk.msra.mxu2 %vm328_vm0, %v3451_v19 }
  0x2c   : > { %2708 = vmatpush.xpose.msk.msra.mxu1 %vm328_vm0, %v3468_v21  ;;  %2850 = vmatpush.xpose.msk.msrb.mxu3 %vm328_vm0, %v3384_v6 }
  0x2e   : > { %2741 = vmatpush.xpose.msk.msra.mxu2 %vm328_vm0, %v3473_v22  ;;  %2672 = vmatmul.msk.f32.gmra.mxu0 %vm328_vm0, %v3478_v23 }
  0x2f   : > { %2691 = vmatmul.msk.f32.gmra.mxu3 %vm328_vm0, %v606_v26 }
  0x30   : > { %2709 = vmatpush.xpose.msk.msra.mxu1 %vm328_vm0, %v3489_v24  ;;  %2851 = vmatpush.xpose.msk.msrb.mxu3 %vm328_vm0, %v3404_v10 }
  0x32   : > { %2742 = vmatpush.xpose.msk.msra.mxu2 %vm328_vm0, %v610_v25 }
  0x34   : > { %2710 = vmatpush.xpose.msk.msra.mxu1 %vm328_vm0, %v3508_v27  ;;  %2852 = vmatpush.xpose.msk.msrb.mxu3 %vm328_vm0, %v3424_v14 }
  0x36   : > { %2743 = vmatpush.xpose.msk.msra.mxu2 %vm328_vm0, %v609_v28  ;;  %2673 = vmatmul.msk.f32.gmra.mxu0 %vm328_vm0, %v290_v29 }
  0x37   : > { %2692 = vmatmul.msk.f32.gmra.mxu3 %vm328_vm0, %v607_v32 }
  0x38   : > { %2711 = vmatpush.xpose.msk.msra.mxu1 %vm328_vm0, %v593_v30  ;;  %2853 = vmatpush.xpose.msk.msrb.mxu3 %vm328_vm0, %v3446_v18 }
  0x3a   : > { %2744 = vmatpush.xpose.msk.msra.mxu2 %vm328_vm0, %v608_v31 }
  0x3c   : > { %2712 = vmatpush.xpose.msk.msra.mxu1 %vm328_vm0, %v592_v33  ;;  %2854 = vmatpush.xpose.msk.msrb.mxu3 %vm328_vm0, %v3468_v21 }
  0x3e   : > { %2745 = vmatpush.xpose.msk.msra.mxu2 %vm328_vm0, %v607_v32  ;;  %2674 = vmatmul.msk.f32.gmra.mxu0 %vm328_vm0, %v291_v34 }
  0x3f   : > { %2693 = vmatmul.msk.f32.gmra.mxu3 %vm328_vm0, %v608_v31 }
  0x40   : > { %2713 = vmatpush.xpose.msk.msra.mxu1 %vm328_vm0, %v591_v35  ;;  %2855 = vmatpush.xpose.msk.msrb.mxu3 %vm328_vm0, %v3489_v24 }
  0x42   : > { %2746 = vmatpush.xpose.msk.msra.mxu2 %vm328_vm0, %v606_v26 }
  0x44   : > { %2714 = vmatpush.xpose.msk.msra.mxu1 %vm328_vm0, %v590_v36  ;;  %2856 = vmatpush.xpose.msk.msrb.mxu3 %vm328_vm0, %v3508_v27 }
  0x46   : > { %2747 = vmatpush.xpose.msk.msra.mxu2 %vm328_vm0, %v605_v20  ;;  %2675 = vmatmul.msk.f32.gmra.mxu0 %vm328_vm0, %v590_v36 }
  0x47   : > { %2694 = vmatmul.msk.f32.gmra.mxu3 %vm328_vm0, %v609_v28 }
  0x48   : > { %2715 = vmatpush.xpose.msk.msra.mxu1 %vm328_vm0, %v291_v34  ;;  %2857 = vmatpush.xpose.msk.msrb.mxu3 %vm328_vm0, %v593_v30 }
  0x4a   : > { %2748 = vmatpush.xpose.msk.msra.mxu2 %vm328_vm0, %v3565_v37 }
  0x4c   : > { %2716 = vmatpush.xpose.msk.msra.mxu1 %vm328_vm0, %v290_v29  ;;  %2858 = vmatpush.xpose.msk.msrb.mxu3 %vm328_vm0, %v592_v33 }
  0x4e   : > { %2749 = vmatpush.xpose.msk.msra.mxu2 %vm328_vm0, %v3576_v38  ;;  %2676 = vmatmul.msk.f32.gmra.mxu0 %vm328_vm0, %v591_v35 }
  0x4f   : > { %2695 = vmatmul.msk.f32.gmra.mxu3 %vm328_vm0, %v610_v25 }
  0x50   : > { %2717 = vmatpush.xpose.msk.msra.mxu1 %vm328_vm0, %v3478_v23  ;;  %2859 = vmatpush.xpose.msk.msrb.mxu3 %vm328_vm0, %v591_v35 }
  0x52   : > { %2750 = vmatpush.xpose.msk.msra.mxu2 %vm328_vm0, %v3585_v39 }
  0x54   : > { %2718 = vmatpush.xpose.msk.msra.mxu1 %vm328_vm0, %v3437_v17  ;;  %2860 = vmatpush.xpose.msk.msrb.mxu3 %vm328_vm0, %v590_v36 }
  0x55   : > { %2751 = vmatmul.msk.f32.vlgmr.msra.gmra.mxu2 %vm328_vm0, %v570_v40 }
  0x56   : > { %2677 = vmatmul.msk.f32.gmra.mxu0 %vm328_vm0, %v592_v33 }
  0x57   : > { %2719 = vmatmul.msk.f32.vlgmr.msra.gmra.mxu1 %vm328_vm0, %v570_v40  ;;  %2696 = vmatmul.msk.f32.gmra.mxu3 %vm328_vm0, %v3473_v22 }
  0x58   : > { %2861 = vmatpush.xpose.msk.msrb.mxu3 %vm328_vm0, %v291_v34 }
  0x5c   : > { %2862 = vmatpush.xpose.msk.msrb.mxu3 %vm328_vm0, %v290_v29 }
  0x5d   : > { %2752 = vmatmul.msk.f32.gmra.mxu2 %vm328_vm0, %v571_v41 }
  0x5e   : > { %2678 = vmatmul.msk.f32.gmra.mxu0 %vm328_vm0, %v593_v30 }
  0x5f   : > { %2720 = vmatmul.msk.f32.gmra.mxu1 %vm328_vm0, %v571_v41  ;;  %2697 = vmatmul.msk.f32.gmra.mxu3 %vm328_vm0, %v3451_v19 }
  0x60   : > { %2863 = vmatpush.xpose.msk.msrb.mxu3 %vm328_vm0, %v3478_v23 }
  0x64   : > { %2864 = vmatpush.xpose.msk.msrb.mxu3 %vm328_vm0, %v3437_v17 }
  0x65   : > { %2753 = vmatmul.msk.f32.gmra.mxu2 %vm328_vm0, %v572_v42 }
  0x66   : > { %2679 = vmatmul.msk.f32.gmra.mxu0 %vm328_vm0, %v3508_v27 }
  0x67   : > { %2721 = vmatmul.msk.f32.gmra.mxu1 %vm328_vm0, %v572_v42  ;;  %2698 = vmatmul.msk.f32.gmra.mxu3 %vm328_vm0, %v3429_v15 }
  0x6d   : > { %2754 = vmatmul.msk.f32.gmra.mxu2 %vm328_vm0, %v573_v43 }
  0x6e   : > { %2680 = vmatmul.msk.f32.gmra.mxu0 %vm328_vm0, %v3489_v24 }
  0x6f   : > { %2722 = vmatmul.msk.f32.gmra.mxu1 %vm328_vm0, %v573_v43  ;;  %2699 = vmatmul.msk.f32.gmra.mxu3 %vm328_vm0, %v3409_v11 }
  0x75   : > { %2755 = vmatmul.msk.f32.gmra.mxu2 %vm328_vm0, %v574_v44 }
  0x76   : > { %2681 = vmatmul.msk.f32.gmra.mxu0 %vm328_vm0, %v3468_v21 }
  0x77   : > { %2723 = vmatmul.msk.f32.gmra.mxu1 %vm328_vm0, %v574_v44  ;;  %2700 = vmatmul.msk.f32.gmra.mxu3 %vm328_vm0, %v3389_v7 }
  0x7d   : > { %2756 = vmatmul.msk.f32.gmra.mxu2 %vm328_vm0, %v575_v45 }
  0x7e   : > { %2682 = vmatmul.msk.f32.gmra.mxu0 %vm328_vm0, %v3446_v18 }
  0x7f   : > { %2724 = vmatmul.msk.f32.gmra.mxu1 %vm328_vm0, %v575_v45  ;;  %2701 = vmatmul.msk.f32.gmra.mxu3 %vm328_vm0, %v3361_v1 }
  0x85   : > { %2757 = vmatmul.msk.f32.gmra.mxu2 %vm328_vm0, %v576_v46 }
  0x86   : > { %2683 = vmatmul.msk.f32.gmra.mxu0 %vm328_vm0, %v3424_v14 }
  0x87   : > { %2725 = vmatmul.msk.f32.gmra.mxu1 %vm328_vm0, %v576_v46  ;;  %2702 = vmatmul.msk.f32.gmra.mxu3 %vm328_vm0, %v3354_v0 }
  0x8d   : > { %2758 = vmatmul.msk.f32.gmra.mxu2 %vm328_vm0, %v577_v47 }
  0x8e   : > { %2684 = vmatmul.msk.f32.gmra.mxu0 %vm328_vm0, %v3404_v10 }
  0x8f   : > { %2726 = vmatmul.msk.f32.gmra.mxu1 %vm328_vm0, %v577_v47  ;;  %2732 = vmatmul.msk.f32.vlgmr.msrb.gmra.mxu3 %vm328_vm0, %v583_v49 }
  0x95   : > { %2759 = vmatmul.msk.f32.gmra.mxu2 %vm328_vm0, %v578_v48 }
  0x96   : > { %2685 = vmatmul.msk.f32.gmra.mxu0 %vm328_vm0, %v3384_v6 }
  0x97   : > { %2727 = vmatmul.msk.f32.gmra.mxu1 %vm328_vm0, %v578_v48  ;;  %2733 = vmatmul.msk.f32.gmra.mxu3 %vm328_vm0, %v584_v51 }
  0x9d   : > { %2760 = vmatmul.msk.f32.gmra.mxu2 %vm328_vm0, %v579_v50 }
  0x9e   : > { %2686 = vmatmul.msk.f32.gmra.mxu0 %vm328_vm0, %v3369_v3 }
  0x9f   : > { %2728 = vmatmul.msk.f32.gmra.mxu1 %vm328_vm0, %v579_v50  ;;  %2734 = vmatmul.msk.f32.gmra.mxu3 %vm328_vm0, %v585_v54  ;;  %v3281_v50 = vmov 0.0  }
  0xa0   : > { %924 = vst.msk [vmem:[#allocation5] sm:$0xff] %vm328_vm0, %v3281_v50 }
  0xa1   : > { %925 = vst.msk [vmem:[#allocation5 + $0x8] sm:$0xff] %vm328_vm0, %v3281_v50 }
  0xa2   : > { %926 = vst.msk [vmem:[#allocation5 + $0x10] sm:$0xff] %vm328_vm0, %v3281_v50 }
  0xa3   : > { %v442_v53 = vpop.f32.mrf.mxu0  ;;  %927 = vst.msk [vmem:[#allocation5 + $0x18] sm:$0xff] %vm328_vm0, %v3281_v50 }
  0xa4   : > { %538 = vst [vmem:[#allocation2] sm:$0xff] %v442_v53 }
  0xa5   : > { %2761 = vmatmul.msk.f32.gmra.mxu2 %vm328_vm0, %v580_v52  ;;  %928 = vst.msk [vmem:[#allocation5 + $0x20] sm:$0xff] %vm328_vm0, %v3281_v50 }
  0xa6   : > { %2687 = vmatmul.msk.f32.gmra.mxu0 %vm328_vm0, %v3585_v39  ;;  %929 = vst.msk [vmem:[#allocation5 + $0x28] sm:$0xff] %vm328_vm0, %v3281_v50 }
  0xa7   : > { %2729 = vmatmul.msk.f32.gmra.mxu1 %vm328_vm0, %v580_v52  ;;  %930 = vst.msk [vmem:[#allocation5 + $0x30] sm:$0xff] %vm328_vm0, %v3281_v50 }
  0xa8   : > { %931 = vst.msk [vmem:[#allocation5 + $0x38] sm:$0xff] %vm328_vm0, %v3281_v50 }
  0xa9   : > { %932 = vst.msk [vmem:[#allocation5 + $0x40] sm:$0xff] %vm328_vm0, %v3281_v50 }
  0xaa   : > { %v499_v57 = vpop.f32.mrf.mxu3  ;;  %933 = vst.msk [vmem:[#allocation5 + $0x48] sm:$0xff] %vm328_vm0, %v3281_v50 }
  0xab   : > { %v445_v56 = vpop.f32.mrf.mxu0  ;;  %557 = vst [vmem:[#allocation2 + $0x98] sm:$0xff] %v499_v57 }
  0xac   : > { %539 = vst [vmem:[#allocation2 + $0x8] sm:$0xff] %v445_v56 }
  0xad   : > { %2762 = vmatmul.msk.f32.gmra.mxu2 %vm328_vm0, %v581_v55  ;;  %934 = vst.msk [vmem:[#allocation5 + $0x50] sm:$0xff] %vm328_vm0, %v3281_v50 }
  0xae   : > { %2688 = vmatmul.msk.f32.gmra.mxu0 %vm328_vm0, %v3576_v38  ;;  %935 = vst.msk [vmem:[#allocation5 + $0x58] sm:$0xff] %vm328_vm0, %v3281_v50 }
  0xaf   : > { %2730 = vmatmul.msk.f32.gmra.mxu1 %vm328_vm0, %v581_v55  ;;  %936 = vst.msk [vmem:[#allocation5 + $0x60] sm:$0xff] %vm328_vm0, %v3281_v50 }
  0xb0   : > { %937 = vst.msk [vmem:[#allocation5 + $0x68] sm:$0xff] %vm328_vm0, %v3281_v50 }
  0xb1   : > { %938 = vst.msk [vmem:[#allocation5 + $0x70] sm:$0xff] %vm328_vm0, %v3281_v50 }
  0xb2   : > { %v502_v60 = vpop.f32.mrf.mxu3  ;;  %939 = vst.msk [vmem:[#allocation5 + $0x78] sm:$0xff] %vm328_vm0, %v3281_v50 }
  0xb3   : > { %v448_v59 = vpop.f32.mrf.mxu0  ;;  %558 = vst [vmem:[#allocation2 + $0xa0] sm:$0xff] %v502_v60 }
  0xb4   : > { %540 = vst [vmem:[#allocation2 + $0x10] sm:$0xff] %v448_v59 }
  0xb5   : > { %2763 = vmatmul.msk.f32.gmra.mxu2 %vm328_vm0, %v582_v58  ;;  %940 = vst.msk [vmem:[#allocation5 + $0x80] sm:$0xff] %vm328_vm0, %v3281_v50 }
  0xb6   : > { %2689 = vmatmul.msk.f32.gmra.mxu0 %vm328_vm0, %v3565_v37  ;;  %941 = vst.msk [vmem:[#allocation5 + $0x88] sm:$0xff] %vm328_vm0, %v3281_v50 }
  0xb7   : > { %2731 = vmatmul.msk.f32.gmra.mxu1 %vm328_vm0, %v582_v58  ;;  %942 = vst.msk [vmem:[#allocation5 + $0x90] sm:$0xff] %vm328_vm0, %v3281_v50 }
  0xb8   : > { %943 = vst.msk [vmem:[#allocation5 + $0x98] sm:$0xff] %vm328_vm0, %v3281_v50 }
  0xb9   : > { %944 = vst.msk [vmem:[#allocation5 + $0xa0] sm:$0xff] %vm328_vm0, %v3281_v50 }
  0xba   : > { %v505_v62 = vpop.f32.mrf.mxu3  ;;  %945 = vst.msk [vmem:[#allocation5 + $0xa8] sm:$0xff] %vm328_vm0, %v3281_v50 }
  0xbb   : > { %v451_v61 = vpop.f32.mrf.mxu0  ;;  %559 = vst [vmem:[#allocation2 + $0xa8] sm:$0xff] %v505_v62 }
  0xbc   : > { %541 = vst [vmem:[#allocation2 + $0x18] sm:$0xff] %v451_v61 }
  0xbd   : > { %2764 = vmatmul.msk.f32.gmra.mxu2 %vm328_vm0, %v583_v49  ;;  %946 = vst.msk [vmem:[#allocation5 + $0xb0] sm:$0xff] %vm328_vm0, %v3281_v50 }
  0xbe   : > { %947 = vst.msk [vmem:[#allocation5 + $0xb8] sm:$0xff] %vm328_vm0, %v3281_v50 }
  0xbf   : > { %948 = vst.msk [vmem:[#allocation5 + $0xc0] sm:$0xff] %vm328_vm0, %v3281_v50 }
  0xc0   : > { %949 = vst.msk [vmem:[#allocation5 + $0xc8] sm:$0xff] %vm328_vm0, %v3281_v50 }
  0xc1   : > { %950 = vst.msk [vmem:[#allocation5 + $0xd0] sm:$0xff] %vm328_vm0, %v3281_v50 }
  0xc2   : > { %v508_v0 = vpop.f32.mrf.mxu3  ;;  %951 = vst.msk [vmem:[#allocation5 + $0xd8] sm:$0xff] %vm328_vm0, %v3281_v50 }
  0xc3   : > { %v454_v63 = vpop.f32.mrf.mxu0  ;;  %560 = vst [vmem:[#allocation2 + $0xb0] sm:$0xff] %v508_v0 }
  0xc4   : > { %542 = vst [vmem:[#allocation2 + $0x20] sm:$0xff] %v454_v63 }
  0xc5   : > { %2765 = vmatmul.msk.f32.gmra.mxu2 %vm328_vm0, %v584_v51  ;;  %952 = vst.msk [vmem:[#allocation5 + $0xe0] sm:$0xff] %vm328_vm0, %v3281_v50 }
  0xc6   : > { %953 = vst.msk [vmem:[#allocation5 + $0xe8] sm:$0xff] %vm328_vm0, %v3281_v50 }
  0xc7   : > { %954 = vst.msk [vmem:[#allocation5 + $0xf0] sm:$0xff] %vm328_vm0, %v3281_v50 }
  0xc8   : > { %955 = vst.msk [vmem:[#allocation5 + $0xf8] sm:$0xff] %vm328_vm0, %v3281_v50 }
  0xca   : > { %v511_v2 = vpop.f32.mrf.mxu3 }
  0xcb   : > { %v457_v1 = vpop.f32.mrf.mxu0  ;;  %561 = vst [vmem:[#allocation2 + $0xb8] sm:$0xff] %v511_v2 }
  0xcc   : > { %543 = vst [vmem:[#allocation2 + $0x28] sm:$0xff] %v457_v1 }
  0xcd   : > { %2766 = vmatmul.msk.f32.gmra.mxu2 %vm328_vm0, %v585_v54 }
  0xd2   : > { %v514_v6 = vpop.f32.mrf.mxu3 }
  0xd3   : > { %v460_v3 = vpop.f32.mrf.mxu0  ;;  %562 = vst [vmem:[#allocation2 + $0xc0] sm:$0xff] %v514_v6 }
  0xd4   : > { %544 = vst [vmem:[#allocation2 + $0x30] sm:$0xff] %v460_v3  ;;  %v779_v4 = vpop.f32.mrf.mxu1 }
  0xd5   : > { %892 = vst [vmem:[#allocation3] sm:$0xff] %v779_v4 }
  0xd8   : > { %v844_v5 = vpop.f32.mrf.mxu2 }
  0xd9   : > { %893 = vst [vmem:[#allocation3 + $0x8] sm:$0xff] %v844_v5 }
  0xda   : > { %v517_v10 = vpop.f32.mrf.mxu3 }
  0xdb   : > { %v463_v7 = vpop.f32.mrf.mxu0  ;;  %563 = vst [vmem:[#allocation2 + $0xc8] sm:$0xff] %v517_v10 }
  0xdc   : > { %545 = vst [vmem:[#allocation2 + $0x38] sm:$0xff] %v463_v7  ;;  %v782_v8 = vpop.f32.mrf.mxu1 }
  0xdd   : > { %894 = vst [vmem:[#allocation3 + $0x10] sm:$0xff] %v782_v8 }
  0xe0   : > { %v847_v9 = vpop.f32.mrf.mxu2 }
  0xe1   : > { %895 = vst [vmem:[#allocation3 + $0x18] sm:$0xff] %v847_v9 }
  0xe2   : > { %v520_v14 = vpop.f32.mrf.mxu3 }
  0xe3   : > { %v466_v11 = vpop.f32.mrf.mxu0  ;;  %564 = vst [vmem:[#allocation2 + $0xd0] sm:$0xff] %v520_v14 }
  0xe4   : > { %546 = vst [vmem:[#allocation2 + $0x40] sm:$0xff] %v466_v11  ;;  %v785_v12 = vpop.f32.mrf.mxu1 }
  0xe5   : > { %896 = vst [vmem:[#allocation3 + $0x20] sm:$0xff] %v785_v12 }
  0xe8   : > { %v850_v13 = vpop.f32.mrf.mxu2 }
  0xe9   : > { %897 = vst [vmem:[#allocation3 + $0x28] sm:$0xff] %v850_v13 }
  0xea   : > { %v523_v18 = vpop.f32.mrf.mxu3 }
  0xeb   : > { %v469_v15 = vpop.f32.mrf.mxu0  ;;  %565 = vst [vmem:[#allocation2 + $0xd8] sm:$0xff] %v523_v18 }
  0xec   : > { %547 = vst [vmem:[#allocation2 + $0x48] sm:$0xff] %v469_v15  ;;  %v788_v16 = vpop.f32.mrf.mxu1 }
  0xed   : > { %898 = vst [vmem:[#allocation3 + $0x30] sm:$0xff] %v788_v16 }
  0xf0   : > { %v853_v17 = vpop.f32.mrf.mxu2 }
  0xf1   : > { %899 = vst [vmem:[#allocation3 + $0x38] sm:$0xff] %v853_v17 }
  0xf2   : > { %v526_v22 = vpop.f32.mrf.mxu3 }
  0xf3   : > { %v472_v19 = vpop.f32.mrf.mxu0  ;;  %566 = vst [vmem:[#allocation2 + $0xe0] sm:$0xff] %v526_v22 }
  0xf4   : > { %548 = vst [vmem:[#allocation2 + $0x50] sm:$0xff] %v472_v19  ;;  %v791_v20 = vpop.f32.mrf.mxu1 }
  0xf5   : > { %900 = vst [vmem:[#allocation3 + $0x40] sm:$0xff] %v791_v20 }
  0xf8   : > { %v856_v21 = vpop.f32.mrf.mxu2 }
  0xf9   : > { %901 = vst [vmem:[#allocation3 + $0x48] sm:$0xff] %v856_v21 }
  0xfa   : > { %v529_v26 = vpop.f32.mrf.mxu3 }
  0xfb   : > { %v475_v23 = vpop.f32.mrf.mxu0  ;;  %567 = vst [vmem:[#allocation2 + $0xe8] sm:$0xff] %v529_v26 }
  0xfc   : > { %549 = vst [vmem:[#allocation2 + $0x58] sm:$0xff] %v475_v23  ;;  %v794_v24 = vpop.f32.mrf.mxu1 }
  0xfd   : > { %902 = vst [vmem:[#allocation3 + $0x50] sm:$0xff] %v794_v24 }
 0x100   : > { %v859_v25 = vpop.f32.mrf.mxu2 }
 0x101   : > { %903 = vst [vmem:[#allocation3 + $0x58] sm:$0xff] %v859_v25 }
 0x102   : > { %v532_v30 = vpop.f32.mrf.mxu3 }
 0x103   : > { %v478_v27 = vpop.f32.mrf.mxu0  ;;  %568 = vst [vmem:[#allocation2 + $0xf0] sm:$0xff] %v532_v30 }
 0x104   : > { %550 = vst [vmem:[#allocation2 + $0x60] sm:$0xff] %v478_v27  ;;  %v797_v28 = vpop.f32.mrf.mxu1 }
 0x105   : > { %904 = vst [vmem:[#allocation3 + $0x60] sm:$0xff] %v797_v28 }
 0x108   : > { %v862_v29 = vpop.f32.mrf.mxu2 }
 0x109   : > { %905 = vst [vmem:[#allocation3 + $0x68] sm:$0xff] %v862_v29 }
 0x10a   : > { %v535_v34 = vpop.f32.mrf.mxu3 }
 0x10b   : > { %v481_v31 = vpop.f32.mrf.mxu0  ;;  %569 = vst [vmem:[#allocation2 + $0xf8] sm:$0xff] %v535_v34 }
 0x10c   : > { %551 = vst [vmem:[#allocation2 + $0x68] sm:$0xff] %v481_v31  ;;  %v800_v32 = vpop.f32.mrf.mxu1 }
 0x10d   : > { %906 = vst [vmem:[#allocation3 + $0x70] sm:$0xff] %v800_v32 }
 0x110   : > { %v865_v33 = vpop.f32.mrf.mxu2 }
 0x111   : > { %907 = vst [vmem:[#allocation3 + $0x78] sm:$0xff] %v865_v33 }
 0x112   : > { %v818_v38 = vpop.f32.mrf.mxu3 }
 0x113   : > { %v484_v35 = vpop.f32.mrf.mxu0  ;;  %918 = vst [vmem:[#allocation3 + $0xd0] sm:$0xff] %v818_v38 }
 0x114   : > { %552 = vst [vmem:[#allocation2 + $0x70] sm:$0xff] %v484_v35  ;;  %v803_v36 = vpop.f32.mrf.mxu1 }
 0x115   : > { %908 = vst [vmem:[#allocation3 + $0x80] sm:$0xff] %v803_v36 }
 0x118   : > { %v868_v37 = vpop.f32.mrf.mxu2 }
 0x119   : > { %909 = vst [vmem:[#allocation3 + $0x88] sm:$0xff] %v868_v37 }
 0x11a   : > { %v821_v42 = vpop.f32.mrf.mxu3 }
 0x11b   : > { %v487_v39 = vpop.f32.mrf.mxu0  ;;  %920 = vst [vmem:[#allocation3 + $0xe0] sm:$0xff] %v821_v42 }
 0x11c   : > { %553 = vst [vmem:[#allocation2 + $0x78] sm:$0xff] %v487_v39  ;;  %v806_v40 = vpop.f32.mrf.mxu1 }
 0x11d   : > { %910 = vst [vmem:[#allocation3 + $0x90] sm:$0xff] %v806_v40 }
 0x120   : > { %v871_v41 = vpop.f32.mrf.mxu2 }
 0x121   : > { %911 = vst [vmem:[#allocation3 + $0x98] sm:$0xff] %v871_v41 }
 0x122   : > { %v824_v46 = vpop.f32.mrf.mxu3 }
 0x123   : > { %v490_v43 = vpop.f32.mrf.mxu0  ;;  %922 = vst [vmem:[#allocation3 + $0xf0] sm:$0xff] %v824_v46 }
 0x124   : > { %554 = vst [vmem:[#allocation2 + $0x80] sm:$0xff] %v490_v43  ;;  %v809_v44 = vpop.f32.mrf.mxu1 }
 0x125   : > { %912 = vst [vmem:[#allocation3 + $0xa0] sm:$0xff] %v809_v44 }
 0x128   : > { %v874_v45 = vpop.f32.mrf.mxu2 }
 0x129   : > { %913 = vst [vmem:[#allocation3 + $0xa8] sm:$0xff] %v874_v45 }
 0x12b   : > { %v493_v47 = vpop.f32.mrf.mxu0 }
 0x12c   : > { %555 = vst [vmem:[#allocation2 + $0x88] sm:$0xff] %v493_v47  ;;  %v812_v48 = vpop.f32.mrf.mxu1 }
 0x12d   : > { %914 = vst [vmem:[#allocation3 + $0xb0] sm:$0xff] %v812_v48 }
 0x130   : > { %v877_v49 = vpop.f32.mrf.mxu2 }
 0x131   : > { %915 = vst [vmem:[#allocation3 + $0xb8] sm:$0xff] %v877_v49 }
 0x133   : > { %v496_v51 = vpop.f32.mrf.mxu0 }
 0x134   : > { %556 = vst [vmem:[#allocation2 + $0x90] sm:$0xff] %v496_v51  ;;  %v815_v52 = vpop.f32.mrf.mxu1 }
 0x135   : > { %916 = vst [vmem:[#allocation3 + $0xc0] sm:$0xff] %v815_v52 }
 0x138   : > { %v880_v53 = vpop.f32.mrf.mxu2 }
 0x139   : > { %917 = vst [vmem:[#allocation3 + $0xc8] sm:$0xff] %v880_v53 }
 0x140   : > { %v883_v54 = vpop.f32.mrf.mxu2 }
 0x141   : > { %919 = vst [vmem:[#allocation3 + $0xd8] sm:$0xff] %v883_v54 }
 0x148   : > { %v886_v55 = vpop.f32.mrf.mxu2 }
 0x149   : > { %921 = vst [vmem:[#allocation3 + $0xe8] sm:$0xff] %v886_v55 }
 0x150   : > { %v889_v56 = vpop.f32.mrf.mxu2 }
 0x151   : > { %923 = vst [vmem:[#allocation3 + $0xf8] sm:$0xff] %v889_v56 }
 0x152 PF: > { %s2767_s26 = sshll.u32 %s3334_s25, 7  ;;  %v974_v57 = vld [vmem:[%s3347_s11] sm:$0xff]  ;;  %v975_v58 = vld [vmem:[%s3347_s11 + $0x8] sm:$0xff]  ;;  %v976_v59 = vld [vmem:[%s3347_s11 + $0x10] sm:$0xff]  ;;  %v3282_v3 = vmov 0.0   ;;  %v4828_v23 = vmov 0  ;;  %v1086_v42 = vlaneseq }
 0x153   : > { %v977_v60 = vld [vmem:[%s3347_s11 + $0x18] sm:$0xff]  ;;  %v978_v61 = vld [vmem:[%s3347_s11 + $0x20] sm:$0xff]  ;;  %v979_v62 = vld [vmem:[%s3347_s11 + $0x28] sm:$0xff]  ;;  %v990_v63 = vunpack.c.l.bf16 %v974_v57  ;;  %v991_v0 = vunpack.c.h.bf16 %v974_v57  ;;  %v992_v1 = vunpack.c.l.bf16 %v975_v58  ;;  %v993_v2 = vunpack.c.h.bf16 %v975_v58  ;;  %1054 = vst [vmem:[#allocation4 + $0xb0] sm:$0xff] %v3282_v3  ;;  %s3763_s27 = scalar_lea.vmem [#allocation2], %s2767_s26 }
 0x154   : > { %v3766_v4 = vld [vmem:[%s3763_s27] sm:$0xff]  ;;  %v3769_v5 = vld [vmem:[%s3763_s27 + $0x8] sm:$0xff]  ;;  %v3772_v6 = vld [vmem:[%s3763_s27 + $0x10] sm:$0xff]  ;;  %v994_v7 = vunpack.c.l.bf16 %v976_v59  ;;  %v995_v8 = vunpack.c.h.bf16 %v976_v59  ;;  %v996_v9 = vunpack.c.l.bf16 %v977_v60  ;;  %v997_v10 = vunpack.c.h.bf16 %v977_v60  ;;  %1055 = vst [vmem:[#allocation4] sm:$0xff] %v3282_v3 }
 0x155   : > { %4815 = vst [vmem:[#allocation12_spill] sm:$0xff] %v3766_v4  ;;  %v3776_v11 = vld [vmem:[%s3763_s27 + $0x18] sm:$0xff]  ;;  %v3779_v12 = vld [vmem:[%s3763_s27 + $0x20] sm:$0xff]  ;;  %v3782_v13 = vld [vmem:[%s3763_s27 + $0x28] sm:$0xff]  ;;  %v998_v14 = vunpack.c.l.bf16 %v978_v61  ;;  %v999_v15 = vunpack.c.h.bf16 %v978_v61  ;;  %v1000_v16 = vunpack.c.l.bf16 %v979_v62  ;;  %v1001_v17 = vunpack.c.h.bf16 %v979_v62 }
 0x156   : > { %4816 = vst [vmem:[#allocation13_spill] sm:$0xff] %v3769_v5  ;;  %v3786_v18 = vld [vmem:[%s3763_s27 + $0x30] sm:$0xff]  ;;  %v3789_v19 = vld [vmem:[%s3763_s27 + $0x38] sm:$0xff]  ;;  %v3792_v20 = vld [vmem:[%s3763_s27 + $0x40] sm:$0xff]  ;;  %vm3794_vm1 = vcmp.gt.f32.partialorder %v990_v63, 0.0  ;;  %vm3798_vm2 = vcmp.gt.f32.partialorder %v991_v0, 0.0 }
 0x157   : > { %4817 = vst [vmem:[#allocation14_spill] sm:$0xff] %v3772_v6  ;;  %vm3802_vm3 = vcmp.gt.f32.partialorder %v992_v1, 0.0  ;;  %v3807_v24 = vld [vmem:[%s3763_s27 + $0x48] sm:$0xff]  ;;  %v3810_v25 = vld [vmem:[%s3763_s27 + $0x50] sm:$0xff]  ;;  %v3813_v26 = vld [vmem:[%s3763_s27 + $0x58] sm:$0xff]  ;;  %vm3815_vm4 = vcmp.gt.f32.partialorder %v993_v2, 0.0 }
 0x158   : > { %4818 = vst [vmem:[#allocation15_spill] sm:$0xff] %v3776_v11  ;;  %v4829_v23 = vsel %vm3802_vm3, 4294967295, %v4828_v23  ;;  %v4833_v27 = vmov 0  ;;  %vm3819_vm5 = vcmp.gt.f32.partialorder %v994_v7, 0.0  ;;  %vm3823_vm6 = vcmp.gt.f32.partialorder %v995_v8, 0.0  ;;  %v3828_v30 = vld [vmem:[%s3763_s27 + $0x60] sm:$0xff] }
 0x159   : > { %4819 = vst [vmem:[#allocation16_spill] sm:$0xff] %v3779_v12  ;;  %v4834_v27 = vsel %vm3815_vm4, 4294967295, %v4833_v27  ;;  %v3831_v31 = vld [vmem:[%s3763_s27 + $0x68] sm:$0xff]  ;;  %v3834_v32 = vld [vmem:[%s3763_s27 + $0x70] sm:$0xff]  ;;  %vm3836_vm7 = vcmp.gt.f32.partialorder %v996_v9, 0.0  ;;  %vm3840_vm8 = vcmp.gt.f32.partialorder %v997_v10, 0.0 }
 0x15a   : > { %4820 = vst [vmem:[#allocation17_spill] sm:$0xff] %v3782_v13  ;;  %vm3844_vm9 = vcmp.gt.f32.partialorder %v998_v14, 0.0  ;;  %v3849_v36 = vld [vmem:[%s3763_s27 + $0x78] sm:$0xff]  ;;  %v980_v37 = vld [vmem:[%s3347_s11 + $0x30] sm:$0xff]  ;;  %vm3853_vm10 = vcmp.gt.f32.partialorder %v999_v15, 0.0  ;;  %vm3857_vm11 = vcmp.gt.f32.partialorder %v1000_v16, 0.0 }
 0x15b   : > { %1056 = vst [vmem:[#allocation4 + $0xd8] sm:$0xff] %v3282_v3  ;;  %v981_v38 = vld [vmem:[%s3347_s11 + $0x38] sm:$0xff]  ;;  %vm3861_vm12 = vcmp.gt.f32.partialorder %v1001_v17, 0.0  ;;  %v982_v43 = vld [vmem:[%s3347_s11 + $0x40] sm:$0xff]  ;;  %v983_v44 = vld [vmem:[%s3347_s11 + $0x48] sm:$0xff]  ;;  %v1002_v46 = vunpack.c.l.bf16 %v980_v37  ;;  %v1003_v47 = vunpack.c.h.bf16 %v980_v37  ;;  %v4855_v14 = vmov 0 }
 0x15c   : > { %4821 = vst [vmem:[#allocation18_spill] sm:$0xff] %v3786_v18  ;;  %v984_v45 = vld [vmem:[%s3347_s11 + $0x50] sm:$0xff]  ;;  %v1004_v48 = vunpack.c.l.bf16 %v981_v38  ;;  %v1005_v49 = vunpack.c.h.bf16 %v981_v38  ;;  %v985_v50 = vld [vmem:[%s3347_s11 + $0x58] sm:$0xff]  ;;  %v986_v51 = vld [vmem:[%s3347_s11 + $0x60] sm:$0xff]  ;;  %v1006_v53 = vunpack.c.l.bf16 %v982_v43  ;;  %v1007_v54 = vunpack.c.h.bf16 %v982_v43 }
 0x15d   : > { %4822 = vst [vmem:[#allocation19_spill] sm:$0xff] %v3789_v19  ;;  %v987_v52 = vld [vmem:[%s3347_s11 + $0x68] sm:$0xff]  ;;  %v1008_v55 = vunpack.c.l.bf16 %v983_v44  ;;  %v1009_v56 = vunpack.c.h.bf16 %v983_v44  ;;  %v988_v57 = vld [vmem:[%s3347_s11 + $0x70] sm:$0xff]  ;;  %v989_v58 = vld [vmem:[%s3347_s11 + $0x78] sm:$0xff]  ;;  %v1010_v59 = vunpack.c.l.bf16 %v984_v45  ;;  %v1011_v60 = vunpack.c.h.bf16 %v984_v45  ;;  %s4029_s11 = smov 0  }
 0x15e   : > { %4823 = vst [vmem:[#allocation20_spill] sm:$0xff] %v3792_v20  ;;  %v1012_v61 = vunpack.c.l.bf16 %v985_v50  ;;  %v1013_v62 = vunpack.c.h.bf16 %v985_v50  ;;  %v1014_v63 = vunpack.c.l.bf16 %v986_v51  ;;  %v1015_v0 = vunpack.c.h.bf16 %v986_v51 }
 0x15f   : > { %4830 = vst [vmem:[#allocation21_spill] sm:$0xff] %v3807_v24  ;;  %v1016_v1 = vunpack.c.l.bf16 %v987_v52  ;;  %v1017_v2 = vunpack.c.h.bf16 %v987_v52  ;;  %v1018_v7 = vunpack.c.l.bf16 %v988_v57  ;;  %v1019_v8 = vunpack.c.h.bf16 %v988_v57 }
 0x160   : > { %4831 = vst [vmem:[#allocation22_spill] sm:$0xff] %v3810_v25  ;;  %v1020_v9 = vunpack.c.l.bf16 %v989_v58  ;;  %v1021_v10 = vunpack.c.h.bf16 %v989_v58  ;;  %vm3878_vm13 = vcmp.gt.f32.partialorder %v1002_v46, 0.0  ;;  %vm3882_vm14 = vcmp.gt.f32.partialorder %v1003_v47, 0.0 }
 0x161   : > { %4832 = vst [vmem:[#allocation23_spill] sm:$0xff] %v3813_v26  ;;  %v4856_v14 = vsel %vm3878_vm13, 4294967295, %v4855_v14  ;;  %v4857_v15 = vmov 0  ;;  %vm3886_vm15 = vcmp.gt.f32.partialorder %v1004_v48, 0.0  ;;  %v4859_v16 = vmov 0 }
 0x162   : > { %4839 = vst [vmem:[#allocation24_spill] sm:$0xff] %v3828_v30  ;;  %v4858_v15 = vsel %vm3882_vm14, 4294967295, %v4857_v15  ;;  %v4860_v16 = vsel %vm3886_vm15, 4294967295, %v4859_v16  ;;  %vm3890_vm0 = vcmp.gt.f32.partialorder %v1005_v49, 0.0  ;;  %v4862_v17 = vmov 0 }
 0x163   : > { %4840 = vst [vmem:[#allocation25_spill] sm:$0xff] %v3831_v31  ;;  %v4863_v17 = vsel %vm3890_vm0, 4294967295, %v4862_v17  ;;  %vm3895_vm4 = vcmp.gt.f32.partialorder %v1006_v53, 0.0  ;;  %v4865_v37 = vmov 0  ;;  %vm3899_vm3 = vcmp.gt.f32.partialorder %v1007_v54, 0.0 }
 0x164   : > { %4841 = vst [vmem:[#allocation26_spill] sm:$0xff] %v3834_v32  ;;  %v4866_v37 = vsel %vm3895_vm4, 4294967295, %v4865_v37  ;;  %v4867_v38 = vmov 0  ;;  %vm3903_vm13 = vcmp.gt.f32.partialorder %v1008_v55, 0.0  ;;  %v4869_v43 = vmov 0 }
 0x165   : > { %4848 = vst [vmem:[#allocation27_spill] sm:$0xff] %v3849_v36  ;;  %v4868_v38 = vsel %vm3899_vm3, 4294967295, %v4867_v38  ;;  %v4870_v43 = vsel %vm3903_vm13, 4294967295, %v4869_v43  ;;  %vm3907_vm14 = vcmp.gt.f32.partialorder %v1009_v56, 0.0  ;;  %v4872_v44 = vmov 0 }
 0x166   : > { %1057 = vst [vmem:[#allocation4 + $0x18] sm:$0xff] %v3282_v3  ;;  %v4873_v44 = vsel %vm3907_vm14, 4294967295, %v4872_v44  ;;  %vm3912_vm0 = vcmp.gt.f32.partialorder %v1010_v59, 0.0  ;;  %v4875_v45 = vmov 0  ;;  %vm3916_vm15 = vcmp.gt.f32.partialorder %v1011_v60, 0.0 }
 0x167   : > { %1058 = vst [vmem:[#allocation4 + $0x50] sm:$0xff] %v3282_v3  ;;  %v4876_v45 = vsel %vm3912_vm0, 4294967295, %v4875_v45  ;;  %v4878_v46 = vmov 0  ;;  %vm3920_vm4 = vcmp.gt.f32.partialorder %v1012_v61, 0.0  ;;  %v4881_v47 = vmov 0 }
 0x168   : > { %1059 = vst [vmem:[#allocation4 + $0x68] sm:$0xff] %v3282_v3  ;;  %v4879_v46 = vsel %vm3916_vm15, 4294967295, %v4878_v46  ;;  %v4882_v47 = vsel %vm3920_vm4, 4294967295, %v4881_v47  ;;  %vm3924_vm3 = vcmp.gt.f32.partialorder %v1013_v62, 0.0  ;;  %v4883_v48 = vmov 0 }
 0x169   : > { %1060 = vst [vmem:[#allocation4 + $0x30] sm:$0xff] %v3282_v3  ;;  %v4884_v48 = vsel %vm3924_vm3, 4294967295, %v4883_v48  ;;  %vm3929_vm14 = vcmp.gt.f32.partialorder %v1014_v63, 0.0  ;;  %v4885_v49 = vmov 0  ;;  %vm3933_vm13 = vcmp.gt.f32.partialorder %v1015_v0, 0.0 }
 0x16a   : > { %1061 = vst [vmem:[#allocation4 + $0x48] sm:$0xff] %v3282_v3  ;;  %v4886_v49 = vsel %vm3929_vm14, 4294967295, %v4885_v49  ;;  %v4888_v50 = vmov 0  ;;  %vm3937_vm0 = vcmp.gt.f32.partialorder %v1016_v1, 0.0  ;;  %v4891_v51 = vmov 0 }
 0x16b   : > { %4861 = vst [vmem:[#allocation28_spill] sm:$0xff] %v4860_v16  ;;  %v4889_v50 = vsel %vm3933_vm13, 4294967295, %v4888_v50  ;;  %v4892_v51 = vsel %vm3937_vm0, 4294967295, %v4891_v51  ;;  %vm3941_vm15 = vcmp.gt.f32.partialorder %v1017_v2, 0.0  ;;  %v4894_v52 = vmov 0 }
 0x16c   : > { %4864 = vst [vmem:[#allocation29_spill] sm:$0xff] %v4863_v17  ;;  %v4895_v52 = vsel %vm3941_vm15, 4294967295, %v4894_v52  ;;  %vm3946_vm3 = vcmp.gt.f32.partialorder %v1018_v7, 0.0  ;;  %v4897_v53 = vmov 0  ;;  %vm3950_vm4 = vcmp.gt.f32.partialorder %v1019_v8, 0.0 }
 0x16d   : > { %1062 = vst [vmem:[#allocation4 + $0x80] sm:$0xff] %v3282_v3  ;;  %v4898_v53 = vsel %vm3946_vm3, 4294967295, %v4897_v53  ;;  %v4900_v54 = vmov 0  ;;  %vm3954_vm14 = vcmp.gt.f32.partialorder %v1020_v9, 0.0  ;;  %v4903_v55 = vmov 0 }
 0x16e   : > { %4871 = vst [vmem:[#allocation30_spill] sm:$0xff] %v4870_v43  ;;  %v4901_v54 = vsel %vm3950_vm4, 4294967295, %v4900_v54  ;;  %v4904_v55 = vsel %vm3954_vm14, 4294967295, %v4903_v55  ;;  %vm3958_vm13 = vcmp.gt.f32.partialorder %v1021_v10, 0.0  ;;  %v4906_v56 = vmov 0 }
 0x16f   : > { %4874 = vst [vmem:[#allocation31_spill] sm:$0xff] %v4873_v44  ;;  %v4907_v56 = vsel %vm3958_vm13, 4294967295, %v4906_v56  ;;  %v3964_v57 = vshrl.u32 %v1086_v42, 7 }
 0x170   : > { %1063 = vst [vmem:[#allocation4 + $0x88] sm:$0xff] %v3282_v3 }
 0x171   : > { %4877 = vst [vmem:[#allocation32_spill] sm:$0xff] %v4876_v45  ;;  %v3969_v58 = vadd.s32 8, %v3964_v57  ;;  %v3972_v59 = vadd.s32 16, %v3964_v57  ;;  %v3975_v60 = vadd.s32 24, %v3964_v57  ;;  %v3978_v61 = vadd.s32 32, %v3964_v57 }
 0x172   : > { %4880 = vst [vmem:[#allocation33_spill] sm:$0xff] %v4879_v46  ;;  %v3982_v42 = vadd.s32 40, %v3964_v57  ;;  %v3985_v62 = vadd.s32 48, %v3964_v57  ;;  %v3988_v63 = vadd.s32 56, %v3964_v57  ;;  %v3991_v0 = vadd.s32 64, %v3964_v57 }
 0x173   : > { %1064 = vst [vmem:[#allocation4 + $0xe8] sm:$0xff] %v3282_v3  ;;  %v3995_v1 = vadd.s32 72, %v3964_v57  ;;  %v3998_v2 = vadd.s32 80, %v3964_v57  ;;  %v4001_v7 = vadd.s32 88, %v3964_v57  ;;  %v4004_v8 = vadd.s32 96, %v3964_v57 }
 0x174   : > { %4887 = vst [vmem:[#allocation34_spill] sm:$0xff] %v4886_v49  ;;  %v4008_v9 = vadd.s32 104, %v3964_v57  ;;  %v4011_v10 = vadd.s32 112, %v3964_v57 }
 0x175   : > { %4890 = vst [vmem:[#allocation35_spill] sm:$0xff] %v4889_v50 }
 0x176   : > { %4893 = vst [vmem:[#allocation36_spill] sm:$0xff] %v4892_v51 }
 0x177   : > { %4896 = vst [vmem:[#allocation37_spill] sm:$0xff] %v4895_v52 }
 0x178   : > { %1065 = vst [vmem:[#allocation4 + $0xb8] sm:$0xff] %v3282_v3 }
 0x179   : > { %4899 = vst [vmem:[#allocation38_spill] sm:$0xff] %v4898_v53 }
 0x17a   : > { %4902 = vst [vmem:[#allocation39_spill] sm:$0xff] %v4901_v54 }
 0x17b   : > { %4905 = vst [vmem:[#allocation40_spill] sm:$0xff] %v4904_v55 }
 0x17c   : > { %4908 = vst [vmem:[#allocation41_spill] sm:$0xff] %v4907_v56  ;;  %v4014_v56 = vadd.s32 120, %v3964_v57 }
 0x17d   : > { %1066 = vst [vmem:[#allocation4 + $0x60] sm:$0xff] %v3282_v3 }
 0x17e   : > { %1067 = vst [vmem:[#allocation4 + $0xf0] sm:$0xff] %v3282_v3 }
 0x17f   : > { %4909 = vst [vmem:[#allocation42_spill] sm:$0xff] %v3964_v57 }
 0x180   : > { %1068 = vst [vmem:[#allocation4 + $0x8] sm:$0xff] %v3282_v3 }
 0x181   : > { %1069 = vst [vmem:[#allocation4 + $0x78] sm:$0xff] %v3282_v3 }
 0x182   : > { %4910 = vst [vmem:[#allocation43_spill] sm:$0xff] %v3969_v58 }
 0x183   : > { %4911 = vst [vmem:[#allocation44_spill] sm:$0xff] %v3972_v59 }
 0x184   : > { %1070 = vst [vmem:[#allocation4 + $0x38] sm:$0xff] %v3282_v3 }
 0x185   : > { %4912 = vst [vmem:[#allocation45_spill] sm:$0xff] %v3982_v42 }
 0x186   : > { %4913 = vst [vmem:[#allocation46_spill] sm:$0xff] %v3991_v0 }
 0x187   : > { %1071 = vst [vmem:[#allocation4 + $0x58] sm:$0xff] %v3282_v3 }
 0x188   : > { %4914 = vst [vmem:[#allocation47_spill] sm:$0xff] %v3995_v1 }
 0x189   : > { %4915 = vst [vmem:[#allocation48_spill] sm:$0xff] %v3998_v2 }
 0x18a   : > { %4916 = vst [vmem:[#allocation49_spill] sm:$0xff] %v4001_v7 }
 0x18b   : > { %4917 = vst [vmem:[#allocation50_spill] sm:$0xff] %v4004_v8 }
 0x18c   : > { %1072 = vst [vmem:[#allocation4 + $0x40] sm:$0xff] %v3282_v3 }
 0x18d   : > { %4918 = vst [vmem:[#allocation51_spill] sm:$0xff] %v4008_v9 }
 0x18e   : > { %4919 = vst [vmem:[#allocation52_spill] sm:$0xff] %v4011_v10 }
 0x18f   : > { %4920 = vst [vmem:[#allocation53_spill] sm:$0xff] %v4014_v56 }
 0x190   : > { %1073 = vst [vmem:[#allocation4 + $0xc8] sm:$0xff] %v3282_v3 }
 0x191   : > { %1074 = vst [vmem:[#allocation4 + $0xe0] sm:$0xff] %v3282_v3 }
 0x192   : > { %1075 = vst [vmem:[#allocation4 + $0x90] sm:$0xff] %v3282_v3 }
 0x193   : > { %1076 = vst [vmem:[#allocation4 + $0x70] sm:$0xff] %v3282_v3 }
 0x194   : > { %1077 = vst [vmem:[#allocation4 + $0xc0] sm:$0xff] %v3282_v3 }
 0x195   : > { %1078 = vst [vmem:[#allocation4 + $0xa8] sm:$0xff] %v3282_v3 }
 0x196   : > { %1079 = vst [vmem:[#allocation4 + $0xd0] sm:$0xff] %v3282_v3 }
 0x197   : > { %1080 = vst [vmem:[#allocation4 + $0x10] sm:$0xff] %v3282_v3 }
 0x198   : > { %1081 = vst [vmem:[#allocation4 + $0x28] sm:$0xff] %v3282_v3 }
 0x199   : > { %1082 = vst [vmem:[#allocation4 + $0xa0] sm:$0xff] %v3282_v3 }
 0x19a   : > { %1083 = vst [vmem:[#allocation4 + $0xf8] sm:$0xff] %v3282_v3 }
 0x19b   : > { %1084 = vst [vmem:[#allocation4 + $0x20] sm:$0xff] %v3282_v3 }
 0x19c   : > { %1085 = vst [vmem:[#allocation4 + $0x98] sm:$0xff] %v3282_v3 }
 0x19d LB: >> { %v4035_v55 = vstv %s3278_s11  ;;  %v4921_v56 = vld [vmem:[#allocation53_spill] sm:$0xff]  ;;  %v4922_v10 = vld [vmem:[#allocation52_spill] sm:$0xff]  ;;  %v3283_v50 = vmov 1.0   ;;  %v4923_v9 = vld [vmem:[#allocation51_spill] sm:$0xff]  ;;  %v3284_v3 = vmov 0   ;;  %s1223_s28 = sshra.s32 %s3278_s11, 3  ;;  %s3278_s11 = sphi %s4029_s11, %s1108_s11  }
 0x19e   : >> { %vm1125_vm13 = vcmp.eq.s32.totalorder %v4921_v56, %v4035_v55  ;;  %vm1124_vm14 = vcmp.eq.s32.totalorder %v4922_v10, %v4035_v55  ;;  %vm1123_vm15 = vcmp.eq.s32.totalorder %v4923_v9, %v4035_v55  ;;  %v4924_v8 = vld [vmem:[#allocation50_spill] sm:$0xff]  ;;  %v4925_v7 = vld [vmem:[#allocation49_spill] sm:$0xff]  ;;  %v4926_v2 = vld [vmem:[#allocation48_spill] sm:$0xff]  ;;  %3002 = vset.pattern.permute.xlu2 %v3284_v3  ;;  %3001 = vset.pattern.permute.xlu0 %v3284_v3  ;;  %s1226_s29 = sand.u32 7, %s3278_s11  ;;  %s2840_s30 = sshll.u32 %s1223_s28, 4 }
 0x19f   : >> { %2784 = vmatpush.msk.msra.mxu0 %vm1125_vm13, %v3283_v50  ;;  %2865 = vmatpush.msk.msra.mxu1 %vm1125_vm13, %v3283_v50  ;;  %vm1122_vm0 = vcmp.eq.s32.totalorder %v4924_v8, %v4035_v55  ;;  %v4927_v1 = vld [vmem:[#allocation47_spill] sm:$0xff]  ;;  %v4928_v0 = vld [vmem:[#allocation46_spill] sm:$0xff]  ;;  %v4929_v42 = vld [vmem:[#allocation45_spill] sm:$0xff]  ;;  %s1229_s8 = sadd.s32 %s2840_s30, %s1226_s29  ;;  %s1477_s10 = sld [smem:[#allocation6 + %s3278_s11]] }
 0x1a0   : >> { %2866 = vmatpush.msk.msra.mxu2 %vm1125_vm13, %v3283_v50  ;;  %2867 = vmatpush.msk.msra.mxu3 %vm1125_vm13, %v3283_v50  ;;  %vm1121_vm13 = vcmp.eq.s32.totalorder %v4925_v7, %v4035_v55  ;;  %v4930_v59 = vld [vmem:[#allocation44_spill] sm:$0xff]  ;;  %v4931_v58 = vld [vmem:[#allocation43_spill] sm:$0xff]  ;;  %v4932_v57 = vld [vmem:[#allocation42_spill] sm:$0xff]  ;;  %s1230_s9 = scalar_lea.vmem [#allocation3], %s1229_s8  ;;  %s1108_s11 = sadd.s32 1, %s3278_s11  }
 0x1a1   : >> { %2785 = vmatpush.msk.msra.mxu0 %vm1124_vm14, %v3283_v50  ;;  %2868 = vmatpush.msk.msra.mxu1 %vm1124_vm14, %v3283_v50  ;;  %v4933_v4 = vld [vmem:[#allocation12_spill] sm:$0xff]  ;;  %v4937_v5 = vld [vmem:[#allocation13_spill] sm:$0xff]  ;;  %v4941_v6 = vld [vmem:[#allocation14_spill] sm:$0xff]  ;;  %p1105_p8 = scmp.ge.s32.totalorder %s1108_s11, 128  }
 0x1a2   : >> { %2869 = vmatpush.msk.msra.mxu2 %vm1124_vm14, %v3283_v50  ;;  %2870 = vmatpush.msk.msra.mxu3 %vm1124_vm14, %v3283_v50  ;;  %vm1120_vm14 = vcmp.eq.s32.totalorder %v4926_v2, %v4035_v55  ;;  %v4934_v12 = vld [vmem:[#allocation16_spill] sm:$0xff]  ;;  %v4938_v24 = vld [vmem:[#allocation21_spill] sm:$0xff]  ;;  %v4942_v25 = vld [vmem:[#allocation22_spill] sm:$0xff]  ;;  %s4606_s14 = scalar_lea.vmem (%p1105_p8), %s4765_s0, %s2767_s26  ;;  %p2802_p9 = scmp.ne.s32.totalorder (%p1105_p8), %s3334_s25, 1 }
 0x1a3   : >> { %2786 = vmatpush.msk.msra.mxu0 %vm1123_vm15, %v3283_v50  ;;  %2871 = vmatpush.msk.msra.mxu1 %vm1123_vm15, %v3283_v50  ;;  %v4935_v20 = vld [vmem:[#allocation20_spill] sm:$0xff]  ;;  %v4939_v13 = vld [vmem:[#allocation17_spill] sm:$0xff]  ;;  %v4943_v18 = vld [vmem:[#allocation18_spill] sm:$0xff] }
 0x1a4   : >> { %2872 = vmatpush.msk.msra.mxu2 %vm1123_vm15, %v3283_v50  ;;  %2873 = vmatpush.msk.msra.mxu3 %vm1123_vm15, %v3283_v50  ;;  %vm1119_vm15 = vcmp.eq.s32.totalorder %v4927_v1, %v4035_v55  ;;  %v4936_v30 = vld [vmem:[#allocation24_spill] sm:$0xff]  ;;  %v4940_v31 = vld [vmem:[#allocation25_spill] sm:$0xff]  ;;  %v4944_v32 = vld [vmem:[#allocation26_spill] sm:$0xff] }
 0x1a5   : >> { %2787 = vmatpush.msk.msra.mxu0 %vm1122_vm0, %v3283_v50  ;;  %2874 = vmatpush.msk.msra.mxu1 %vm1122_vm0, %v3283_v50  ;;  %v4945_v11 = vld [vmem:[#allocation15_spill] sm:$0xff] }
 0x1a6   : >> { %2875 = vmatpush.msk.msra.mxu2 %vm1122_vm0, %v3283_v50  ;;  %2876 = vmatpush.msk.msra.mxu3 %vm1122_vm0, %v3283_v50  ;;  %vm1118_vm0 = vcmp.eq.s32.totalorder %v4928_v0, %v4035_v55  ;;  %v4946_v26 = vld [vmem:[#allocation23_spill] sm:$0xff] }
 0x1a7   : >> { %2788 = vmatpush.msk.msra.mxu0 %vm1121_vm13, %v3283_v50  ;;  %2877 = vmatpush.msk.msra.mxu1 %vm1121_vm13, %v3283_v50  ;;  %v4947_v19 = vld [vmem:[#allocation19_spill] sm:$0xff] }
 0x1a8   : >> { %2878 = vmatpush.msk.msra.mxu2 %vm1121_vm13, %v3283_v50  ;;  %2879 = vmatpush.msk.msra.mxu3 %vm1121_vm13, %v3283_v50  ;;  %vm1117_vm13 = vcmp.eq.s32.totalorder %v3988_v63, %v4035_v55  ;;  %v4948_v36 = vld [vmem:[#allocation27_spill] sm:$0xff] }
 0x1a9   : >> { %2789 = vmatpush.msk.msra.mxu0 %vm1120_vm14, %v3283_v50  ;;  %2880 = vmatpush.msk.msra.mxu1 %vm1120_vm14, %v3283_v50  ;;  %v1448_v56 = vld [vmem:[#allocation4 + $0x18] sm:$0xff] }
 0x1aa   : >> { %2881 = vmatpush.msk.msra.mxu2 %vm1120_vm14, %v3283_v50  ;;  %2882 = vmatpush.msk.msra.mxu3 %vm1120_vm14, %v3283_v50  ;;  %vm1116_vm14 = vcmp.eq.s32.totalorder %v3985_v62, %v4035_v55 }
 0x1ab   : >> { %2790 = vmatpush.msk.msra.mxu0 %vm1119_vm15, %v3283_v50  ;;  %2883 = vmatpush.msk.msra.mxu1 %vm1119_vm15, %v3283_v50 }
 0x1ac   : >> { %2884 = vmatpush.msk.msra.mxu2 %vm1119_vm15, %v3283_v50  ;;  %2885 = vmatpush.msk.msra.mxu3 %vm1119_vm15, %v3283_v50  ;;  %vm1115_vm15 = vcmp.eq.s32.totalorder %v4929_v42, %v4035_v55 }
 0x1ad   : >> { %2791 = vmatpush.msk.msra.mxu0 %vm1118_vm0, %v3283_v50  ;;  %2886 = vmatpush.msk.msra.mxu1 %vm1118_vm0, %v3283_v50 }
 0x1ae   : >> { %2887 = vmatpush.msk.msra.mxu2 %vm1118_vm0, %v3283_v50  ;;  %2888 = vmatpush.msk.msra.mxu3 %vm1118_vm0, %v3283_v50  ;;  %vm1114_vm0 = vcmp.eq.s32.totalorder %v3978_v61, %v4035_v55 }
 0x1af   : >> { %2792 = vmatpush.msk.msra.mxu0 %vm1117_vm13, %v3283_v50  ;;  %2889 = vmatpush.msk.msra.mxu1 %vm1117_vm13, %v3283_v50 }
 0x1b0   : >> { %2890 = vmatpush.msk.msra.mxu2 %vm1117_vm13, %v3283_v50  ;;  %2891 = vmatpush.msk.msra.mxu3 %vm1117_vm13, %v3283_v50  ;;  %vm1113_vm13 = vcmp.eq.s32.totalorder %v3975_v60, %v4035_v55 }
 0x1b1   : >> { %2793 = vmatpush.msk.msra.mxu0 %vm1116_vm14, %v3283_v50  ;;  %2892 = vmatpush.msk.msra.mxu1 %vm1116_vm14, %v3283_v50 }
 0x1b2   : >> { %2893 = vmatpush.msk.msra.mxu2 %vm1116_vm14, %v3283_v50  ;;  %2894 = vmatpush.msk.msra.mxu3 %vm1116_vm14, %v3283_v50  ;;  %vm1112_vm14 = vcmp.eq.s32.totalorder %v4930_v59, %v4035_v55 }
 0x1b3   : >> { %2794 = vmatpush.msk.msra.mxu0 %vm1115_vm15, %v3283_v50  ;;  %2895 = vmatpush.msk.msra.mxu1 %vm1115_vm15, %v3283_v50 }
 0x1b4   : >> { %2896 = vmatpush.msk.msra.mxu2 %vm1115_vm15, %v3283_v50  ;;  %2897 = vmatpush.msk.msra.mxu3 %vm1115_vm15, %v3283_v50  ;;  %vm1111_vm15 = vcmp.eq.s32.totalorder %v4931_v58, %v4035_v55 }
 0x1b5   : >> { %2795 = vmatpush.msk.msra.mxu0 %vm1114_vm0, %v3283_v50  ;;  %2898 = vmatpush.msk.msra.mxu1 %vm1114_vm0, %v3283_v50 }
 0x1b6   : >> { %2899 = vmatpush.msk.msra.mxu2 %vm1114_vm0, %v3283_v50  ;;  %2900 = vmatpush.msk.msra.mxu3 %vm1114_vm0, %v3283_v50  ;;  %vm1110_vm0 = vcmp.eq.s32.totalorder %v4932_v57, %v4035_v55 }
 0x1b7   : >> { %2796 = vmatpush.msk.msra.mxu0 %vm1113_vm13, %v3283_v50  ;;  %2901 = vmatpush.msk.msra.mxu1 %vm1113_vm13, %v3283_v50 }
 0x1b8   : >> { %2902 = vmatpush.msk.msra.mxu2 %vm1113_vm13, %v3283_v50  ;;  %2903 = vmatpush.msk.msra.mxu3 %vm1113_vm13, %v3283_v50 }
 0x1b9   : >> { %2797 = vmatpush.msk.msra.mxu0 %vm1112_vm14, %v3283_v50  ;;  %2904 = vmatpush.msk.msra.mxu1 %vm1112_vm14, %v3283_v50 }
 0x1ba   : >> { %2905 = vmatpush.msk.msra.mxu2 %vm1112_vm14, %v3283_v50  ;;  %2906 = vmatpush.msk.msra.mxu3 %vm1112_vm14, %v3283_v50 }
 0x1bb   : >> { %2798 = vmatpush.msk.msra.mxu0 %vm1111_vm15, %v3283_v50  ;;  %2907 = vmatpush.msk.msra.mxu1 %vm1111_vm15, %v3283_v50 }
 0x1bc   : >> { %2908 = vmatpush.msk.msra.mxu2 %vm1111_vm15, %v3283_v50  ;;  %2909 = vmatpush.msk.msra.mxu3 %vm1111_vm15, %v3283_v50 }
 0x1bd   : >> { %2799 = vmatpush.msk.msra.mxu0 %vm1110_vm0, %v3283_v50  ;;  %2910 = vmatpush.msk.msra.mxu1 %vm1110_vm0, %v3283_v50 }
 0x1be   : >> { %2911 = vmatpush.msk.msra.mxu2 %vm1110_vm0, %v3283_v50  ;;  %1174 = vmatmul.f32.vlgmr.msra.gmra.mxu0 %v4933_v4 }
 0x1bf   : >> { %1186 = vmatmul.f32.vlgmr.msra.gmra.mxu1 %v4934_v12  ;;  %1198 = vmatmul.f32.vlgmr.msra.gmra.mxu2 %v4935_v20 }
 0x1c0   : >> { %2912 = vmatpush.msk.msra.mxu3 %vm1110_vm0, %v3283_v50  ;;  %3003 = vset.pattern.permute.xlu1 %v3284_v3 }
 0x1c1   : >> { %1210 = vmatmul.f32.vlgmr.msra.gmra.mxu3 %v4936_v30  ;;  %v1470_v30 = vld [vmem:[#allocation4 + $0xd0] sm:$0xff] }
 0x1c6   : >> { %1177 = vmatmul.f32.gmra.mxu0 %v4937_v5 }
 0x1c7   : >> { %1201 = vmatmul.f32.gmra.mxu2 %v4938_v24  ;;  %1189 = vmatmul.f32.gmra.mxu1 %v4939_v13 }
 0x1c9   : >> { %1213 = vmatmul.f32.gmra.mxu3 %v4940_v31 }
 0x1ce   : >> { %1180 = vmatmul.f32.gmra.mxu0 %v4941_v6 }
 0x1cf   : >> { %1204 = vmatmul.f32.gmra.mxu2 %v4942_v25  ;;  %1192 = vmatmul.f32.gmra.mxu1 %v4943_v18  ;;  %v1461_v25 = vld [vmem:[#allocation4 + $0x38] sm:$0xff] }
 0x1d1   : >> { %1216 = vmatmul.f32.gmra.mxu3 %v4944_v32 }
 0x1d6   : >> { %1183 = vmatmul.f32.gmra.mxu0 %v4945_v11 }
 0x1d7   : >> { %1207 = vmatmul.f32.gmra.mxu2 %v4946_v26  ;;  %1195 = vmatmul.f32.gmra.mxu1 %v4947_v19 }
 0x1d9   : >> { %1219 = vmatmul.f32.gmra.mxu3 %v4948_v36 }
 0x23b   : >> { %v1175_v50 = vpop.f32.mrf.mxu0 }
 0x23c   : >> { %v1187_v55 = vpop.f32.mrf.mxu1  ;;  %1234 = vperm.xlu0 %3001, %v1175_v50  }
 0x23d   : >> { %1254 = vperm.xlu2 %3002, %v1187_v55  }
 0x242   : >> { %v1199_v3 = vpop.f32.mrf.mxu2 }
 0x243   : >> { %v1178_v0 = vpop.f32.mrf.mxu0 }
 0x244   : >> { %v1211_v1 = vpop.f32.mrf.mxu3  ;;  %v1190_v4 = vpop.f32.mrf.mxu1 }
 0x245   : >> { %1274 = vperm.xlu2 %3002, %v1199_v3   ;;  %1294 = vperm.xlu0 %3001, %v1211_v1  }
 0x24a   : >> { %v1202_v2 = vpop.f32.mrf.mxu2 }
 0x24b   : >> { %v1181_v5 = vpop.f32.mrf.mxu0 }
 0x24c   : >> { %1244 = vperm.xlu1 %3003, %v1181_v5   ;;  %v1214_v6 = vpop.f32.mrf.mxu3  ;;  %v1193_v8 = vpop.f32.mrf.mxu1 }
 0x24d   : >> { %1239 = vperm.xlu0 %3001, %v1178_v0   ;;  %1259 = vperm.xlu2 %3002, %v1190_v4   ;;  %v1231_v4 = vld [vmem:[%s1230_s9] ss:$8 sm:$0x3] }
 0x24e   : >> { %v4152_v5 = vperm.slane %v1231_v4, 0  ;;  %v4154_v0 = vperm.slane %v1231_v4, 1 }
 0x252   : >> { %v1205_v7 = vpop.f32.mrf.mxu2 }
 0x253   : >> { %v1184_v55 = vpop.f32.mrf.mxu0 }
 0x254   : >> { %1284 = vperm.xlu1 %3003, %v1205_v7   ;;  %v1217_v50 = vpop.f32.mrf.mxu3  ;;  %v1196_v1 = vpop.f32.mrf.mxu1 }
 0x255   : >> { %1279 = vperm.xlu0 %3001, %v1202_v2  }
 0x25a   : >> { %v1208_v9 = vpop.f32.mrf.mxu2 }
 0x25b   : >> { %1289 = vperm.xlu2 %3002, %v1208_v9  }
 0x25c   : >> { %1249 = vperm.xlu1 %3003, %v1184_v55   ;;  %v1220_v3 = vpop.f32.mrf.mxu3  ;;  %v1453_v55 = vld [vmem:[#allocation4 + $0x80] sm:$0xff] }
 0x25d   : >> { %1264 = vperm.xlu0 %3001, %v1193_v8  }
 0x263   : >> { %1304 = vperm.xlu2 %3002, %v1217_v50   ;;  %v4158_v50 = vstv %s1477_s10 }
 0x264   : >> { %1269 = vperm.xlu1 %3003, %v1196_v1   ;;  %v1454_v1 = vld [vmem:[#allocation4 + $0x88] sm:$0xff] }
 0x265   : >> { %1309 = vperm.xlu0 %3001, %v1220_v3  }
 0x26c   : >> { %1299 = vperm.xlu1 %3003, %v1214_v6  }
 0x297   : >> { %v1255_v2 = vpop.permute.xlu2 %1254 }
 0x298   : >> { %v1325_v7 = vadd.f32 %v4152_v5, %v1255_v2  ;;  %v1326_v8 = vadd.f32 %v4154_v0, %v1255_v2 }
 0x29a   : >> { %vm1357_vm13 = vcmp.ge.f32.partialorder %v1325_v7, 0.0  ;;  %vm1358_vm14 = vcmp.ge.f32.partialorder %v1326_v8, 0.0  ;;  %v1389_v9 = vmul.f32 0.2, %v1325_v7  ;;  %v1390_v6 = vmul.f32 0.2, %v1326_v8 }
 0x29c   : >> { %v1421_v3 = vsel %vm1357_vm13, %v1325_v7, %v1389_v9  ;;  %v1422_v10 = vsel %vm1358_vm14, %v1326_v8, %v1390_v6  ;;  %v1462_v8 = vld [vmem:[#allocation4 + $0x58] sm:$0xff] }
 0x29d   : >> { %v1487_v11 = vmul.f32 %v4158_v50, %v1421_v3  ;;  %v1488_v4 = vmul.f32 %v4158_v50, %v1422_v10 }
 0x29f   : >> { %v1519_v12 = vadd.f32 %v1487_v11, %v1453_v55  ;;  %v1520_v13 = vadd.f32 %v1488_v4, %v1454_v1  ;;  %v1275_v18 = vpop.permute.xlu2 %1274 }
 0x2a0   : >> { %v1333_v19 = vadd.f32 %v4152_v5, %v1275_v18  ;;  %v1334_v2 = vadd.f32 %v4154_v0, %v1275_v18 }
 0x2a1   : >> { %1551 = vst [vmem:[#allocation4 + $0x80] sm:$0xff] %v1519_v12 }
 0x2a2   : >> { %1552 = vst [vmem:[#allocation4 + $0x88] sm:$0xff] %v1520_v13  ;;  %vm1365_vm15 = vcmp.ge.f32.partialorder %v1333_v19, 0.0  ;;  %vm1366_vm0 = vcmp.ge.f32.partialorder %v1334_v2, 0.0  ;;  %v1397_v20 = vmul.f32 0.2, %v1333_v19 }
 0x2a3   : >> { %v1398_v24 = vmul.f32 0.2, %v1334_v2 }
 0x2a4   : >> { %v1429_v7 = vsel %vm1365_vm15, %v1333_v19, %v1397_v20  ;;  %v1455_v19 = vld [vmem:[#allocation4 + $0xe8] sm:$0xff] }
 0x2a5   : >> { %v1430_v9 = vsel %vm1366_vm0, %v1334_v2, %v1398_v24  ;;  %v1495_v6 = vmul.f32 %v4158_v50, %v1429_v7  ;;  %v1456_v24 = vld [vmem:[#allocation4 + $0xb8] sm:$0xff] }
 0x2a6   : >> { %v1496_v11 = vmul.f32 %v4158_v50, %v1430_v9 }
 0x2a7   : >> { %v1527_v10 = vadd.f32 %v1495_v6, %v1461_v25  ;;  %v1260_v55 = vpop.permute.xlu2 %1259 }
 0x2a8   : >> { %v1528_v1 = vadd.f32 %v1496_v11, %v1462_v8  ;;  %v1327_v3 = vadd.f32 %v4152_v5, %v1260_v55  ;;  %v1328_v12 = vadd.f32 %v4154_v0, %v1260_v55 }
 0x2a9   : >> { %1559 = vst [vmem:[#allocation4 + $0x38] sm:$0xff] %v1527_v10 }
 0x2aa   : >> { %1560 = vst [vmem:[#allocation4 + $0x58] sm:$0xff] %v1528_v1  ;;  %vm1359_vm13 = vcmp.ge.f32.partialorder %v1327_v3, 0.0  ;;  %vm1360_vm14 = vcmp.ge.f32.partialorder %v1328_v12, 0.0  ;;  %v1391_v13 = vmul.f32 0.2, %v1327_v3  ;;  %v1445_v1 = vld [vmem:[#allocation4 + $0xb0] sm:$0xff] }
 0x2ab   : >> { %v1392_v18 = vmul.f32 0.2, %v1328_v12 }
 0x2ac   : >> { %v1423_v20 = vsel %vm1359_vm13, %v1327_v3, %v1391_v13 }
 0x2ad   : >> { %v1424_v4 = vsel %vm1360_vm14, %v1328_v12, %v1392_v18  ;;  %v1489_v2 = vmul.f32 %v4158_v50, %v1423_v20  ;;  %v1446_v12 = vld [vmem:[#allocation4] sm:$0xff] }
 0x2ae   : >> { %v1490_v25 = vmul.f32 %v4158_v50, %v1424_v4  ;;  %v1235_v7 = vpop.permute.xlu0 %1234 }
 0x2af   : >> { %v1521_v8 = vadd.f32 %v1489_v2, %v1455_v19  ;;  %v1317_v9 = vadd.f32 %v4152_v5, %v1235_v7  ;;  %v1318_v6 = vadd.f32 %v4154_v0, %v1235_v7 }
 0x2b0   : >> { %v1522_v11 = vadd.f32 %v1490_v25, %v1456_v24 }
 0x2b1   : >> { %1553 = vst [vmem:[#allocation4 + $0xe8] sm:$0xff] %v1521_v8  ;;  %vm1349_vm15 = vcmp.ge.f32.partialorder %v1317_v9, 0.0  ;;  %vm1350_vm0 = vcmp.ge.f32.partialorder %v1318_v6, 0.0  ;;  %v1381_v10 = vmul.f32 0.2, %v1317_v9 }
 0x2b2   : >> { %1554 = vst [vmem:[#allocation4 + $0xb8] sm:$0xff] %v1522_v11  ;;  %v1382_v55 = vmul.f32 0.2, %v1318_v6 }
 0x2b3   : >> { %v1413_v3 = vsel %vm1349_vm15, %v1317_v9, %v1381_v10  ;;  %v1467_v10 = vld [vmem:[#allocation4 + $0x70] sm:$0xff] }
 0x2b4   : >> { %v1414_v13 = vsel %vm1350_vm0, %v1318_v6, %v1382_v55  ;;  %v1479_v18 = vmul.f32 %v4158_v50, %v1413_v3  ;;  %v1468_v3 = vld [vmem:[#allocation4 + $0xc0] sm:$0xff] }
 0x2b5   : >> { %v1480_v20 = vmul.f32 %v4158_v50, %v1414_v13  ;;  %v1290_v19 = vpop.permute.xlu2 %1289 }
 0x2b6   : >> { %v1511_v4 = vadd.f32 %v1479_v18, %v1445_v1  ;;  %v1339_v2 = vadd.f32 %v4152_v5, %v1290_v19  ;;  %v1340_v24 = vadd.f32 %v4154_v0, %v1290_v19  ;;  %v1469_v19 = vld [vmem:[#allocation4 + $0xa8] sm:$0xff] }
 0x2b7   : >> { %v1512_v25 = vadd.f32 %v1480_v20, %v1446_v12  ;;  %v1295_v7 = vpop.permute.xlu0 %1294 }
 0x2b8   : >> { %1543 = vst [vmem:[#allocation4 + $0xb0] sm:$0xff] %v1511_v4  ;;  %vm1371_vm13 = vcmp.ge.f32.partialorder %v1339_v2, 0.0  ;;  %vm1372_vm14 = vcmp.ge.f32.partialorder %v1340_v24, 0.0  ;;  %v1403_v8 = vmul.f32 0.2, %v1339_v2  ;;  %v1341_v9 = vadd.f32 %v4152_v5, %v1295_v7  ;;  %v4249_v63 = vld [vmem:[#allocation4 + $0xe8] sm:$0xff] (%p1105_p8) }
 0x2b9   : >> { %1544 = vst [vmem:[#allocation4] sm:$0xff] %v1512_v25  ;;  %v1404_v6 = vmul.f32 0.2, %v1340_v24  ;;  %v1342_v11 = vadd.f32 %v4154_v0, %v1295_v7 }
 0x2ba   : >> { %v1435_v55 = vsel %vm1371_vm13, %v1339_v2, %v1403_v8  ;;  %vm1373_vm15 = vcmp.ge.f32.partialorder %v1341_v9, 0.0  ;;  %v1405_v1 = vmul.f32 0.2, %v1341_v9 }
 0x2bb   : >> { %v1436_v13 = vsel %vm1372_vm14, %v1340_v24, %v1404_v6  ;;  %v1501_v18 = vmul.f32 %v4158_v50, %v1435_v55  ;;  %vm1374_vm0 = vcmp.ge.f32.partialorder %v1342_v11, 0.0  ;;  %v1406_v12 = vmul.f32 0.2, %v1342_v11 }
 0x2bc   : >> { %v1502_v20 = vmul.f32 %v4158_v50, %v1436_v13  ;;  %v1437_v4 = vsel %vm1373_vm15, %v1341_v9, %v1405_v1  ;;  %v1473_v1 = vld [vmem:[#allocation4 + $0xa0] sm:$0xff] }
 0x2bd   : >> { %v1533_v26 = vadd.f32 %v1501_v18, %v1467_v10  ;;  %v1438_v25 = vsel %vm1374_vm0, %v1342_v11, %v1406_v12  ;;  %v1503_v31 = vmul.f32 %v4158_v50, %v1437_v4  ;;  %v1305_v7 = vpop.permute.xlu2 %1304 }
 0x2be   : >> { %v1534_v32 = vadd.f32 %v1502_v20, %v1468_v3  ;;  %v1504_v2 = vmul.f32 %v4158_v50, %v1438_v25  ;;  %v1345_v8 = vadd.f32 %v4152_v5, %v1305_v7  ;;  %v1346_v24 = vadd.f32 %v4154_v0, %v1305_v7  ;;  %v1245_v6 = vpop.permute.xlu1 %1244 }
 0x2bf   : >> { %1565 = vst [vmem:[#allocation4 + $0x70] sm:$0xff] %v1533_v26  ;;  %v1535_v55 = vadd.f32 %v1503_v31, %v1469_v19  ;;  %v1240_v36 = vpop.permute.xlu0 %1239  ;;  %v1321_v13 = vadd.f32 %v4152_v5, %v1245_v6  ;;  %v1322_v9 = vadd.f32 %v4154_v0, %v1245_v6  ;;  %v1474_v19 = vld [vmem:[#allocation4 + $0xf8] sm:$0xff] }
 0x2c0   : >> { %1566 = vst [vmem:[#allocation4 + $0xc0] sm:$0xff] %v1534_v32  ;;  %v1536_v11 = vadd.f32 %v1504_v2, %v1470_v30  ;;  %vm1377_vm13 = vcmp.ge.f32.partialorder %v1345_v8, 0.0  ;;  %vm1378_vm14 = vcmp.ge.f32.partialorder %v1346_v24, 0.0  ;;  %v1409_v10 = vmul.f32 0.2, %v1345_v8  ;;  %v1449_v2 = vld [vmem:[#allocation4 + $0x50] sm:$0xff] }
 0x2c1   : >> { %1567 = vst [vmem:[#allocation4 + $0xa8] sm:$0xff] %v1535_v55  ;;  %v1410_v3 = vmul.f32 0.2, %v1346_v24  ;;  %v1319_v18 = vadd.f32 %v4152_v5, %v1240_v36  ;;  %v1320_v12 = vadd.f32 %v4154_v0, %v1240_v36  ;;  %vm1353_vm15 = vcmp.ge.f32.partialorder %v1321_v13, 0.0  ;;  %v1450_v36 = vld [vmem:[#allocation4 + $0x68] sm:$0xff]  ;;  %v4247_v62 = vld [vmem:[#allocation4] sm:$0xff] (%p1105_p8) }
 0x2c2   : >> { %1568 = vst [vmem:[#allocation4 + $0xd0] sm:$0xff] %v1536_v11  ;;  %v1441_v26 = vsel %vm1377_vm13, %v1345_v8, %v1409_v10  ;;  %vm1354_vm0 = vcmp.ge.f32.partialorder %v1322_v9, 0.0  ;;  %v1385_v31 = vmul.f32 0.2, %v1321_v13  ;;  %v1386_v20 = vmul.f32 0.2, %v1322_v9 }
 0x2c3   : >> { %v1442_v4 = vsel %vm1378_vm14, %v1346_v24, %v1410_v3  ;;  %v1507_v30 = vmul.f32 %v4158_v50, %v1441_v26  ;;  %vm1351_vm4 = vcmp.ge.f32.partialorder %v1319_v18, 0.0  ;;  %vm1352_vm3 = vcmp.ge.f32.partialorder %v1320_v12, 0.0  ;;  %v1447_v10 = vld [vmem:[#allocation4 + $0xd8] sm:$0xff] }
 0x2c4   : >> { %v1508_v32 = vmul.f32 %v4158_v50, %v1442_v4  ;;  %v1383_v25 = vmul.f32 0.2, %v1319_v18  ;;  %v1384_v7 = vmul.f32 0.2, %v1320_v12  ;;  %v1417_v6 = vsel %vm1353_vm15, %v1321_v13, %v1385_v31 }
 0x2c5   : >> { %v1539_v55 = vadd.f32 %v1507_v30, %v1473_v1  ;;  %v1418_v42 = vsel %vm1354_vm0, %v1322_v9, %v1386_v20  ;;  %v1483_v8 = vmul.f32 %v4158_v50, %v1417_v6 }
 0x2c6   : >> { %v1540_v11 = vadd.f32 %v1508_v32, %v1474_v19  ;;  %v1415_v57 = vsel %vm1351_vm4, %v1319_v18, %v1383_v25  ;;  %v1416_v24 = vsel %vm1352_vm3, %v1320_v12, %v1384_v7  ;;  %v1484_v3 = vmul.f32 %v4158_v50, %v1418_v42  ;;  %v1285_v26 = vpop.permute.xlu1 %1284  ;;  %v1465_v32 = vld [vmem:[#allocation4 + $0xe0] sm:$0xff] }
 0x2c7   : >> { %1571 = vst [vmem:[#allocation4 + $0xa0] sm:$0xff] %v1539_v55  ;;  %v1481_v4 = vmul.f32 %v4158_v50, %v1415_v57  ;;  %v1482_v58 = vmul.f32 %v4158_v50, %v1416_v24  ;;  %v1515_v59 = vadd.f32 %v1483_v8, %v1449_v2  ;;  %v1280_v13 = vpop.permute.xlu0 %1279  ;;  %v1337_v1 = vadd.f32 %v4152_v5, %v1285_v26  ;;  %v1463_v2 = vld [vmem:[#allocation4 + $0x40] sm:$0xff] }
 0x2c8   : >> { %1572 = vst [vmem:[#allocation4 + $0xf8] sm:$0xff] %v1540_v11  ;;  %v1516_v9 = vadd.f32 %v1484_v3, %v1450_v36  ;;  %v1335_v31 = vadd.f32 %v4152_v5, %v1280_v13  ;;  %v1336_v20 = vadd.f32 %v4154_v0, %v1280_v13  ;;  %v1338_v18 = vadd.f32 %v4154_v0, %v1285_v26  ;;  %v1464_v36 = vld [vmem:[#allocation4 + $0xc8] sm:$0xff] }
 0x2c9   : >> { %v1513_v12 = vadd.f32 %v1481_v4, %v1447_v10  ;;  %v1514_v42 = vadd.f32 %v1482_v58, %v1448_v56  ;;  %1547 = vst [vmem:[#allocation4 + $0x50] sm:$0xff] %v1515_v59  ;;  %vm1369_vm3 = vcmp.ge.f32.partialorder %v1337_v1, 0.0  ;;  %v1401_v19 = vmul.f32 0.2, %v1337_v1  ;;  %v1466_v59 = vld [vmem:[#allocation4 + $0x90] sm:$0xff] }
 0x2ca   : >> { %1548 = vst [vmem:[#allocation4 + $0x68] sm:$0xff] %v1516_v9  ;;  %vm1367_vm4 = vcmp.ge.f32.partialorder %v1335_v31, 0.0  ;;  %vm1368_vm13 = vcmp.ge.f32.partialorder %v1336_v20, 0.0  ;;  %v1399_v57 = vmul.f32 0.2, %v1335_v31  ;;  %vm1370_vm14 = vcmp.ge.f32.partialorder %v1338_v18, 0.0 }
 0x2cb   : >> { %1545 = vst [vmem:[#allocation4 + $0xd8] sm:$0xff] %v1513_v12  ;;  %v1400_v30 = vmul.f32 0.2, %v1336_v20  ;;  %v1402_v25 = vmul.f32 0.2, %v1338_v18  ;;  %v1433_v7 = vsel %vm1369_vm3, %v1337_v1, %v1401_v19 }
 0x2cc   : >> { %1546 = vst [vmem:[#allocation4 + $0x18] sm:$0xff] %v1514_v42  ;;  %v1431_v6 = vsel %vm1367_vm4, %v1335_v31, %v1399_v57  ;;  %v1499_v55 = vmul.f32 %v4158_v50, %v1433_v7  ;;  %v1451_v57 = vld [vmem:[#allocation4 + $0x30] sm:$0xff] }
 0x2cd   : >> { %v1432_v56 = vsel %vm1368_vm13, %v1336_v20, %v1400_v30  ;;  %v1497_v58 = vmul.f32 %v4158_v50, %v1431_v6  ;;  %v1434_v8 = vsel %vm1370_vm14, %v1338_v18, %v1402_v25  ;;  %v1457_v25 = vld [vmem:[#allocation4 + $0x60] sm:$0xff]  ;;  %v1458_v6 = vld [vmem:[#allocation4 + $0xf0] sm:$0xff] }
 0x2ce   : >> { %v1498_v11 = vmul.f32 %v4158_v50, %v1432_v56  ;;  %v1500_v10 = vmul.f32 %v4158_v50, %v1434_v8  ;;  %v1531_v24 = vadd.f32 %v1499_v55, %v1465_v32  ;;  %v1250_v3 = vpop.permute.xlu1 %1249  ;;  %v1452_v56 = vld [vmem:[#allocation4 + $0x48] sm:$0xff] }
 0x2cf   : >> { %v1529_v26 = vadd.f32 %v1497_v58, %v1463_v2  ;;  %v1265_v4 = vpop.permute.xlu0 %1264  ;;  %v1323_v13 = vadd.f32 %v4152_v5, %v1250_v3  ;;  %v1324_v1 = vadd.f32 %v4154_v0, %v1250_v3 }
 0x2d0   : >> { %v1530_v9 = vadd.f32 %v1498_v11, %v1464_v36  ;;  %v1532_v31 = vadd.f32 %v1500_v10, %v1466_v59  ;;  %1563 = vst [vmem:[#allocation4 + $0xe0] sm:$0xff] %v1531_v24  ;;  %v1329_v20 = vadd.f32 %v4152_v5, %v1265_v4  ;;  %v1330_v12 = vadd.f32 %v4154_v0, %v1265_v4 }
 0x2d1   : >> { %1561 = vst [vmem:[#allocation4 + $0x40] sm:$0xff] %v1529_v26  ;;  %vm1355_vm15 = vcmp.ge.f32.partialorder %v1323_v13, 0.0  ;;  %v1387_v18 = vmul.f32 0.2, %v1323_v13  ;;  %vm1356_vm4 = vcmp.ge.f32.partialorder %v1324_v1, 0.0 }
 0x2d2   : >> { %1562 = vst [vmem:[#allocation4 + $0xc8] sm:$0xff] %v1530_v9  ;;  %vm1361_vm0 = vcmp.ge.f32.partialorder %v1329_v20, 0.0  ;;  %vm1362_vm3 = vcmp.ge.f32.partialorder %v1330_v12, 0.0  ;;  %v1393_v42 = vmul.f32 0.2, %v1329_v20 }
 0x2d3   : >> { %1564 = vst [vmem:[#allocation4 + $0x90] sm:$0xff] %v1532_v31  ;;  %v1394_v19 = vmul.f32 0.2, %v1330_v12  ;;  %v1388_v30 = vmul.f32 0.2, %v1324_v1  ;;  %v1419_v32 = vsel %vm1355_vm15, %v1323_v13, %v1387_v18 }
 0x2d4   : >> { %v1425_v7 = vsel %vm1361_vm0, %v1329_v20, %v1393_v42  ;;  %v1485_v2 = vmul.f32 %v4158_v50, %v1419_v32  ;;  %v1459_v42 = vld [vmem:[#allocation4 + $0x8] sm:$0xff] }
 0x2d5   : >> { %v1426_v55 = vsel %vm1362_vm3, %v1330_v12, %v1394_v19  ;;  %v1491_v36 = vmul.f32 %v4158_v50, %v1425_v7  ;;  %v1420_v58 = vsel %vm1356_vm4, %v1324_v1, %v1388_v30  ;;  %v1475_v30 = vld [vmem:[#allocation4 + $0x20] sm:$0xff]  ;;  %v1476_v7 = vld [vmem:[#allocation4 + $0x98] sm:$0xff] }
 0x2d6   : >> { %v1492_v59 = vmul.f32 %v4158_v50, %v1426_v55  ;;  %v1486_v8 = vmul.f32 %v4158_v50, %v1420_v58  ;;  %v1517_v11 = vadd.f32 %v1485_v2, %v1451_v57  ;;  %v1270_v10 = vpop.permute.xlu1 %1269  ;;  %v1460_v55 = vld [vmem:[#allocation4 + $0x78] sm:$0xff] }
 0x2d7   : >> { %v1523_v24 = vadd.f32 %v1491_v36, %v1457_v25  ;;  %v1310_v3 = vpop.permute.xlu0 %1309  ;;  %v1331_v26 = vadd.f32 %v4152_v5, %v1270_v10  ;;  %v1332_v4 = vadd.f32 %v4154_v0, %v1270_v10 }
 0x2d8   : >> { %v1524_v13 = vadd.f32 %v1492_v59, %v1458_v6  ;;  %v1518_v9 = vadd.f32 %v1486_v8, %v1452_v56  ;;  %1549 = vst [vmem:[#allocation4 + $0x30] sm:$0xff] %v1517_v11  ;;  %v1347_v31 = vadd.f32 %v4152_v5, %v1310_v3  ;;  %v1348_v20 = vadd.f32 %v4154_v0, %v1310_v3 }
 0x2d9   : >> { %1555 = vst [vmem:[#allocation4 + $0x60] sm:$0xff] %v1523_v24  ;;  %vm1363_vm13 = vcmp.ge.f32.partialorder %v1331_v26, 0.0  ;;  %v1395_v1 = vmul.f32 0.2, %v1331_v26  ;;  %vm1364_vm0 = vcmp.ge.f32.partialorder %v1332_v4, 0.0 }
 0x2da   : >> { %1556 = vst [vmem:[#allocation4 + $0xf0] sm:$0xff] %v1524_v13  ;;  %vm1379_vm14 = vcmp.ge.f32.partialorder %v1347_v31, 0.0  ;;  %vm1380_vm15 = vcmp.ge.f32.partialorder %v1348_v20, 0.0  ;;  %v1411_v12 = vmul.f32 0.2, %v1347_v31 }
 0x2db   : >> { %1550 = vst [vmem:[#allocation4 + $0x48] sm:$0xff] %v1518_v9  ;;  %v1412_v18 = vmul.f32 0.2, %v1348_v20  ;;  %v1396_v19 = vmul.f32 0.2, %v1332_v4  ;;  %v1427_v57 = vsel %vm1363_vm13, %v1331_v26, %v1395_v1  ;;  %v1471_v9 = vld [vmem:[#allocation4 + $0x10] sm:$0xff]  ;;  %vm4949_vm13 = vnez (%p1105_p8), %v4829_v23 }
 0x2dc   : >> { %v1443_v32 = vsel %vm1379_vm14, %v1347_v31, %v1411_v12  ;;  %v1493_v25 = vmul.f32 %v4158_v50, %v1427_v57  ;;  %v4229_v57 = vld [vmem:[#allocation4 + $0x50] sm:$0xff] (%p1105_p8)  ;;  %vm4950_vm14 = vnez (%p1105_p8), %v4834_v27 }
 0x2dd   : >> { %v1444_v2 = vsel %vm1380_vm15, %v1348_v20, %v1412_v18  ;;  %v1509_v6 = vmul.f32 %v4158_v50, %v1443_v32  ;;  %v1428_v36 = vsel %vm1364_vm0, %v1332_v4, %v1396_v19  ;;  %v1472_v20 = vld [vmem:[#allocation4 + $0x28] sm:$0xff]  ;;  %v1611_v60 = vsel (%p1105_p8), %vm3819_vm5, %v4229_v57, -1e+30 }
 0x2de   : >> { %v1510_v56 = vmul.f32 %v4158_v50, %v1444_v2  ;;  %v1494_v58 = vmul.f32 %v4158_v50, %v1428_v36  ;;  %v1525_v59 = vadd.f32 %v1493_v25, %v1459_v42  ;;  %v1300_v8 = vpop.permute.xlu1 %1299  ;;  %v4225_v42 = vld [vmem:[#allocation4 + $0x80] sm:$0xff] (%p1105_p8)  ;;  %v4227_v19 = vld [vmem:[#allocation4 + $0x88] sm:$0xff] (%p1105_p8)  ;;  %v4239_v25 = vld [vmem:[#allocation4 + $0xb0] sm:$0xff] (%p1105_p8)  ;;  %vm4951_vm15 = vnez (%p1105_p8), %v4866_v37 }
 0x2df   : >> { %v1541_v11 = vadd.f32 %v1509_v6, %v1475_v30  ;;  %v1343_v10 = vadd.f32 %v4152_v5, %v1300_v8  ;;  %v1344_v24 = vadd.f32 %v4154_v0, %v1300_v8  ;;  %v1616_v30 = vsel (%p1105_p8), %vm3853_vm10, %v4227_v19, -1e+30  ;;  %v4237_v32 = vld [vmem:[#allocation4 + $0x68] sm:$0xff] (%p1105_p8)  ;;  %v4257_v36 = vld [vmem:[#allocation4 + $0xb8] sm:$0xff] (%p1105_p8) }
 0x2e0   : >> { %v1542_v3 = vadd.f32 %v1510_v56, %v1476_v7  ;;  %v1526_v26 = vadd.f32 %v1494_v58, %v1460_v55  ;;  %1557 = vst [vmem:[#allocation4 + $0x8] sm:$0xff] %v1525_v59  ;;  %v1612_v61 = vsel (%p1105_p8), %vm3823_vm6, %v4237_v32, -1e+30  ;;  %v1607_v6 = vsel (%p1105_p8), %vm3794_vm1, %v4239_v25, -1e+30  ;;  %v4259_v56 = vld [vmem:[#allocation4 + $0x30] sm:$0xff] (%p1105_p8) }
 0x2e1   : >> { %1573 = vst [vmem:[#allocation4 + $0x20] sm:$0xff] %v1541_v11  ;;  %vm1375_vm3 = vcmp.ge.f32.partialorder %v1343_v10, 0.0  ;;  %vm1376_vm4 = vcmp.ge.f32.partialorder %v1344_v24, 0.0  ;;  %v1407_v13 = vmul.f32 0.2, %v1343_v10  ;;  %v1645_v2 = vmax.f32 (%p1105_p8), %v1611_v60, %v1612_v61  ;;  %v4263_v8 = vld [vmem:[#allocation4 + $0xd8] sm:$0xff] (%p1105_p8) }
 0x2e2   : >> { %1574 = vst [vmem:[#allocation4 + $0x98] sm:$0xff] %v1542_v3  ;;  %v1408_v4 = vmul.f32 0.2, %v1344_v24  ;;  %v1608_v55 = vsel (%p1105_p8), %vm3798_vm2, %v4247_v62, -1e+30  ;;  %v4261_v59 = vld [vmem:[#allocation4 + $0x48] sm:$0xff] (%p1105_p8)  ;;  %vm4952_vm0 = vnez (%p1105_p8), %v4868_v38 }
 0x2e3   : >> { %1558 = vst [vmem:[#allocation4 + $0x78] sm:$0xff] %v1526_v26  ;;  %v1439_v31 = vsel %vm1375_vm3, %v1343_v10, %v1407_v13  ;;  %v1639_v58 = vmax.f32 (%p1105_p8), %v1607_v6, %v1608_v55  ;;  %1646 = vmax.xlane.f32.xlu1 (%p1105_p8), %v1645_v2  ;;  %v1617_v11 = vsel (%p1105_p8), %vm3857_vm11, %v4249_v63, -1e+30  ;;  %v1618_v10 = vsel (%p1105_p8), %vm3861_vm12, %v4257_v36, -1e+30 }
 0x2e4   : >> { %v1440_v1 = vsel %vm1376_vm4, %v1344_v24, %v1408_v4  ;;  %v1505_v12 = vmul.f32 %v4158_v50, %v1439_v31  ;;  %v4271_v24 = vld [vmem:[#allocation4 + $0x18] sm:$0xff] (%p1105_p8)  ;;  %v1613_v3 = vsel (%p1105_p8), %vm3836_vm7, %v4259_v56, -1e+30  ;;  %v1614_v26 = vsel (%p1105_p8), %vm3840_vm8, %v4261_v59, -1e+30 }
 0x2e5   : >> { %v1506_v5 = vmul.f32 %v4158_v50, %v1440_v1  ;;  %1107 = sbr.rel (!%p1105_p8) target bundleno = 413 (0x19d), region = 98  ;;  %v1615_v50 = vsel (%p1105_p8), %vm3844_vm9, %v4225_v42, -1e+30  ;;  %1640 = vmax.xlane.f32.xlu0 (%p1105_p8), %v1639_v58  ;;  %v1609_v13 = vsel (%p1105_p8), %vm4949_vm13, %v4263_v8, -1e+30  ;;  %v1648_v31 = vmax.f32 (%p1105_p8), %v1613_v3, %v1614_v26  ;;  %v4285_v1 = vld [vmem:[#allocation4 + $0x38] sm:$0xff] (%p1105_p8) }
 0x2e6   : >> { %v1537_v18 = vadd.f32 %v1505_v12, %v1471_v9  ;;  %v1651_v7 = vmax.f32 (%p1105_p8), %v1615_v50, %v1616_v30  ;;  %v1610_v4 = vsel (%p1105_p8), %vm4950_vm14, %v4271_v24, -1e+30  ;;  %v1654_v9 = vmax.f32 (%p1105_p8), %v1617_v11, %v1618_v10  ;;  %v4287_v12 = vld [vmem:[#allocation4 + $0x58] sm:$0xff] (%p1105_p8)  ;;  %v4295_v50 = vld [vmem:[#allocation4 + $0xf0] sm:$0xff] (%p1105_p8)  ;;  %v4317_v3 = vld [vmem:[#allocation4 + $0xc0] sm:$0xff] (%p1105_p8) }
 0x2e7   : >> { %v1538_v0 = vadd.f32 %v1506_v5, %v1472_v20  ;;  %v1642_v20 = vmax.f32 (%p1105_p8), %v1609_v13, %v1610_v4  ;;  %v4289_v5 = vld [vmem:[#allocation4 + $0x8] sm:$0xff] (%p1105_p8)  ;;  %v1623_v30 = vsel (%p1105_p8), %vm4951_vm15, %v4285_v1, -1e+30  ;;  %vm4953_vm3 = vnez (%p1105_p8), %v4860_v16  ;;  %v4315_v10 = vld [vmem:[#allocation4 + $0x70] sm:$0xff] (%p1105_p8)  ;;  %v4319_v26 = vld [vmem:[#allocation4 + $0xe0] sm:$0xff] (%p1105_p8) }
 0x2e8   : >> { %1569 = vst [vmem:[#allocation4 + $0x10] sm:$0xff] %v1537_v18  ;;  %1652 = vmax.xlane.f32.xlu2 (%p1105_p8), %v1651_v7  ;;  %v1624_v7 = vsel (%p1105_p8), %vm4952_vm0, %v4287_v12, -1e+30  ;;  %v1621_v60 = vsel (%p1105_p8), %vm4953_vm3, %v4289_v5, -1e+30  ;;  %vm4954_vm4 = vnez (%p1105_p8), %v4863_v17  ;;  %vm4955_vm14 = vnez (%p1105_p8), %v4856_v14  ;;  %v4321_v13 = vld [vmem:[#allocation4 + $0x90] sm:$0xff] (%p1105_p8) }
 0x2e9   : >> { %1570 = vst [vmem:[#allocation4 + $0x28] sm:$0xff] %v1538_v0  ;;  %v4293_v0 = vld [vmem:[#allocation4 + $0x60] sm:$0xff] (%p1105_p8)  ;;  %vm4956_vm15 = vnez (%p1105_p8), %v4858_v15  ;;  %v1663_v55 = vmax.f32 (%p1105_p8), %v1623_v30, %v1624_v7  ;;  %vm4958_vm3 = vnez (%p1105_p8), %v4884_v48  ;;  %vm4961_vm0 = vnez (%p1105_p8), %v4870_v43  ;;  %v4355_v43 = vld [vmem:[#allocation4 + $0xd0] sm:$0xff] (%p1105_p8) }
 0x2ea   : > { %v4291_v18 = vld [vmem:[#allocation4 + $0x78] sm:$0xff]  ;;  %v1619_v2 = vsel %vm4955_vm14, %v4293_v0, -1e+30  ;;  %v1620_v6 = vsel %vm4956_vm15, %v4295_v50, -1e+30  ;;  %v4323_v4 = vld [vmem:[#allocation4 + $0x40] sm:$0xff]  ;;  %vm4959_vm15 = vnez %v4876_v45  ;;  %vm4960_vm14 = vnez %v4879_v46 }
 0x2eb   : > { %1649 = vmax.xlane.f32.xlu1 %v1648_v31  ;;  %v1622_v61 = vsel %vm4954_vm4, %v4291_v18, -1e+30  ;;  %v1657_v11 = vmax.f32 %v1619_v2, %v1620_v6  ;;  %vm4957_vm4 = vnez %v4882_v47  ;;  %v1627_v30 = vsel %vm4959_vm15, %v4319_v26, -1e+30  ;;  %v4353_v46 = vld [vmem:[#allocation4 + $0xa8] sm:$0xff] }
 0x2ec   : > { %v1660_v58 = vmax.f32 %v1621_v60, %v1622_v61  ;;  %v1629_v31 = vsel %vm4957_vm4, %v4315_v10, -1e+30  ;;  %v1628_v7 = vsel %vm4960_vm14, %v4321_v13, -1e+30  ;;  %v1625_v60 = vsel %vm4961_vm0, %v4323_v4, -1e+30 }
 0x2ed   : > { %1643 = vmax.xlane.f32.xlu0 %v1642_v20  ;;  %v1630_v20 = vsel %vm4958_vm3, %v4317_v3, -1e+30  ;;  %vm4962_vm4 = vnez %v4873_v44  ;;  %v1669_v6 = vmax.f32 %v1627_v30, %v1628_v7  ;;  %vm4963_vm14 = vnez %v4898_v53 }
 0x2ee   : > { %v1672_v2 = vmax.f32 %v1629_v31, %v1630_v20  ;;  %vm4964_vm15 = vnez %v4901_v54  ;;  %vm4966_vm0 = vnez %v4895_v52  ;;  %vm4967_vm3 = vnez %v4886_v49  ;;  %v4972_v52 = vld [vmem:[#allocation40_spill] sm:$0xff]  ;;  %v4974_v49 = vld [vmem:[#allocation41_spill] sm:$0xff] }
 0x2ef   : > { %v4349_v45 = vld [vmem:[#allocation4 + $0x10] sm:$0xff]  ;;  %v1631_v7 = vsel %vm4967_vm3, %v4353_v46, -1e+30 }
 0x2f0   : > { %1655 = vmax.xlane.f32.xlu2 %v1654_v9  ;;  %v4325_v9 = vld [vmem:[#allocation4 + $0xc8] sm:$0xff] }
 0x2f1   : > { %v1626_v61 = vsel %vm4962_vm4, %v4325_v9, -1e+30  ;;  %v4351_v17 = vld [vmem:[#allocation4 + $0x28] sm:$0xff]  ;;  %vm4965_vm4 = vnez %v4892_v51  ;;  %v4377_v51 = vld [vmem:[#allocation4 + $0x98] sm:$0xff] }
 0x2f2   : > { %v1633_v20 = vsel %vm4965_vm4, %v4349_v45, -1e+30  ;;  %v1634_v30 = vsel %vm4966_vm0, %v4351_v17, -1e+30  ;;  %4971 = vst [vmem:[#allocation13_spill] sm:$0xff] %v4377_v51  ;;  %vm4973_vm0 = vnez %v4972_v52  ;;  %vm4975_vm4 = vnez %v4974_v49 }
 0x2f3   : > { %1661 = vmax.xlane.f32.xlu1 %v1660_v58  ;;  %v4345_v58 = vld [vmem:[#allocation4 + $0xa0] sm:$0xff]  ;;  %v1678_v54 = vmax.f32 %v1633_v20, %v1634_v30  ;;  %v1638_v16 = vsel %vm4975_vm4, %v4377_v51, -1e+30 }
 0x2f4   : > { %v1635_v44 = vsel %vm4963_vm14, %v4345_v58, -1e+30 }
 0x2f5   : > { %1658 = vmax.xlane.f32.xlu0 %v1657_v11  ;;  %v4347_v11 = vld [vmem:[#allocation4 + $0xf8] sm:$0xff] }
 0x2f6   : > { %v1636_v31 = vsel %vm4964_vm15, %v4347_v11, -1e+30 }
 0x2f8   : > { %1664 = vmax.xlane.f32.xlu2 %v1663_v55  ;;  %v1666_v55 = vmax.f32 %v1625_v60, %v1626_v61  ;;  %v4968_v60 = vld [vmem:[#allocation35_spill] sm:$0xff] }
 0x2f9   : > { %vm4969_vm14 = vnez %v4968_v60 }
 0x2fa   : > { %v1632_v61 = vsel %vm4969_vm14, %v4355_v43, -1e+30 }
 0x2fb   : > { %1670 = vmax.xlane.f32.xlu1 %v1669_v6  ;;  %v1675_v6 = vmax.f32 %v1631_v7, %v1632_v61 }
 0x2fd   : > { %1667 = vmax.xlane.f32.xlu0 %v1666_v55  ;;  %v4375_v55 = vld [vmem:[#allocation4 + $0x20] sm:$0xff] }
 0x2fe   : > { %4970 = vst [vmem:[#allocation12_spill] sm:$0xff] %v4375_v55  ;;  %v1637_v53 = vsel %vm4973_vm0, %v4375_v55, -1e+30 }
 0x2ff   : > { %v1684_v60 = vmax.f32 %v1637_v53, %v1638_v16 }
 0x300   : > { %1673 = vmax.xlane.f32.xlu2 %v1672_v2  ;;  %v1681_v2 = vmax.f32 %v1635_v44, %v1636_v31 }
 0x303   : > { %1679 = vmax.xlane.f32.xlu1 %v1678_v54 }
 0x305   : > { %1676 = vmax.xlane.f32.xlu0 %v1675_v6 }
 0x308   : > { %1682 = vmax.xlane.f32.xlu2 %v1681_v2 }
 0x30d   : > { %1685 = vmax.xlane.f32.xlu0 %v1684_v60 }
 0x356   : > { %v1647_v31 = vpop.xlane.xlu1 %1646 }
 0x357   : > { %vm1689_vm3 = vcmp.lt.f32.partialorder %v1647_v31, -1e+29 }
 0x358   : > { %v1641_v30 = vpop.xlane.xlu0 %1640  ;;  %v1705_v54 = vsel %vm1689_vm3, 0.0, %v1647_v31 }
 0x359   : > { %vm1687_vm15 = vcmp.lt.f32.partialorder %v1641_v30, -1e+29  ;;  %v1723_v61 = vsub.f32 %v4229_v57, %v1705_v54  ;;  %v1724_v2 = vsub.f32 %v4237_v32, %v1705_v54 }
 0x35a   : > { %v1703_v6 = vsel %vm1687_vm15, 0.0, %v1641_v30 }
 0x35b   : > { %v1653_v44 = vpop.xlane.xlu2 %1652  ;;  %v1719_v16 = vsub.f32 %v4239_v25, %v1703_v6  ;;  %v1720_v53 = vsub.f32 %v4247_v62, %v1703_v6  ;;  %v1759_v60 = vmul.f32 1.442695, %v1723_v61 }
 0x35c   : > { %vm1691_vm14 = vcmp.lt.f32.partialorder %v1653_v44, -1e+29 }
 0x35d   : > { %v1707_v20 = vsel %vm1691_vm14, 0.0, %v1653_v44  ;;  %v1761_v44 = vmul.f32 1.442695, %v1724_v2  ;;  %v1751_v51 = vmul.f32 1.442695, %v1719_v16 }
 0x35e   : > { %v1727_v7 = vsub.f32 %v4225_v42, %v1707_v20  ;;  %v1728_v49 = vsub.f32 %v4227_v19, %v1707_v20  ;;  %v1753_v55 = vmul.f32 1.442695, %v1720_v53  ;;  %v1650_v57 = vpop.xlane.xlu1 %1649 }
 0x35f   : > { %vm1690_vm15 = vcmp.lt.f32.partialorder %v1650_v57, -1e+29 }
 0x360   : > { %v1767_v52 = vmul.f32 1.442695, %v1727_v7  ;;  %v1769_v31 = vmul.f32 1.442695, %v1728_v49  ;;  %v1644_v30 = vpop.xlane.xlu0 %1643  ;;  %v1706_v62 = vsel %vm1690_vm15, 0.0, %v1650_v57 }
 0x361   : > { %v1725_v20 = vsub.f32 %v4259_v56, %v1706_v62  ;;  %vm1688_vm3 = vcmp.lt.f32.partialorder %v1644_v30, -1e+29 }
 0x362   : > { %3116 = vpow2.f32 %v1767_v52  ;;  %v1726_v52 = vsub.f32 %v4261_v59, %v1706_v62  ;;  %v1704_v54 = vsel %vm1688_vm3, 0.0, %v1644_v30 }
 0x363   : > { %v1656_v42 = vpop.xlane.xlu2 %1655  ;;  %3118 = vpow2.f32 %v1759_v60  ;;  %v1763_v2 = vmul.f32 1.442695, %v1725_v20 }
 0x364   : > { %vm1692_vm14 = vcmp.lt.f32.partialorder %v1656_v42, -1e+29  ;;  %3120 = vpow2.f32 %v1761_v44  ;;  %v1765_v6 = vmul.f32 1.442695, %v1726_v52 }
 0x365   : > { %v1708_v32 = vsel %vm1692_vm14, 0.0, %v1656_v42  ;;  %3122 = vpow2.f32 %v1751_v51  ;;  %v1721_v51 = vsub.f32 %v4263_v8, %v1704_v54 }
 0x366   : > { %v1729_v19 = vsub.f32 %v4249_v63, %v1708_v32  ;;  %v1730_v25 = vsub.f32 %v4257_v36, %v1708_v32  ;;  %3124 = vpow2.f32 %v1753_v55  ;;  %v1722_v63 = vsub.f32 %v4271_v24, %v1704_v54  ;;  %v1662_v8 = vpop.xlane.xlu1 %1661 }
 0x367   : > { %3126 = vpow2.f32 %v1769_v31  ;;  %v1755_v55 = vmul.f32 1.442695, %v1721_v51 }
 0x368   : > { %v1771_v49 = vmul.f32 1.442695, %v1729_v19  ;;  %v1773_v7 = vmul.f32 1.442695, %v1730_v25  ;;  %v3117_v61 = vpop.eup %3116  ;;  %v1757_v56 = vmul.f32 1.442695, %v1722_v63  ;;  %v1659_v31 = vpop.xlane.xlu0 %1658 }
 0x369   : > { %v3119_v16 = vpop.eup %3118  ;;  %v4427_v22 = vsel %vm3844_vm9, %v3117_v61, 0.0  ;;  %vm4977_vm9 = vnez %v4866_v37 }
 0x36a   : > { %3128 = vpow2.f32 %v1771_v49  ;;  %v3121_v36 = vpop.eup %3120  ;;  %v4399_v59 = vsel %vm3819_vm5, %v3119_v16, 0.0  ;;  %vm1693_vm5 = vcmp.lt.f32.partialorder %v1659_v31, -1e+29 }
 0x36b   : > { %3130 = vpow2.f32 %v1773_v7  ;;  %v1665_v53 = vpop.xlane.xlu2 %1664  ;;  %v3123_v60 = vpop.eup %3122  ;;  %v4403_v44 = vsel %vm3823_vm6, %v3121_v36, 0.0  ;;  %v1709_v19 = vsel %vm1693_vm5, 0.0, %v1659_v31  ;;  %vm1694_vm6 = vcmp.lt.f32.partialorder %v1662_v8, -1e+29 }
 0x36c   : > { %3132 = vpow2.f32 %v1763_v2  ;;  %vm1695_vm14 = vcmp.lt.f32.partialorder %v1665_v53, -1e+29  ;;  %v3125_v24 = vpop.eup %3124  ;;  %v1853_v57 = vadd.f32 %v4403_v44, %v4399_v59  ;;  %v4409_v28 = vsel %vm3794_vm1, %v3123_v60, 0.0 }
 0x36d   : > { %3134 = vpow2.f32 %v1765_v6  ;;  %v1711_v42 = vsel %vm1695_vm14, 0.0, %v1665_v53  ;;  %v3127_v32 = vpop.eup %3126  ;;  %v4415_v25 = vsel %vm3798_vm2, %v3125_v24, 0.0  ;;  %v1731_v52 = vsub.f32 %v4293_v0, %v1709_v19 }
 0x36e   : > { %3136 = vpow2.f32 %v1755_v55  ;;  %v1735_v30 = vsub.f32 %v4285_v1, %v1711_v42  ;;  %v1736_v29 = vsub.f32 %v4287_v12, %v1711_v42  ;;  %1854 = vadd.xlane.f32.xlu0 %v1853_v57  ;;  %v1732_v49 = vsub.f32 %v4295_v50, %v1709_v19  ;;  %v1671_v55 = vpop.xlane.xlu1 %1670 }
 0x36f   : > { %3138 = vpow2.f32 %v1757_v56  ;;  %v1847_v1 = vadd.f32 %v4415_v25, %v4409_v28  ;;  %v1710_v12 = vsel %vm1694_vm6, 0.0, %v1662_v8  ;;  %v1775_v6 = vmul.f32 1.442695, %v1731_v52 }
 0x370   : > { %v3129_v62 = vpop.eup %3128  ;;  %v1783_v20 = vmul.f32 1.442695, %v1735_v30  ;;  %v1785_v21 = vmul.f32 1.442695, %v1736_v29  ;;  %v1777_v51 = vmul.f32 1.442695, %v1732_v49  ;;  %v1733_v0 = vsub.f32 %v4289_v5, %v1710_v12  ;;  %v1668_v60 = vpop.xlane.xlu0 %1667 }
 0x371   : > { %v3131_v7 = vpop.eup %3130  ;;  %v4423_v54 = vsel %vm3857_vm11, %v3129_v62, 0.0  ;;  %1848 = vadd.xlane.f32.xlu1 %v1847_v1  ;;  %v1734_v16 = vsub.f32 %v4291_v18, %v1710_v12  ;;  %vm1696_vm2 = vcmp.lt.f32.partialorder %v1668_v60, -1e+29  ;;  %v4449_v24 = vsel %vm3853_vm10, %v3127_v32, 0.0 }
 0x372   : > { %v3133_v2 = vpop.eup %3132  ;;  %3140 = vpow2.f32 %v1783_v20  ;;  %v4433_v40 = vsel %vm3861_vm12, %v3131_v7, 0.0  ;;  %v1779_v36 = vmul.f32 1.442695, %v1733_v0  ;;  %v1712_v42 = vsel %vm1696_vm2, 0.0, %v1668_v60 }
 0x373   : > { %v3135_v50 = vpop.eup %3134  ;;  %3142 = vpow2.f32 %v1785_v21  ;;  %v1674_v63 = vpop.xlane.xlu2 %1673  ;;  %v4437_v35 = vsel %vm3836_vm7, %v3133_v2, 0.0  ;;  %v1862_v5 = vadd.f32 %v4433_v40, %v4423_v54  ;;  %v1781_v18 = vmul.f32 1.442695, %v1734_v16 }
 0x374   : > { %v3137_v61 = vpop.eup %3136  ;;  %3144 = vpow2.f32 %v1775_v6  ;;  %vm1698_vm1 = vcmp.lt.f32.partialorder %v1674_v63, -1e+29  ;;  %v4443_v41 = vsel %vm3840_vm8, %v3135_v50, 0.0  ;;  %v1738_v29 = vsub.f32 %v4325_v9, %v1712_v42 }
 0x375   : > { %v3139_v56 = vpop.eup %3138  ;;  %3146 = vpow2.f32 %v1777_v51  ;;  %v1714_v53 = vsel %vm1698_vm1, 0.0, %v1674_v63  ;;  %v1856_v31 = vadd.f32 %v4443_v41, %v4437_v35  ;;  %v4455_v34 = vsel %vm4949_vm13, %v3137_v61, 0.0 }
 0x376   : > { %v1741_v33 = vsub.f32 %v4315_v10, %v1714_v53  ;;  %v1742_v8 = vsub.f32 %v4317_v3, %v1714_v53  ;;  %3148 = vpow2.f32 %v1779_v36  ;;  %1863 = vadd.xlane.f32.xlu0 %v1862_v5  ;;  %v1737_v3 = vsub.f32 %v4323_v4, %v1712_v42  ;;  %v1680_v1 = vpop.xlane.xlu1 %1679 }
 0x377   : > { %3150 = vpow2.f32 %v1781_v18  ;;  %vm4976_vm7 = vnez %v4834_v27  ;;  %vm1697_vm8 = vcmp.lt.f32.partialorder %v1671_v55, -1e+29  ;;  %v1789_v20 = vmul.f32 1.442695, %v1738_v29 }
 0x378   : > { %v3141_v57 = vpop.eup %3140  ;;  %v1795_v30 = vmul.f32 1.442695, %v1741_v33  ;;  %v1797_v10 = vmul.f32 1.442695, %v1742_v8  ;;  %v4461_v32 = vsel %vm4976_vm7, %v3139_v56, 0.0  ;;  %v1713_v52 = vsel %vm1697_vm8, 0.0, %v1671_v55  ;;  %v1677_v6 = vpop.xlane.xlu0 %1676 }
 0x379   : > { %v3143_v39 = vpop.eup %3142  ;;  %v4465_v19 = vsel %vm4977_vm9, %v3141_v57, 0.0  ;;  %v1787_v62 = vmul.f32 1.442695, %v1737_v3  ;;  %v1850_v4 = vadd.f32 %v4461_v32, %v4455_v34  ;;  %1857 = vadd.xlane.f32.xlu1 %v1856_v31  ;;  %vm4978_vm10 = vnez %v4868_v38  ;;  %v4985_v57 = vld [vmem:[#allocation29_spill] sm:$0xff]  ;;  %v4989_v3 = vld [vmem:[#allocation31_spill] sm:$0xff] }
 0x37a   : > { %v3145_v23 = vpop.eup %3144  ;;  %3152 = vpow2.f32 %v1795_v30  ;;  %v4471_v27 = vsel %vm4978_vm10, %v3143_v39, 0.0  ;;  %vm4979_vm11 = vnez %v4856_v14  ;;  %v1739_v49 = vsub.f32 %v4319_v26, %v1713_v52 }
 0x37b   : > { %v3147_v21 = vpop.eup %3146  ;;  %3154 = vpow2.f32 %v1797_v10  ;;  %v1683_v9 = vpop.xlane.xlu2 %1682  ;;  %v4475_v37 = vsel %vm4979_vm11, %v3145_v23, 0.0  ;;  %1851 = vadd.xlane.f32.xlu2 %v1850_v4  ;;  %v1740_v7 = vsub.f32 %v4321_v13, %v1713_v52  ;;  %v1871_v38 = vadd.f32 %v4471_v27, %v4465_v19  ;;  %v4987_v10 = vld [vmem:[#allocation30_spill] sm:$0xff] }
 0x37c   : > { %3156 = vpow2.f32 %v1787_v62  ;;  %vm1701_vm12 = vcmp.lt.f32.partialorder %v1683_v9, -1e+29  ;;  %v3149_v12 = vpop.eup %3148  ;;  %vm4980_vm13 = vnez %v4858_v15  ;;  %v1791_v50 = vmul.f32 1.442695, %v1739_v49  ;;  %v4992_v49 = vld [vmem:[#allocation13_spill] sm:$0xff] }
 0x37d   : > { %3158 = vpow2.f32 %v1789_v20  ;;  %v1717_v2 = vsel %vm1701_vm12, 0.0, %v1683_v9  ;;  %v4483_v14 = vsel %vm4980_vm13, %v3147_v21, 0.0  ;;  %v3151_v26 = vpop.eup %3150  ;;  %v1793_v63 = vmul.f32 1.442695, %v1740_v7  ;;  %v4991_v9 = vld [vmem:[#allocation12_spill] sm:$0xff] }
 0x37e   : > { %v1747_v51 = vsub.f32 %v4345_v58, %v1717_v2  ;;  %v1748_v0 = vsub.f32 %v4347_v11, %v1717_v2  ;;  %vm1699_vm15 = vcmp.lt.f32.partialorder %v1677_v6, -1e+29  ;;  %1872 = vadd.xlane.f32.xlu0 %v1871_v38  ;;  %v1865_v13 = vadd.f32 %v4483_v14, %v4475_v37  ;;  %v4993_v2 = vld [vmem:[#allocation38_spill] sm:$0xff] }
 0x37f   : > { %vm1700_vm3 = vcmp.lt.f32.partialorder %v1680_v1, -1e+29  ;;  %v1715_v5 = vsel %vm1699_vm15, 0.0, %v1677_v6  ;;  %v1859_v15 = vadd.f32 %v4449_v24, %v4427_v22  ;;  %3160 = vpow2.f32 %v1791_v50  ;;  %v4995_v50 = vld [vmem:[#allocation39_spill] sm:$0xff] }
 0x380   : > { %v3153_v16 = vpop.eup %3152  ;;  %v1807_v61 = vmul.f32 1.442695, %v1747_v51  ;;  %v1809_v36 = vmul.f32 1.442695, %v1748_v0  ;;  %v1743_v58 = vsub.f32 %v4353_v46, %v1715_v5  ;;  %v1744_v11 = vsub.f32 %v4355_v43, %v1715_v5  ;;  %v4999_v5 = vld [vmem:[#allocation32_spill] sm:$0xff] }
 0x381   : > { %v3155_v55 = vpop.eup %3154  ;;  %v1716_v56 = vsel %vm1700_vm3, 0.0, %v1680_v1  ;;  %vm4981_vm14 = vnez %v4882_v47  ;;  %1866 = vadd.xlane.f32.xlu1 %v1865_v13  ;;  %vm4982_vm5 = vnez %v4884_v48  ;;  %v1686_v47 = vpop.xlane.xlu0 %1685  ;;  %vm4986_vm1 = vnez %v4985_v57 }
 0x382   : > { %v3157_v53 = vpop.eup %3156  ;;  %3162 = vpow2.f32 %v1807_v61  ;;  %v1745_v18 = vsub.f32 %v4349_v45, %v1716_v56  ;;  %v1746_v60 = vsub.f32 %v4351_v17, %v1716_v56  ;;  %v4497_v33 = vsel %vm4981_vm14, %v3153_v16, 0.0  ;;  %v4983_v45 = vld [vmem:[#allocation28_spill] sm:$0xff]  ;;  %v4997_v61 = vld [vmem:[#allocation34_spill] sm:$0xff] }
 0x383   : > { %v3159_v8 = vpop.eup %3158  ;;  %3164 = vpow2.f32 %v1809_v36  ;;  %v1799_v42 = vmul.f32 1.442695, %v1743_v58  ;;  %v1801_v31 = vmul.f32 1.442695, %v1744_v11  ;;  %v4501_v46 = vsel %vm4982_vm5, %v3155_v55, 0.0  ;;  %1860 = vadd.xlane.f32.xlu2 %v1859_v15  ;;  %v5001_v55 = vld [vmem:[#allocation33_spill] sm:$0xff] }
 0x384   : > { %3166 = vpow2.f32 %v1793_v63  ;;  %v1880_v43 = vadd.f32 %v4501_v46, %v4497_v33  ;;  %vm4984_vm6 = vnez %v4983_v45  ;;  %v4511_v30 = vsel %vm4986_vm1, %v3151_v26, 0.0  ;;  %v5003_v11 = vld [vmem:[#allocation35_spill] sm:$0xff] }
 0x385   : > { %v4507_v17 = vsel %vm4984_vm6, %v3149_v12, 0.0  ;;  %3168 = vpow2.f32 %v1799_v42  ;;  %vm4988_vm2 = vnez %v4987_v10  ;;  %vm4990_vm7 = vnez %v4989_v3  ;;  %v3161_v23 = vpop.eup %3160  ;;  %v5007_v10 = vld [vmem:[#allocation36_spill] sm:$0xff] }
 0x386   : > { %v4515_v48 = vsel %vm4988_vm2, %v3157_v53, 0.0  ;;  %v4519_v29 = vsel %vm4990_vm7, %v3159_v8, 0.0  ;;  %3170 = vpow2.f32 %v1801_v31  ;;  %v1803_v39 = vmul.f32 1.442695, %v1745_v18  ;;  %1881 = vadd.xlane.f32.xlu0 %v1880_v43 }
 0x387   : > { %vm1702_vm8 = vcmp.lt.f32.partialorder %v1686_v47, -1e+29  ;;  %v1805_v62 = vmul.f32 1.442695, %v1746_v60  ;;  %v1874_v4 = vadd.f32 %v4519_v29, %v4515_v48  ;;  %v1868_v1 = vadd.f32 %v4511_v30, %v4507_v17 }
 0x388   : > { %v1718_v20 = vsel %vm1702_vm8, 0.0, %v1686_v47  ;;  %v3163_v21 = vpop.eup %3162  ;;  %vm4994_vm9 = vnez %v4993_v2  ;;  %3172 = vpow2.f32 %v1803_v39  ;;  %vm4996_vm10 = vnez %v4995_v50  ;;  %v5009_v39 = vld [vmem:[#allocation37_spill] sm:$0xff] }
 0x389   : > { %v1749_v52 = vsub.f32 %v4991_v9, %v1718_v20  ;;  %v1750_v7 = vsub.f32 %v4992_v49, %v1718_v20  ;;  %v3165_v12 = vpop.eup %3164  ;;  %v4529_v6 = vsel %vm4994_vm9, %v3163_v21, 0.0  ;;  %3174 = vpow2.f32 %v1805_v62  ;;  %1875 = vadd.xlane.f32.xlu1 %v1874_v4 }
 0x38a   : > { %v3167_v38 = vpop.eup %3166  ;;  %v4533_v26 = vsel %vm4996_vm10, %v3165_v12, 0.0  ;;  %vm4998_vm11 = vnez %v4997_v61  ;;  %vm5000_vm12 = vnez %v4999_v5  ;;  %vm5002_vm13 = vnez %v5001_v55 }
 0x38b   : > { %v1811_v51 = vmul.f32 1.442695, %v1749_v52  ;;  %v1813_v0 = vmul.f32 1.442695, %v1750_v7  ;;  %v3169_v63 = vpop.eup %3168  ;;  %v1889_v13 = vadd.f32 %v4533_v26, %v4529_v6  ;;  %1869 = vadd.xlane.f32.xlu2 %v1868_v1  ;;  %v4543_v15 = vsel %vm5000_vm12, %v3161_v23, 0.0 }
 0x38c   : > { %v3171_v16 = vpop.eup %3170  ;;  %v4539_v36 = vsel %vm4998_vm11, %v3169_v63, 0.0  ;;  %v4547_v58 = vsel %vm5002_vm13, %v3167_v38, 0.0  ;;  %vm5004_vm15 = vnez %v5003_v11  ;;  %vm5008_vm3 = vnez %v5007_v10 }
 0x38d   : > { %3176 = vpow2.f32 %v1811_v51  ;;  %v4551_v56 = vsel %vm5004_vm15, %v3171_v16, 0.0  ;;  %v1877_v60 = vadd.f32 %v4547_v58, %v4543_v15  ;;  %vm5010_vm14 = vnez %v5009_v39 }
 0x38e   : > { %3178 = vpow2.f32 %v1813_v0  ;;  %1890 = vadd.xlane.f32.xlu0 %v1889_v13  ;;  %v1883_v53 = vadd.f32 %v4551_v56, %v4539_v36  ;;  %v3173_v18 = vpop.eup %3172 }
 0x38f   : > { %v3175_v8 = vpop.eup %3174  ;;  %v4567_v3 = vsel %vm5008_vm3, %v3173_v18, 0.0 }
 0x390   : > { %v4571_v23 = vsel %vm5010_vm14, %v3175_v8, 0.0 }
 0x391   : > { %1884 = vadd.xlane.f32.xlu1 %v1883_v53  ;;  %v1886_v20 = vadd.f32 %v4571_v23, %v4567_v3 }
 0x393   : > { %v3177_v42 = vpop.eup %3176  ;;  %1878 = vadd.xlane.f32.xlu2 %v1877_v60 }
 0x394   : > { %v3179_v31 = vpop.eup %3178  ;;  %v4559_v45 = vsel %vm4973_vm0, %v3177_v42, 0.0 }
 0x395   : > { %v4563_v57 = vsel %vm4975_vm4, %v3179_v31, 0.0 }
 0x396   : > { %v1892_v62 = vadd.f32 %v4563_v57, %v4559_v45 }
 0x399   : > { %1893 = vadd.xlane.f32.xlu1 %v1892_v62 }
 0x39b   : > { %1887 = vadd.xlane.f32.xlu2 %v1886_v20 }
 0x3e1   : > { %v1855_v9 = vpop.xlane.xlu0 %1854 }
 0x3e2   : > { %vm1897_vm4 = vcmp.gt.f32.partialorder %v1855_v9, 0.0 }
 0x3e3   : > { %v1913_v38 = vsel %vm1897_vm4, %v1855_v9, 1.0 }
 0x3e4   : > { %v1849_v4 = vpop.xlane.xlu1 %1848 }
 0x3e5   : > { %vm1895_vm0 = vcmp.gt.f32.partialorder %v1849_v4, 0.0 }
 0x3e6   : > { %v1911_v21 = vsel %vm1895_vm0, %v1849_v4, 1.0  ;;  %vm2233_vm0 = vcmask 523264  }
 0x3e7   : > { %3180 = vrcp.f32 %v1911_v21 }
 0x3e9   : > { %v1864_v18 = vpop.xlane.xlu0 %1863 }
 0x3ea   : > { %vm1900_vm2 = vcmp.gt.f32.partialorder %v1864_v18, 0.0 }
 0x3eb   : > { %v1916_v60 = vsel %vm1900_vm2, %v1864_v18, 1.0 }
 0x3ec   : > { %v1858_v51 = vpop.xlane.xlu1 %1857 }
 0x3ed   : > { %v3181_v52 = vpop.eup %3180  ;;  %vm1898_vm6 = vcmp.gt.f32.partialorder %v1858_v51, 0.0 }
 0x3ee   : > { %v1852_v49 = vpop.xlane.xlu2 %1851  ;;  %v1943_v7 = vmul.f32 %v3181_v52, %v4409_v28  ;;  %v1944_v1 = vmul.f32 %v3181_v52, %v4415_v25  ;;  %v1914_v13 = vsel %vm1898_vm6, %v1858_v51, 1.0 }
 0x3ef   : > { %vm1896_vm5 = vcmp.gt.f32.partialorder %v1852_v49, 0.0 }
 0x3f0   : > { %v1912_v12 = vsel %vm1896_vm5, %v1852_v49, 1.0  ;;  %v3004_v2 = vpack.i.bf16 %v1943_v7, %v1944_v1 }
 0x3f1   : > { %3182 = vrcp.f32 %v1912_v12  ;;  %v1873_v21 = vpop.xlane.xlu0 %1872 }
 0x3f2   : > { %3005 = vxpose.xlu2.b32.start [1/16] %v3004_v2, 128  ;;  %3184 = vrcp.f32 %v1913_v38  ;;  %vm1903_vm9 = vcmp.gt.f32.partialorder %v1873_v21, 0.0 }
 0x3f3   : > { %3186 = vrcp.f32 %v1914_v13  ;;  %v1919_v9 = vsel %vm1903_vm9, %v1873_v21, 1.0  ;;  %v1983_v21 = vld [vmem:[%s4606_s14 + $0x38] sm:$0xff] }
 0x3f4   : > { %v1867_v31 = vpop.xlane.xlu1 %1866 }
 0x3f5   : > { %vm1901_vm7 = vcmp.gt.f32.partialorder %v1867_v31, 0.0 }
 0x3f6   : > { %v1861_v5 = vpop.xlane.xlu2 %1860  ;;  %v1917_v43 = vsel %vm1901_vm7, %v1867_v31, 1.0 }
 0x3f7   : > { %v3183_v0 = vpop.eup %3182  ;;  %vm1899_vm1 = vcmp.gt.f32.partialorder %v1861_v5, 0.0 }
 0x3f8   : > { %v1945_v50 = vmul.f32 %v3183_v0, %v4455_v34  ;;  %v1946_v63 = vmul.f32 %v3183_v0, %v4461_v32  ;;  %v3185_v61 = vpop.eup %3184  ;;  %v1915_v55 = vsel %vm1899_vm1, %v1861_v5, 1.0 }
 0x3f9   : > { %v1947_v28 = vmul.f32 %v3185_v61, %v4399_v59  ;;  %v1948_v25 = vmul.f32 %v3185_v61, %v4403_v44  ;;  %v3187_v53 = vpop.eup %3186  ;;  %3188 = vrcp.f32 %v1915_v55 }
 0x3fa   : > { %v3006_v16 = vpack.i.bf16 %v1945_v50, %v1946_v63  ;;  %v1949_v34 = vmul.f32 %v3187_v53, %v4437_v35  ;;  %v1950_v32 = vmul.f32 %v3187_v53, %v4443_v41  ;;  %3190 = vrcp.f32 %v1916_v60  ;;  %v1882_v63 = vpop.xlane.xlu0 %1881  ;;  %v1989_v60 = vld [vmem:[%s4606_s14 + $0x68] sm:$0xff] }
 0x3fb   : > { %v3008_v11 = vpack.i.bf16 %v1947_v28, %v1948_v25  ;;  %3192 = vrcp.f32 %v1917_v43  ;;  %vm1906_vm12 = vcmp.gt.f32.partialorder %v1882_v63, 0.0 }
 0x3fc   : > { %3007 = vxpose.xlu2.b32.cont [2/16] %v3006_v16, 128  ;;  %v3010_v8 = vpack.i.bf16 %v1949_v34, %v1950_v32  ;;  %v1876_v7 = vpop.xlane.xlu1 %1875  ;;  %v1922_v13 = vsel %vm1906_vm12, %v1882_v63, 1.0  ;;  %v1988_v34 = vld [vmem:[%s4606_s14 + $0x60] sm:$0xff] }
 0x3fd   : > { %vm1904_vm10 = vcmp.gt.f32.partialorder %v1876_v7, 0.0  ;;  %v2110_v31 = vpack.c.bf16 %v1989_v60, %v1988_v34 }
 0x3fe   : > { %v1870_v39 = vpop.xlane.xlu2 %1869  ;;  %v1920_v1 = vsel %vm1904_vm10, %v1876_v7, 1.0 }
 0x3ff   : > { %v3189_v42 = vpop.eup %3188  ;;  %vm1902_vm8 = vcmp.gt.f32.partialorder %v1870_v39, 0.0 }
 0x400   : > { %v1951_v59 = vmul.f32 %v3189_v42, %v4427_v22  ;;  %v1952_v44 = vmul.f32 %v3189_v42, %v4449_v24  ;;  %v3191_v10 = vpop.eup %3190  ;;  %v1918_v62 = vsel %vm1902_vm8, %v1870_v39, 1.0 }
 0x401   : > { %v1953_v35 = vmul.f32 %v3191_v10, %v4423_v54  ;;  %v1954_v41 = vmul.f32 %v3191_v10, %v4433_v40  ;;  %v3193_v4 = vpop.eup %3192  ;;  %3194 = vrcp.f32 %v1918_v62 }
 0x402   : > { %v3012_v47 = vpack.i.bf16 %v1951_v59, %v1952_v44  ;;  %v1955_v22 = vmul.f32 %v3193_v4, %v4475_v37  ;;  %v1956_v24 = vmul.f32 %v3193_v4, %v4483_v14  ;;  %3196 = vrcp.f32 %v1919_v9  ;;  %v1891_v18 = vpop.xlane.xlu0 %1890  ;;  %v1986_v59 = vld [vmem:[%s4606_s14 + $0x50] sm:$0xff]  ;;  %v1987_v44 = vld [vmem:[%s4606_s14 + $0x58] sm:$0xff] }
 0x403   : > { %v3014_v20 = vpack.i.bf16 %v1953_v35, %v1954_v41  ;;  %3198 = vrcp.f32 %v1920_v1  ;;  %vm1909_vm3 = vcmp.gt.f32.partialorder %v1891_v18, 0.0  ;;  %v1985_v35 = vld [vmem:[%s4606_s14 + $0x48] sm:$0xff]  ;;  %v1982_v4 = vld [vmem:[%s4606_s14 + $0x30] sm:$0xff] }
 0x404   : > { %3009 = vxpose.xlu2.b32.cont [3/16] %v3008_v11, 128  ;;  %v3016_v52 = vpack.i.bf16 %v1955_v22, %v1956_v24  ;;  %v1885_v5 = vpop.xlane.xlu1 %1884  ;;  %v1925_v43 = vsel %vm1909_vm3, %v1891_v18, 1.0 }
 0x405   : > { %vm1907_vm13 = vcmp.gt.f32.partialorder %v1885_v5, 0.0 }
 0x406   : > { %v1879_v38 = vpop.xlane.xlu2 %1878  ;;  %v1923_v28 = vsel %vm1907_vm13, %v1885_v5, 1.0 }
 0x407   : > { %v3195_v49 = vpop.eup %3194  ;;  %vm1905_vm11 = vcmp.gt.f32.partialorder %v1879_v38, 0.0 }
 0x408   : > { %v1957_v54 = vmul.f32 %v3195_v49, %v4507_v17  ;;  %v1958_v40 = vmul.f32 %v3195_v49, %v4511_v30  ;;  %v3197_v2 = vpop.eup %3196  ;;  %v1921_v51 = vsel %vm1905_vm11, %v1879_v38, 1.0  ;;  %v1979_v38 = vld [vmem:[%s4606_s14 + $0x18] sm:$0xff] }
 0x409   : > { %v1959_v37 = vmul.f32 %v3197_v2, %v4465_v19  ;;  %v1960_v14 = vmul.f32 %v3197_v2, %v4471_v27  ;;  %v3199_v50 = vpop.eup %3198  ;;  %3200 = vrcp.f32 %v1921_v51 }
 0x40a   : > { %v3018_v12 = vpack.i.bf16 %v1957_v54, %v1958_v40  ;;  %v1961_v17 = vmul.f32 %v3199_v50, %v4515_v48  ;;  %v1962_v30 = vmul.f32 %v3199_v50, %v4519_v29  ;;  %3202 = vrcp.f32 %v1922_v13 }
 0x40b   : > { %v3020_v0 = vpack.i.bf16 %v1959_v37, %v1960_v14  ;;  %3204 = vrcp.f32 %v1923_v28  ;;  %v1976_v14 = vld [vmem:[%s4606_s14] sm:$0xff] }
 0x40c   : > { %3011 = vxpose.xlu2.b32.cont [4/16] %v3010_v8, 128  ;;  %v3022_v16 = vpack.i.bf16 %v1961_v17, %v1962_v30  ;;  %v1894_v39 = vpop.xlane.xlu1 %1893 }
 0x40d   : > { %vm1910_vm14 = vcmp.gt.f32.partialorder %v1894_v39, 0.0 }
 0x40e   : > { %v1888_v11 = vpop.xlane.xlu2 %1887  ;;  %v1926_v22 = vsel %vm1910_vm14, %v1894_v39, 1.0 }
 0x40f   : > { %v3201_v61 = vpop.eup %3200  ;;  %vm1908_vm15 = vcmp.gt.f32.partialorder %v1888_v11, 0.0 }
 0x410   : > { %v1963_v19 = vmul.f32 %v3201_v61, %v4543_v15  ;;  %v1964_v27 = vmul.f32 %v3201_v61, %v4547_v58  ;;  %v3203_v55 = vpop.eup %3202  ;;  %v1924_v15 = vsel %vm1908_vm15, %v1888_v11, 1.0 }
 0x411   : > { %v1965_v48 = vmul.f32 %v3203_v55, %v4497_v33  ;;  %v1966_v29 = vmul.f32 %v3203_v55, %v4501_v46  ;;  %v3205_v53 = vpop.eup %3204  ;;  %v1990_v33 = vld [vmem:[%s4606_s14 + $0x70] sm:$0xff]  ;;  %v1991_v46 = vld [vmem:[%s4606_s14 + $0x78] sm:$0xff]  ;;  %3206 = vrcp.f32 %v1924_v15 }
 0x412   : > { %v3024_v25 = vpack.i.bf16 %v1963_v19, %v1964_v27  ;;  %v2111_v32 = vpack.c.bf16 %v1991_v46, %v1990_v33  ;;  %v1967_v8 = vmul.f32 %v3205_v53, %v4539_v36  ;;  %v1968_v42 = vmul.f32 %v3205_v53, %v4551_v56  ;;  %v1984_v56 = vld [vmem:[%s4606_s14 + $0x40] sm:$0xff] }
 0x413   : > { %v3026_v58 = vpack.i.bf16 %v1965_v48, %v1966_v29  ;;  %v2109_v36 = vpack.c.bf16 %v1987_v44, %v1986_v59  ;;  %3208 = vrcp.f32 %v1925_v43 }
 0x414   : > { %3013 = vxpose.xlu2.b32.cont [5/16] %v3012_v47, 128  ;;  %2112 = vmatpush.bf16.msra.mxu0 %v2111_v32  ;;  %v3028_v47 = vpack.i.bf16 %v1967_v8, %v1968_v42  ;;  %3210 = vrcp.f32 %v1926_v22 }
 0x415   : > { %2914 = vmatpush.bf16.msra.mxu2 %v2111_v32  ;;  %2913 = vmatpush.bf16.msra.mxu1 %v2111_v32 }
 0x416   : > { %2915 = vmatpush.bf16.msra.mxu3 %v2111_v32 }
 0x417   : > { %v3207_v10 = vpop.eup %3206 }
 0x418   : > { %2113 = vmatpush.bf16.msra.mxu0 %v2110_v31  ;;  %v1969_v41 = vmul.f32 %v3207_v10, %v4567_v3  ;;  %v1970_v62 = vmul.f32 %v3207_v10, %v4571_v23 }
 0x419   : > { %2917 = vmatpush.bf16.msra.mxu2 %v2110_v31  ;;  %2916 = vmatpush.bf16.msra.mxu1 %v2110_v31  ;;  %v3209_v9 = vpop.eup %3208 }
 0x41a   : > { %2918 = vmatpush.bf16.msra.mxu3 %v2110_v31  ;;  %v3030_v24 = vpack.i.bf16 %v1969_v41, %v1970_v62  ;;  %v1971_v3 = vmul.f32 %v3209_v9, %v4529_v6  ;;  %v1972_v23 = vmul.f32 %v3209_v9, %v4533_v26  ;;  %v3211_v7 = vpop.eup %3210  ;;  %v1980_v6 = vld [vmem:[%s4606_s14 + $0x20] sm:$0xff]  ;;  %v1978_v26 = vld [vmem:[%s4606_s14 + $0x10] sm:$0xff] }
 0x41b   : > { %v1973_v54 = vmul.f32 %v3211_v7, %v4559_v45  ;;  %v1974_v40 = vmul.f32 %v3211_v7, %v4563_v57  ;;  %v2105_v37 = vpack.c.bf16 %v1979_v38, %v1978_v26  ;;  %v1977_v45 = vld [vmem:[%s4606_s14 + $0x8] sm:$0xff] }
 0x41c   : > { %3015 = vxpose.xlu2.b32.cont [6/16] %v3014_v20, 128  ;;  %2114 = vmatpush.bf16.msra.mxu0 %v2109_v36  ;;  %v2108_v20 = vpack.c.bf16 %v1985_v35, %v1984_v56  ;;  %v3032_v49 = vpack.i.bf16 %v1971_v3, %v1972_v23  ;;  %v2104_v57 = vpack.c.bf16 %v1977_v45, %v1976_v14 }
 0x41d   : > { %2920 = vmatpush.bf16.msra.mxu2 %v2109_v36  ;;  %2919 = vmatpush.bf16.msra.mxu1 %v2109_v36  ;;  %v3034_v1 = vpack.i.bf16 %v1973_v54, %v1974_v40 }
 0x41e   : > { %2921 = vmatpush.bf16.msra.mxu3 %v2109_v36 }
 0x420   : > { %2115 = vmatpush.bf16.msra.mxu0 %v2108_v20 }
 0x421   : > { %2923 = vmatpush.bf16.msra.mxu2 %v2108_v20  ;;  %2922 = vmatpush.bf16.msra.mxu1 %v2108_v20 }
 0x422   : > { %2924 = vmatpush.bf16.msra.mxu3 %v2108_v20 }
 0x424   : > { %3017 = vxpose.xlu2.b32.cont [7/16] %v3016_v52, 128  ;;  %v2107_v52 = vpack.c.bf16 %v1983_v21, %v1982_v4 }
 0x426   : > { %2116 = vmatpush.bf16.msra.mxu0 %v2107_v52  ;;  %2926 = vmatpush.bf16.msra.mxu2 %v2107_v52 }
 0x427   : > { %2925 = vmatpush.bf16.msra.mxu1 %v2107_v52  ;;  %2927 = vmatpush.bf16.msra.mxu3 %v2107_v52 }
 0x42c   : > { %3019 = vxpose.xlu2.b32.cont [8/16] %v3018_v12, 128  ;;  %v1981_v12 = vld [vmem:[%s4606_s14 + $0x28] sm:$0xff] }
 0x42d   : > { %v2106_v2 = vpack.c.bf16 %v1981_v12, %v1980_v6 }
 0x42f   : > { %2117 = vmatpush.bf16.msra.mxu0 %v2106_v2  ;;  %2929 = vmatpush.bf16.msra.mxu2 %v2106_v2 }
 0x430   : > { %2928 = vmatpush.bf16.msra.mxu1 %v2106_v2  ;;  %2930 = vmatpush.bf16.msra.mxu3 %v2106_v2 }
 0x433   : > { %2118 = vmatpush.bf16.msra.mxu0 %v2105_v37  ;;  %2932 = vmatpush.bf16.msra.mxu2 %v2105_v37 }
 0x434   : > { %3021 = vxpose.xlu2.b32.cont [9/16] %v3020_v0, 128  ;;  %2931 = vmatpush.bf16.msra.mxu1 %v2105_v37 }
 0x435   : > { %2933 = vmatpush.bf16.msra.mxu3 %v2105_v37 }
 0x437   : > { %2119 = vmatpush.bf16.msra.mxu0 %v2104_v57  ;;  %2935 = vmatpush.bf16.msra.mxu2 %v2104_v57 }
 0x438   : > { %2934 = vmatpush.bf16.msra.mxu1 %v2104_v57 }
 0x439   : > { %2936 = vmatpush.bf16.msra.mxu3 %v2104_v57 }
 0x43c   : > { %3023 = vxpose.xlu2.b32.cont [10/16] %v3022_v16, 128 }
 0x444   : > { %3025 = vxpose.xlu2.b32.cont [11/16] %v3024_v25, 128 }
 0x44c   : > { %3027 = vxpose.xlu2.b32.cont [12/16] %v3026_v58, 128 }
 0x454   : > { %3029 = vxpose.xlu2.b32.cont [13/16] %v3028_v47, 128 }
 0x45c   : > { %3031 = vxpose.xlu2.b32.cont [14/16] %v3030_v24, 128 }
 0x464   : > { %3033 = vxpose.xlu2.b32.cont [15/16] %v3032_v49, 128 }
 0x46c   : > { %3035 = vxpose.xlu2.b32.end [16/16] %v3034_v1, 128 }
 0x48d   : > { %v3036_v51 = vpop.trf.xlu2 }
 0x48e   : > { %v3040_v50 = vunpack.i.h.bf16 %v3036_v51  ;;  %v3037_v63 = vunpack.i.l.bf16 %v3036_v51  ;;  %v1992_v51 = vld [vmem:[#allocation5] sm:$0xff] }
 0x495   : > { %v3041_v0 = vpop.trf.xlu2 }
 0x496   : > { %v3045_v17 = vunpack.i.h.bf16 %v3041_v0  ;;  %v3042_v30 = vunpack.i.l.bf16 %v3041_v0 }
 0x498   : > { %v2088_v13 = vpack.c.bf16 %v3045_v17, %v3040_v50  ;;  %v2096_v16 = vpack.c.bf16 %v3042_v30, %v3037_v63  ;;  %v2008_v63 = vld [vmem:[#allocation5 + $0x80] sm:$0xff]  ;;  %v1993_v30 = vld [vmem:[#allocation5 + $0x8] sm:$0xff] }
 0x49a   : > { %2120 = vmatmul.bf16.vlgmr.msra.gmra.mxu0 %v2088_v13  ;;  %2160 = vmatmul.bf16.vlgmr.msra.gmra.mxu2 %v2096_v16 }
 0x49d   : > { %v3046_v61 = vpop.trf.xlu2 }
 0x49e   : > { %v3050_v19 = vunpack.i.h.bf16 %v3046_v61  ;;  %v3047_v27 = vunpack.i.l.bf16 %v3046_v61 }
 0x4a5   : > { %v3051_v5 = vpop.trf.xlu2 }
 0x4a6   : > { %v3055_v28 = vunpack.i.h.bf16 %v3051_v5  ;;  %v3052_v25 = vunpack.i.l.bf16 %v3051_v5  ;;  %v2009_v5 = vld [vmem:[#allocation5 + $0x88] sm:$0xff] }
 0x4a8   : > { %v2089_v55 = vpack.c.bf16 %v3055_v28, %v3050_v19  ;;  %v2097_v11 = vpack.c.bf16 %v3052_v25, %v3047_v27  ;;  %v1994_v27 = vld [vmem:[#allocation5 + $0x10] sm:$0xff] }
 0x4aa   : > { %2125 = vmatmul.bf16.gmra.mxu0 %v2089_v55  ;;  %2165 = vmatmul.bf16.gmra.mxu2 %v2097_v11  ;;  %v2010_v11 = vld [vmem:[#allocation5 + $0x90] sm:$0xff] }
 0x4ad   : > { %v3056_v48 = vpop.trf.xlu2 }
 0x4ae   : > { %v3060_v15 = vunpack.i.h.bf16 %v3056_v48  ;;  %v3057_v58 = vunpack.i.l.bf16 %v3056_v48 }
 0x4b5   : > { %v3061_v29 = vpop.trf.xlu2 }
 0x4b6   : > { %v3065_v53 = vunpack.i.h.bf16 %v3061_v29  ;;  %v3062_v18 = vunpack.i.l.bf16 %v3061_v29  ;;  %v1995_v29 = vld [vmem:[#allocation5 + $0x18] sm:$0xff] }
 0x4b8   : > { %v2090_v33 = vpack.c.bf16 %v3065_v53, %v3060_v15  ;;  %v2098_v46 = vpack.c.bf16 %v3062_v18, %v3057_v58  ;;  %v2011_v18 = vld [vmem:[#allocation5 + $0x98] sm:$0xff] }
 0x4ba   : > { %2130 = vmatmul.bf16.gmra.mxu0 %v2090_v33  ;;  %2170 = vmatmul.bf16.gmra.mxu2 %v2098_v46  ;;  %v1996_v46 = vld [vmem:[#allocation5 + $0x20] sm:$0xff] }
 0x4bd   : > { %v3066_v34 = vpop.trf.xlu2 }
 0x4be   : > { %v3070_v60 = vunpack.i.h.bf16 %v3066_v34  ;;  %v3067_v8 = vunpack.i.l.bf16 %v3066_v34 }
 0x4c5   : > { %v3071_v32 = vpop.trf.xlu2 }
 0x4c6   : > { %v3075_v42 = vunpack.i.h.bf16 %v3071_v32  ;;  %v3072_v31 = vunpack.i.l.bf16 %v3071_v32 }
 0x4c8   : > { %v2091_v59 = vpack.c.bf16 %v3075_v42, %v3070_v60  ;;  %v2099_v44 = vpack.c.bf16 %v3072_v31, %v3067_v8  ;;  %v2012_v8 = vld [vmem:[#allocation5 + $0xa0] sm:$0xff]  ;;  %v1997_v31 = vld [vmem:[#allocation5 + $0x28] sm:$0xff] }
 0x4ca   : > { %2135 = vmatmul.bf16.gmra.mxu0 %v2091_v59  ;;  %2175 = vmatmul.bf16.gmra.mxu2 %v2099_v44 }
 0x4cd   : > { %v3076_v43 = vpop.trf.xlu2 }
 0x4ce   : > { %v3080_v10 = vunpack.i.h.bf16 %v3076_v43  ;;  %v3077_v36 = vunpack.i.l.bf16 %v3076_v43 }
 0x4d5   : > { %v3081_v47 = vpop.trf.xlu2 }
 0x4d6   : > { %v3085_v39 = vunpack.i.h.bf16 %v3081_v47  ;;  %v3082_v56 = vunpack.i.l.bf16 %v3081_v47  ;;  %v2013_v47 = vld [vmem:[#allocation5 + $0xa8] sm:$0xff] }
 0x4d8   : > { %v2092_v35 = vpack.c.bf16 %v3085_v39, %v3080_v10  ;;  %v2100_v41 = vpack.c.bf16 %v3082_v56, %v3077_v36  ;;  %v1998_v36 = vld [vmem:[#allocation5 + $0x30] sm:$0xff] }
 0x4da   : > { %2140 = vmatmul.bf16.vlgmr.msra.gmra.mxu1 %v2092_v35  ;;  %2180 = vmatmul.bf16.vlgmr.msra.gmra.mxu3 %v2100_v41  ;;  %v2014_v41 = vld [vmem:[#allocation5 + $0xb0] sm:$0xff] }
 0x4dd   : > { %v3086_v62 = vpop.trf.xlu2 }
 0x4de   : > { %v3090_v4 = vunpack.i.h.bf16 %v3086_v62  ;;  %v3087_v21 = vunpack.i.l.bf16 %v3086_v62 }
 0x4e5   : > { %v3091_v20 = vpop.trf.xlu2 }
 0x4e6   : > { %v3095_v22 = vunpack.i.h.bf16 %v3091_v20  ;;  %v3092_v24 = vunpack.i.l.bf16 %v3091_v20  ;;  %v1999_v20 = vld [vmem:[#allocation5 + $0x38] sm:$0xff] }
 0x4e8   : > { %v2093_v9 = vpack.c.bf16 %v3095_v22, %v3090_v4  ;;  %v2101_v52 = vpack.c.bf16 %v3092_v24, %v3087_v21  ;;  %v2015_v24 = vld [vmem:[#allocation5 + $0xb8] sm:$0xff] }
 0x4ea   : > { %2145 = vmatmul.bf16.gmra.mxu1 %v2093_v9  ;;  %2185 = vmatmul.bf16.gmra.mxu3 %v2101_v52  ;;  %v2000_v52 = vld [vmem:[#allocation5 + $0x40] sm:$0xff] }
 0x4ed   : > { %v3096_v3 = vpop.trf.xlu2 }
 0x4ee   : > { %v3100_v49 = vunpack.i.h.bf16 %v3096_v3  ;;  %v3097_v7 = vunpack.i.l.bf16 %v3096_v3 }
 0x4f5   : > { %v3101_v23 = vpop.trf.xlu2 }
 0x4f6   : > { %v3105_v54 = vunpack.i.h.bf16 %v3101_v23  ;;  %v3102_v40 = vunpack.i.l.bf16 %v3101_v23 }
 0x4f8   : > { %v2094_v1 = vpack.c.bf16 %v3105_v54, %v3100_v49  ;;  %v2102_v6 = vpack.c.bf16 %v3102_v40, %v3097_v7  ;;  %v2016_v7 = vld [vmem:[#allocation5 + $0xc0] sm:$0xff]  ;;  %v2001_v40 = vld [vmem:[#allocation5 + $0x48] sm:$0xff] }
 0x4fa   : > { %2150 = vmatmul.bf16.gmra.mxu1 %v2094_v1  ;;  %2190 = vmatmul.bf16.gmra.mxu3 %v2102_v6 }
 0x4fd   : > { %v3106_v12 = vpop.trf.xlu2 }
 0x4fe   : > { %v3110_v26 = vunpack.i.h.bf16 %v3106_v12  ;;  %v3107_v38 = vunpack.i.l.bf16 %v3106_v12 }
 0x505   : > { %v3111_v2 = vpop.trf.xlu2 }
 0x506   : > { %v3115_v37 = vunpack.i.h.bf16 %v3111_v2  ;;  %v3112_v14 = vunpack.i.l.bf16 %v3111_v2  ;;  %v2017_v2 = vld [vmem:[#allocation5 + $0xc8] sm:$0xff] }
 0x508   : > { %v2095_v45 = vpack.c.bf16 %v3115_v37, %v3110_v26  ;;  %v2103_v57 = vpack.c.bf16 %v3112_v14, %v3107_v38  ;;  %v2002_v38 = vld [vmem:[#allocation5 + $0x50] sm:$0xff] }
 0x50a   : > { %2155 = vmatmul.bf16.gmra.mxu1 %v2095_v45  ;;  %2195 = vmatmul.bf16.gmra.mxu3 %v2103_v57  ;;  %v2018_v57 = vld [vmem:[#allocation5 + $0xd0] sm:$0xff] }
 0x517   : > { %v2121_v0 = vpop.f32.mrf.mxu0 }
 0x518   : > { %v2201_v50 = vadd.f32 %v2121_v0, %v1992_v51  ;;  %v2003_v0 = vld [vmem:[#allocation5 + $0x58] sm:$0xff] }
 0x51a   : > { %2234 = vst.msk [vmem:[#allocation5] sm:$0xff] %vm2233_vm0, %v2201_v50 }
 0x51d   : > { %v2161_v17 = vpop.f32.mrf.mxu2 }
 0x51e   : > { %v2217_v13 = vadd.f32 %v2161_v17, %v2008_v63 }
 0x51f   : > { %v2123_v16 = vpop.f32.mrf.mxu0 }
 0x520   : > { %2250 = vst.msk [vmem:[#allocation5 + $0x80] sm:$0xff] %vm2233_vm0, %v2217_v13  ;;  %v2202_v61 = vadd.f32 %v2123_v16, %v1993_v30  ;;  %v2019_v30 = vld [vmem:[#allocation5 + $0xd8] sm:$0xff]  ;;  %v2004_v16 = vld [vmem:[#allocation5 + $0x60] sm:$0xff] }
 0x522   : > { %2235 = vst.msk [vmem:[#allocation5 + $0x8] sm:$0xff] %vm2233_vm0, %v2202_v61 }
 0x525   : > { %v2163_v19 = vpop.f32.mrf.mxu2 }
 0x526   : > { %v2218_v28 = vadd.f32 %v2163_v19, %v2009_v5 }
 0x527   : > { %v2126_v25 = vpop.f32.mrf.mxu0 }
 0x528   : > { %2251 = vst.msk [vmem:[#allocation5 + $0x88] sm:$0xff] %vm2233_vm0, %v2218_v28  ;;  %v2203_v55 = vadd.f32 %v2126_v25, %v1994_v27  ;;  %v2020_v27 = vld [vmem:[#allocation5 + $0xe0] sm:$0xff]  ;;  %v2005_v25 = vld [vmem:[#allocation5 + $0x68] sm:$0xff] }
 0x52a   : > { %2236 = vst.msk [vmem:[#allocation5 + $0x10] sm:$0xff] %vm2233_vm0, %v2203_v55 }
 0x52d   : > { %v2166_v48 = vpop.f32.mrf.mxu2 }
 0x52e   : > { %v2219_v15 = vadd.f32 %v2166_v48, %v2010_v11 }
 0x52f   : > { %v2128_v58 = vpop.f32.mrf.mxu0 }
 0x530   : > { %2252 = vst.msk [vmem:[#allocation5 + $0x90] sm:$0xff] %vm2233_vm0, %v2219_v15  ;;  %v2204_v53 = vadd.f32 %v2128_v58, %v1995_v29  ;;  %v2021_v29 = vld [vmem:[#allocation5 + $0xe8] sm:$0xff]  ;;  %v2006_v58 = vld [vmem:[#allocation5 + $0x70] sm:$0xff] }
 0x532   : > { %2237 = vst.msk [vmem:[#allocation5 + $0x18] sm:$0xff] %vm2233_vm0, %v2204_v53 }
 0x535   : > { %v2168_v33 = vpop.f32.mrf.mxu2 }
 0x536   : > { %v2220_v34 = vadd.f32 %v2168_v33, %v2011_v18 }
 0x537   : > { %v2131_v32 = vpop.f32.mrf.mxu0 }
 0x538   : > { %2253 = vst.msk [vmem:[#allocation5 + $0x98] sm:$0xff] %vm2233_vm0, %v2220_v34  ;;  %v2205_v60 = vadd.f32 %v2131_v32, %v1996_v46  ;;  %v2022_v46 = vld [vmem:[#allocation5 + $0xf0] sm:$0xff]  ;;  %v2007_v32 = vld [vmem:[#allocation5 + $0x78] sm:$0xff] }
 0x53a   : > { %2238 = vst.msk [vmem:[#allocation5 + $0x20] sm:$0xff] %vm2233_vm0, %v2205_v60 }
 0x53d   : > { %v2171_v42 = vpop.f32.mrf.mxu2 }
 0x53e   : > { %v2221_v59 = vadd.f32 %v2171_v42, %v2012_v8 }
 0x53f   : > { %v2133_v44 = vpop.f32.mrf.mxu0 }
 0x540   : > { %2254 = vst.msk [vmem:[#allocation5 + $0xa0] sm:$0xff] %vm2233_vm0, %v2221_v59  ;;  %v2206_v43 = vadd.f32 %v2133_v44, %v1997_v31  ;;  %v2023_v31 = vld [vmem:[#allocation5 + $0xf8] sm:$0xff] }
 0x542   : > { %2239 = vst.msk [vmem:[#allocation5 + $0x28] sm:$0xff] %vm2233_vm0, %v2206_v43 }
 0x545   : > { %v2173_v10 = vpop.f32.mrf.mxu2 }
 0x546   : > { %v2222_v39 = vadd.f32 %v2173_v10, %v2013_v47 }
 0x547   : > { %v2136_v56 = vpop.f32.mrf.mxu0 }
 0x548   : > { %2255 = vst.msk [vmem:[#allocation5 + $0xa8] sm:$0xff] %vm2233_vm0, %v2222_v39  ;;  %v2207_v35 = vadd.f32 %v2136_v56, %v1998_v36 }
 0x54a   : > { %2240 = vst.msk [vmem:[#allocation5 + $0x30] sm:$0xff] %vm2233_vm0, %v2207_v35 }
 0x54d   : > { %v2176_v62 = vpop.f32.mrf.mxu2 }
 0x54e   : > { %v2223_v4 = vadd.f32 %v2176_v62, %v2014_v41 }
 0x54f   : > { %v2138_v21 = vpop.f32.mrf.mxu0 }
 0x550   : > { %2256 = vst.msk [vmem:[#allocation5 + $0xb0] sm:$0xff] %vm2233_vm0, %v2223_v4  ;;  %v2208_v22 = vadd.f32 %v2138_v21, %v1999_v20 }
 0x552   : > { %2241 = vst.msk [vmem:[#allocation5 + $0x38] sm:$0xff] %vm2233_vm0, %v2208_v22 }
 0x555   : > { %v2178_v9 = vpop.f32.mrf.mxu2 }
 0x556   : > { %v2224_v3 = vadd.f32 %v2178_v9, %v2015_v24 }
 0x557   : > { %v2141_v23 = vpop.f32.mrf.mxu1 }
 0x558   : > { %2257 = vst.msk [vmem:[#allocation5 + $0xb8] sm:$0xff] %vm2233_vm0, %v2224_v3  ;;  %v2209_v49 = vadd.f32 %v2141_v23, %v2000_v52 }
 0x55a   : > { %2242 = vst.msk [vmem:[#allocation5 + $0x40] sm:$0xff] %vm2233_vm0, %v2209_v49 }
 0x55d   : > { %v2181_v54 = vpop.f32.mrf.mxu3 }
 0x55e   : > { %v2225_v1 = vadd.f32 %v2181_v54, %v2016_v7 }
 0x55f   : > { %v2143_v6 = vpop.f32.mrf.mxu1 }
 0x560   : > { %2258 = vst.msk [vmem:[#allocation5 + $0xc0] sm:$0xff] %vm2233_vm0, %v2225_v1  ;;  %v2210_v12 = vadd.f32 %v2143_v6, %v2001_v40 }
 0x562   : > { %2243 = vst.msk [vmem:[#allocation5 + $0x48] sm:$0xff] %vm2233_vm0, %v2210_v12 }
 0x565   : > { %v2183_v26 = vpop.f32.mrf.mxu3 }
 0x566   : > { %v2226_v37 = vadd.f32 %v2183_v26, %v2017_v2 }
 0x567   : > { %v2146_v14 = vpop.f32.mrf.mxu1 }
 0x568   : > { %2259 = vst.msk [vmem:[#allocation5 + $0xc8] sm:$0xff] %vm2233_vm0, %v2226_v37  ;;  %v2211_v45 = vadd.f32 %v2146_v14, %v2002_v38 }
 0x56a   : > { %2244 = vst.msk [vmem:[#allocation5 + $0x50] sm:$0xff] %vm2233_vm0, %v2211_v45 }
 0x56d   : > { %v2186_v51 = vpop.f32.mrf.mxu3 }
 0x56e   : > { %v2227_v50 = vadd.f32 %v2186_v51, %v2018_v57 }
 0x56f   : > { %v2148_v63 = vpop.f32.mrf.mxu1 }
 0x570   : > { %2260 = vst.msk [vmem:[#allocation5 + $0xd0] sm:$0xff] %vm2233_vm0, %v2227_v50  ;;  %v2212_v17 = vadd.f32 %v2148_v63, %v2003_v0 }
 0x572   : > { %2245 = vst.msk [vmem:[#allocation5 + $0x58] sm:$0xff] %vm2233_vm0, %v2212_v17 }
 0x575   : > { %v2188_v13 = vpop.f32.mrf.mxu3 }
 0x576   : > { %v2228_v61 = vadd.f32 %v2188_v13, %v2019_v30 }
 0x577   : > { %v2151_v5 = vpop.f32.mrf.mxu1 }
 0x578   : > { %2261 = vst.msk [vmem:[#allocation5 + $0xd8] sm:$0xff] %vm2233_vm0, %v2228_v61  ;;  %v2213_v19 = vadd.f32 %v2151_v5, %v2004_v16 }
 0x57a   : > { %2246 = vst.msk [vmem:[#allocation5 + $0x60] sm:$0xff] %vm2233_vm0, %v2213_v19 }
 0x57d   : > { %v2191_v28 = vpop.f32.mrf.mxu3 }
 0x57e   : > { %v2229_v55 = vadd.f32 %v2191_v28, %v2020_v27 }
 0x57f   : > { %v2153_v11 = vpop.f32.mrf.mxu1 }
 0x580   : > { %2262 = vst.msk [vmem:[#allocation5 + $0xe0] sm:$0xff] %vm2233_vm0, %v2229_v55  ;;  %v2214_v48 = vadd.f32 %v2153_v11, %v2005_v25 }
 0x582   : > { %2247 = vst.msk [vmem:[#allocation5 + $0x68] sm:$0xff] %vm2233_vm0, %v2214_v48 }
 0x585   : > { %v2193_v15 = vpop.f32.mrf.mxu3 }
 0x586   : > { %v2230_v53 = vadd.f32 %v2193_v15, %v2021_v29 }
 0x587   : > { %v2156_v18 = vpop.f32.mrf.mxu1 }
 0x588   : > { %2263 = vst.msk [vmem:[#allocation5 + $0xe8] sm:$0xff] %vm2233_vm0, %v2230_v53  ;;  %v2215_v33 = vadd.f32 %v2156_v18, %v2006_v58 }
 0x58a   : > { %2248 = vst.msk [vmem:[#allocation5 + $0x70] sm:$0xff] %vm2233_vm0, %v2215_v33 }
 0x58d   : > { %v2196_v34 = vpop.f32.mrf.mxu3 }
 0x58e   : > { %v2231_v60 = vadd.f32 %v2196_v34, %v2022_v46 }
 0x58f   : > { %v2158_v8 = vpop.f32.mrf.mxu1 }
 0x590   : > { %2264 = vst.msk [vmem:[#allocation5 + $0xf0] sm:$0xff] %vm2233_vm0, %v2231_v60  ;;  %v2216_v42 = vadd.f32 %v2158_v8, %v2007_v32 }
 0x592   : > { %2249 = vst.msk [vmem:[#allocation5 + $0x78] sm:$0xff] %vm2233_vm0, %v2216_v42 }
 0x594   : > { %2269 = sbr.rel (%p2802_p9) target bundleno = 1643 (0x66b), region = 67 }
 0x595   : > { %v2198_v59 = vpop.f32.mrf.mxu3 }
 0x596   : > { %v2232_v44 = vadd.f32 %v2198_v59, %v2023_v31 }
 0x598   : > { %2265 = vst.msk [vmem:[#allocation5 + $0xf8] sm:$0xff] %vm2233_vm0, %v2232_v44 }
 0x599   : > { %v2309_v43 = vld [vmem:[%s4770_s5 + $0x38] sm:$0xff]  ;;  %v2308_v47 = vld [vmem:[%s4770_s5 + $0x30] sm:$0xff]  ;;  %v2307_v10 = vld [vmem:[%s4770_s5 + $0x28] sm:$0xff] }
 0x59a   : > { %2938 = vmatpush.msra.mxu2 %v2309_v43  ;;  %2939 = vmatpush.msra.mxu3 %v2309_v43  ;;  %v2306_v36 = vld [vmem:[%s4770_s5 + $0x20] sm:$0xff]  ;;  %v2305_v39 = vld [vmem:[%s4770_s5 + $0x18] sm:$0xff]  ;;  %v2304_v56 = vld [vmem:[%s4770_s5 + $0x10] sm:$0xff] }
 0x59b   : > { %2418 = vmatpush.msra.mxu0 %v2309_v43  ;;  %2937 = vmatpush.msra.mxu1 %v2309_v43  ;;  %v2303_v35 = vld [vmem:[%s4770_s5 + $0x8] sm:$0xff]  ;;  %v2302_v41 = vld [vmem:[%s4770_s5] sm:$0xff]  ;;  %v2288_v3 = vld [vmem:[#allocation5 + $0x90] sm:$0xff] }
 0x59c   : > { %2941 = vmatpush.msra.mxu2 %v2308_v47  ;;  %2942 = vmatpush.msra.mxu3 %v2308_v47  ;;  %v2286_v62 = vld [vmem:[#allocation5 + $0x80] sm:$0xff]  ;;  %v2287_v22 = vld [vmem:[#allocation5 + $0x88] sm:$0xff]  ;;  %v2296_v23 = vld [vmem:[#allocation5 + $0xd0] sm:$0xff] }
 0x59d   : > { %2419 = vmatpush.msra.mxu0 %v2308_v47  ;;  %2940 = vmatpush.msra.mxu1 %v2308_v47  ;;  %v2294_v20 = vld [vmem:[#allocation5 + $0xc0] sm:$0xff]  ;;  %v2295_v24 = vld [vmem:[#allocation5 + $0xc8] sm:$0xff]  ;;  %v2272_v49 = vld [vmem:[#allocation5 + $0x10] sm:$0xff] }
 0x59e   : > { %2944 = vmatpush.msra.mxu2 %v2307_v10  ;;  %2945 = vmatpush.msra.mxu3 %v2307_v10  ;;  %v2270_v4 = vld [vmem:[#allocation5] sm:$0xff]  ;;  %v2271_v9 = vld [vmem:[#allocation5 + $0x8] sm:$0xff]  ;;  %v2280_v7 = vld [vmem:[#allocation5 + $0x50] sm:$0xff] }
 0x59f   : > { %2420 = vmatpush.msra.mxu0 %v2307_v10  ;;  %2943 = vmatpush.msra.mxu1 %v2307_v10  ;;  %v2278_v21 = vld [vmem:[#allocation5 + $0x40] sm:$0xff]  ;;  %v2279_v52 = vld [vmem:[#allocation5 + $0x48] sm:$0xff]  ;;  %v2289_v54 = vld [vmem:[#allocation5 + $0x98] sm:$0xff] }
 0x5a0   : > { %2947 = vmatpush.msra.mxu2 %v2306_v36  ;;  %2948 = vmatpush.msra.mxu3 %v2306_v36  ;;  %v2297_v40 = vld [vmem:[#allocation5 + $0xd8] sm:$0xff]  ;;  %v2290_v12 = vld [vmem:[#allocation5 + $0xa0] sm:$0xff]  ;;  %v2291_v37 = vld [vmem:[#allocation5 + $0xa8] sm:$0xff] }
 0x5a1   : > { %2421 = vmatpush.msra.mxu0 %v2306_v36  ;;  %2946 = vmatpush.msra.mxu1 %v2306_v36  ;;  %v2273_v1 = vld [vmem:[#allocation5 + $0x18] sm:$0xff]  ;;  %v2298_v2 = vld [vmem:[#allocation5 + $0xe0] sm:$0xff]  ;;  %v2299_v14 = vld [vmem:[#allocation5 + $0xe8] sm:$0xff] }
 0x5a2   : > { %2950 = vmatpush.msra.mxu2 %v2305_v39  ;;  %2951 = vmatpush.msra.mxu3 %v2305_v39  ;;  %v2281_v6 = vld [vmem:[#allocation5 + $0x58] sm:$0xff]  ;;  %v2274_v26 = vld [vmem:[#allocation5 + $0x20] sm:$0xff]  ;;  %v2275_v45 = vld [vmem:[#allocation5 + $0x28] sm:$0xff] }
 0x5a3   : > { %2422 = vmatpush.msra.mxu0 %v2305_v39  ;;  %2949 = vmatpush.msra.mxu1 %v2305_v39  ;;  %v2282_v38 = vld [vmem:[#allocation5 + $0x60] sm:$0xff]  ;;  %v2283_v57 = vld [vmem:[#allocation5 + $0x68] sm:$0xff]  ;;  %v2292_v51 = vld [vmem:[#allocation5 + $0xb0] sm:$0xff] }
 0x5a4   : > { %2953 = vmatpush.msra.mxu2 %v2304_v56  ;;  %2954 = vmatpush.msra.mxu3 %v2304_v56  ;;  %v2300_v0 = vld [vmem:[#allocation5 + $0xf0] sm:$0xff]  ;;  %v2293_v17 = vld [vmem:[#allocation5 + $0xb8] sm:$0xff]  ;;  %v4724_v61 = vld [vmem:[%s4771_s6] ss:$0 sm:$0xff] }
 0x5a5   : > { %2423 = vmatpush.msra.mxu0 %v2304_v56  ;;  %2952 = vmatpush.msra.mxu1 %v2304_v56  ;;  %v2276_v50 = vld [vmem:[#allocation5 + $0x30] sm:$0xff]  ;;  %v2301_v30 = vld [vmem:[#allocation5 + $0xf8] sm:$0xff] }
 0x5a6   : > { %2956 = vmatpush.msra.mxu2 %v2303_v35  ;;  %2957 = vmatpush.msra.mxu3 %v2303_v35  ;;  %v2284_v63 = vld [vmem:[#allocation5 + $0x70] sm:$0xff]  ;;  %v2277_v13 = vld [vmem:[#allocation5 + $0x38] sm:$0xff] }
 0x5a7   : > { %2424 = vmatpush.msra.mxu0 %v2303_v35  ;;  %2955 = vmatpush.msra.mxu1 %v2303_v35  ;;  %v2285_v16 = vld [vmem:[#allocation5 + $0x78] sm:$0xff] }
 0x5a8   : > { %2959 = vmatpush.msra.mxu2 %v2302_v41  ;;  %2960 = vmatpush.msra.mxu3 %v2302_v41 }
 0x5a9   : > { %2819 = vmatmul.msk.f32.vlgmr.msra.gmra.mxu2 %vm2233_vm0, %v2286_v62  ;;  %2827 = vmatmul.msk.f32.vlgmr.msra.gmra.mxu3 %vm2233_vm0, %v2294_v20 }
 0x5aa   : > { %2425 = vmatpush.msra.mxu0 %v2302_v41  ;;  %2958 = vmatpush.msra.mxu1 %v2302_v41 }
 0x5ab   : > { %2803 = vmatmul.msk.f32.vlgmr.msra.gmra.mxu0 %vm2233_vm0, %v2270_v4  ;;  %2811 = vmatmul.msk.f32.vlgmr.msra.gmra.mxu1 %vm2233_vm0, %v2278_v21 }
 0x5b1   : > { %2820 = vmatmul.msk.f32.gmra.mxu2 %vm2233_vm0, %v2287_v22  ;;  %2828 = vmatmul.msk.f32.gmra.mxu3 %vm2233_vm0, %v2295_v24 }
 0x5b3   : > { %2804 = vmatmul.msk.f32.gmra.mxu0 %vm2233_vm0, %v2271_v9  ;;  %2812 = vmatmul.msk.f32.gmra.mxu1 %vm2233_vm0, %v2279_v52 }
 0x5b9   : > { %2821 = vmatmul.msk.f32.gmra.mxu2 %vm2233_vm0, %v2288_v3  ;;  %2829 = vmatmul.msk.f32.gmra.mxu3 %vm2233_vm0, %v2296_v23 }
 0x5bb   : > { %2805 = vmatmul.msk.f32.gmra.mxu0 %vm2233_vm0, %v2272_v49  ;;  %2813 = vmatmul.msk.f32.gmra.mxu1 %vm2233_vm0, %v2280_v7 }
 0x5c1   : > { %2822 = vmatmul.msk.f32.gmra.mxu2 %vm2233_vm0, %v2289_v54  ;;  %2830 = vmatmul.msk.f32.gmra.mxu3 %vm2233_vm0, %v2297_v40 }
 0x5c3   : > { %2806 = vmatmul.msk.f32.gmra.mxu0 %vm2233_vm0, %v2273_v1  ;;  %2814 = vmatmul.msk.f32.gmra.mxu1 %vm2233_vm0, %v2281_v6 }
 0x5c9   : > { %2823 = vmatmul.msk.f32.gmra.mxu2 %vm2233_vm0, %v2290_v12  ;;  %2831 = vmatmul.msk.f32.gmra.mxu3 %vm2233_vm0, %v2298_v2 }
 0x5cb   : > { %2807 = vmatmul.msk.f32.gmra.mxu0 %vm2233_vm0, %v2274_v26  ;;  %2815 = vmatmul.msk.f32.gmra.mxu1 %vm2233_vm0, %v2282_v38 }
 0x5d1   : > { %2824 = vmatmul.msk.f32.gmra.mxu2 %vm2233_vm0, %v2291_v37  ;;  %2832 = vmatmul.msk.f32.gmra.mxu3 %vm2233_vm0, %v2299_v14 }
 0x5d3   : > { %2808 = vmatmul.msk.f32.gmra.mxu0 %vm2233_vm0, %v2275_v45  ;;  %2816 = vmatmul.msk.f32.gmra.mxu1 %vm2233_vm0, %v2283_v57 }
 0x5d9   : > { %2825 = vmatmul.msk.f32.gmra.mxu2 %vm2233_vm0, %v2292_v51  ;;  %2833 = vmatmul.msk.f32.gmra.mxu3 %vm2233_vm0, %v2300_v0 }
 0x5db   : > { %2809 = vmatmul.msk.f32.gmra.mxu0 %vm2233_vm0, %v2276_v50  ;;  %2817 = vmatmul.msk.f32.gmra.mxu1 %vm2233_vm0, %v2284_v63 }
 0x5e1   : > { %2826 = vmatmul.msk.f32.gmra.mxu2 %vm2233_vm0, %v2293_v17  ;;  %2834 = vmatmul.msk.f32.gmra.mxu3 %vm2233_vm0, %v2301_v30 }
 0x5e3   : > { %2810 = vmatmul.msk.f32.gmra.mxu0 %vm2233_vm0, %v2277_v13  ;;  %2818 = vmatmul.msk.f32.gmra.mxu1 %vm2233_vm0, %v2285_v16 }
 0x628   : > { %v2427_v5 = vpop.f32.mrf.mxu0  ;;  %v2451_v19 = vpop.f32.mrf.mxu1 }
 0x629   : > { %v2428_v27 = vadd.f32 %v4724_v61, %v2427_v5  ;;  %v2452_v28 = vadd.f32 %v4724_v61, %v2451_v19 }
 0x62b   : > { %v2523_v25 = vmax.f32 %v2428_v27, 0.0  ;;  %v2531_v55 = vmax.f32 %v2452_v28, 0.0 }
 0x62c   : > { %v2475_v11 = vpop.f32.mrf.mxu2  ;;  %v2499_v48 = vpop.f32.mrf.mxu3 }
 0x62d   : > { %2555 = vst [vmem:[#allocation9] sm:$0xff] %v2523_v25  ;;  %v2476_v29 = vadd.f32 %v4724_v61, %v2475_v11  ;;  %v2500_v15 = vadd.f32 %v4724_v61, %v2499_v48 }
 0x62e   : > { %2563 = vst [vmem:[#allocation9 + $0x40] sm:$0xff] %v2531_v55 }
 0x62f   : > { %v2539_v58 = vmax.f32 %v2476_v29, 0.0  ;;  %v2547_v53 = vmax.f32 %v2500_v15, 0.0 }
 0x630   : > { %v2430_v18 = vpop.f32.mrf.mxu0  ;;  %v2454_v33 = vpop.f32.mrf.mxu1 }
 0x631   : > { %2571 = vst [vmem:[#allocation9 + $0x80] sm:$0xff] %v2539_v58  ;;  %v2431_v46 = vadd.f32 %v4724_v61, %v2430_v18  ;;  %v2455_v34 = vadd.f32 %v4724_v61, %v2454_v33 }
 0x632   : > { %2579 = vst [vmem:[#allocation9 + $0xc0] sm:$0xff] %v2547_v53 }
 0x633   : > { %v2524_v32 = vmax.f32 %v2431_v46, 0.0  ;;  %v2532_v60 = vmax.f32 %v2455_v34, 0.0 }
 0x634   : > { %v2478_v8 = vpop.f32.mrf.mxu2  ;;  %v2502_v42 = vpop.f32.mrf.mxu3 }
 0x635   : > { %2556 = vst [vmem:[#allocation9 + $0x8] sm:$0xff] %v2524_v32  ;;  %v2479_v31 = vadd.f32 %v4724_v61, %v2478_v8  ;;  %v2503_v59 = vadd.f32 %v4724_v61, %v2502_v42 }
 0x636   : > { %2564 = vst [vmem:[#allocation9 + $0x48] sm:$0xff] %v2532_v60 }
 0x637   : > { %v2540_v44 = vmax.f32 %v2479_v31, 0.0  ;;  %v2548_v43 = vmax.f32 %v2503_v59, 0.0 }
 0x638   : > { %v2433_v47 = vpop.f32.mrf.mxu0  ;;  %v2457_v10 = vpop.f32.mrf.mxu1 }
 0x639   : > { %2572 = vst [vmem:[#allocation9 + $0x88] sm:$0xff] %v2540_v44  ;;  %v2434_v36 = vadd.f32 %v4724_v61, %v2433_v47  ;;  %v2458_v39 = vadd.f32 %v4724_v61, %v2457_v10 }
 0x63a   : > { %2580 = vst [vmem:[#allocation9 + $0xc8] sm:$0xff] %v2548_v43 }
 0x63b   : > { %v2525_v56 = vmax.f32 %v2434_v36, 0.0  ;;  %v2533_v35 = vmax.f32 %v2458_v39, 0.0 }
 0x63c   : > { %v2481_v41 = vpop.f32.mrf.mxu2  ;;  %v2505_v62 = vpop.f32.mrf.mxu3 }
 0x63d   : > { %2557 = vst [vmem:[#allocation9 + $0x10] sm:$0xff] %v2525_v56  ;;  %v2482_v20 = vadd.f32 %v4724_v61, %v2481_v41  ;;  %v2506_v4 = vadd.f32 %v4724_v61, %v2505_v62 }
 0x63e   : > { %2565 = vst [vmem:[#allocation9 + $0x50] sm:$0xff] %v2533_v35 }
 0x63f   : > { %v2541_v21 = vmax.f32 %v2482_v20, 0.0  ;;  %v2549_v22 = vmax.f32 %v2506_v4, 0.0 }
 0x640   : > { %v2436_v24 = vpop.f32.mrf.mxu0  ;;  %v2460_v9 = vpop.f32.mrf.mxu1 }
 0x641   : > { %2573 = vst [vmem:[#allocation9 + $0x90] sm:$0xff] %v2541_v21  ;;  %v2437_v52 = vadd.f32 %v4724_v61, %v2436_v24  ;;  %v2461_v3 = vadd.f32 %v4724_v61, %v2460_v9 }
 0x642   : > { %2581 = vst [vmem:[#allocation9 + $0xd0] sm:$0xff] %v2549_v22 }
 0x643   : > { %v2526_v23 = vmax.f32 %v2437_v52, 0.0  ;;  %v2534_v49 = vmax.f32 %v2461_v3, 0.0 }
 0x644   : > { %v2484_v7 = vpop.f32.mrf.mxu2  ;;  %v2508_v54 = vpop.f32.mrf.mxu3 }
 0x645   : > { %2558 = vst [vmem:[#allocation9 + $0x18] sm:$0xff] %v2526_v23  ;;  %v2485_v40 = vadd.f32 %v4724_v61, %v2484_v7  ;;  %v2509_v1 = vadd.f32 %v4724_v61, %v2508_v54 }
 0x646   : > { %2566 = vst [vmem:[#allocation9 + $0x58] sm:$0xff] %v2534_v49 }
 0x647   : > { %v2542_v6 = vmax.f32 %v2485_v40, 0.0  ;;  %v2550_v12 = vmax.f32 %v2509_v1, 0.0 }
 0x648   : > { %v2439_v2 = vpop.f32.mrf.mxu0  ;;  %v2463_v26 = vpop.f32.mrf.mxu1 }
 0x649   : > { %2574 = vst [vmem:[#allocation9 + $0x98] sm:$0xff] %v2542_v6  ;;  %v2440_v38 = vadd.f32 %v4724_v61, %v2439_v2  ;;  %v2464_v37 = vadd.f32 %v4724_v61, %v2463_v26 }
 0x64a   : > { %2582 = vst [vmem:[#allocation9 + $0xd8] sm:$0xff] %v2550_v12 }
 0x64b   : > { %v2527_v14 = vmax.f32 %v2440_v38, 0.0  ;;  %v2535_v45 = vmax.f32 %v2464_v37, 0.0 }
 0x64c   : > { %v2487_v57 = vpop.f32.mrf.mxu2  ;;  %v2511_v51 = vpop.f32.mrf.mxu3 }
 0x64d   : > { %2559 = vst [vmem:[#allocation9 + $0x20] sm:$0xff] %v2527_v14  ;;  %v2488_v0 = vadd.f32 %v4724_v61, %v2487_v57  ;;  %v2512_v50 = vadd.f32 %v4724_v61, %v2511_v51 }
 0x64e   : > { %2567 = vst [vmem:[#allocation9 + $0x60] sm:$0xff] %v2535_v45 }
 0x64f   : > { %v2543_v63 = vmax.f32 %v2488_v0, 0.0  ;;  %v2551_v17 = vmax.f32 %v2512_v50, 0.0 }
 0x650   : > { %v2442_v30 = vpop.f32.mrf.mxu0  ;;  %v2466_v13 = vpop.f32.mrf.mxu1 }
 0x651   : > { %2575 = vst [vmem:[#allocation9 + $0xa0] sm:$0xff] %v2543_v63  ;;  %v2443_v16 = vadd.f32 %v4724_v61, %v2442_v30  ;;  %v2467_v5 = vadd.f32 %v4724_v61, %v2466_v13 }
 0x652   : > { %2583 = vst [vmem:[#allocation9 + $0xe0] sm:$0xff] %v2551_v17 }
 0x653   : > { %v2528_v19 = vmax.f32 %v2443_v16, 0.0  ;;  %v2536_v27 = vmax.f32 %v2467_v5, 0.0 }
 0x654   : > { %v2490_v28 = vpop.f32.mrf.mxu2  ;;  %v2514_v25 = vpop.f32.mrf.mxu3 }
 0x655   : > { %2560 = vst [vmem:[#allocation9 + $0x28] sm:$0xff] %v2528_v19  ;;  %v2491_v55 = vadd.f32 %v4724_v61, %v2490_v28  ;;  %v2515_v11 = vadd.f32 %v4724_v61, %v2514_v25 }
 0x656   : > { %2568 = vst [vmem:[#allocation9 + $0x68] sm:$0xff] %v2536_v27 }
 0x657   : > { %v2544_v48 = vmax.f32 %v2491_v55, 0.0  ;;  %v2552_v29 = vmax.f32 %v2515_v11, 0.0 }
 0x658   : > { %v2445_v15 = vpop.f32.mrf.mxu0  ;;  %v2469_v58 = vpop.f32.mrf.mxu1 }
 0x659   : > { %2576 = vst [vmem:[#allocation9 + $0xa8] sm:$0xff] %v2544_v48  ;;  %v2446_v53 = vadd.f32 %v4724_v61, %v2445_v15  ;;  %v2470_v18 = vadd.f32 %v4724_v61, %v2469_v58 }
 0x65a   : > { %2584 = vst [vmem:[#allocation9 + $0xe8] sm:$0xff] %v2552_v29 }
 0x65b   : > { %v2529_v33 = vmax.f32 %v2446_v53, 0.0  ;;  %v2537_v46 = vmax.f32 %v2470_v18, 0.0 }
 0x65c   : > { %v2493_v34 = vpop.f32.mrf.mxu2  ;;  %v2517_v32 = vpop.f32.mrf.mxu3 }
 0x65d   : > { %2561 = vst [vmem:[#allocation9 + $0x30] sm:$0xff] %v2529_v33  ;;  %v2494_v60 = vadd.f32 %v4724_v61, %v2493_v34  ;;  %v2518_v8 = vadd.f32 %v4724_v61, %v2517_v32 }
 0x65e   : > { %2569 = vst [vmem:[#allocation9 + $0x70] sm:$0xff] %v2537_v46 }
 0x65f   : > { %v2545_v42 = vmax.f32 %v2494_v60, 0.0  ;;  %v2553_v31 = vmax.f32 %v2518_v8, 0.0 }
 0x660   : > { %v2448_v59 = vpop.f32.mrf.mxu0  ;;  %v2472_v44 = vpop.f32.mrf.mxu1 }
 0x661   : > { %2577 = vst [vmem:[#allocation9 + $0xb0] sm:$0xff] %v2545_v42  ;;  %v2449_v43 = vadd.f32 %v4724_v61, %v2448_v59  ;;  %v2473_v47 = vadd.f32 %v4724_v61, %v2472_v44 }
 0x662   : > { %2585 = vst [vmem:[#allocation9 + $0xf0] sm:$0xff] %v2553_v31 }
 0x663   : > { %v2530_v10 = vmax.f32 %v2449_v43, 0.0  ;;  %v2538_v36 = vmax.f32 %v2473_v47, 0.0 }
 0x664   : > { %v2496_v39 = vpop.f32.mrf.mxu2  ;;  %v2520_v56 = vpop.f32.mrf.mxu3 }
 0x665   : > { %2562 = vst [vmem:[#allocation9 + $0x38] sm:$0xff] %v2530_v10  ;;  %v2497_v35 = vadd.f32 %v4724_v61, %v2496_v39  ;;  %v2521_v41 = vadd.f32 %v4724_v61, %v2520_v56 }
 0x666   : > { %2570 = vst [vmem:[#allocation9 + $0x78] sm:$0xff] %v2538_v36 }
 0x667   : > { %v2546_v62 = vmax.f32 %v2497_v35, 0.0  ;;  %v2554_v20 = vmax.f32 %v2521_v41, 0.0 }
 0x669   : > { %2578 = vst [vmem:[#allocation9 + $0xb8] sm:$0xff] %v2546_v62 }
 0x66a   : > { %2586 = vst [vmem:[#allocation9 + $0xf8] sm:$0xff] %v2554_v20 }
 0x66b PF: > { %p2975_p10 = scmp.eq.s32.totalorder %s3334_s25, 1  ;;  %s3285_s12 = smov [#allocation9]  }
 0x66c   : > { %s2592_s13 = sshll.u32 %s3285_s12, 4  ;;  %s2594_s16 = sshll.u32 %s4772_s7, 4  ;;  %s2593_s13 = int_to_ptr.vmem [resolvable:$true] %s2592_s13  ;;  %s2595_s16 = int_to_ptr.hbm [resolvable:$true] %s2594_s16 }
 0x66d   : > { %s3286_s17 = smov 128   ;;  %s3287_s18 = smov 8  }
 0x66e   : > { %2966 = dma.vmem_to_hbm [thread:$0]  (%p2975_p10), %s2593_s13, 4096, %s2595_s16, [#allocation7], %s3286_s17, %s3286_s17, %s3287_s18  }
 0x66f   : > { %3269 = dma.done.wait (%p2975_p10), [#allocation7], 4096  }
 0x670   : > { %3271 = vsyncadd (%p2975_p10), [#allocation7], 4294963200 }
 0x671 PF: > { %s19_s24 = sadd.s32 1, %s3274_s24  }
 0x672   : > { %p16_p11 = scmp.ge.s32.totalorder %s19_s24, 4  }
 0x674   :  { %18 = sbr.rel (!%p16_p11) target bundleno = 2 (0x2), region = 109 }
 0x679   :  { %2611 = vsyncpa [#allocation7], 1 }
 0x67a   :  { %2613 = vsyncpa [#allocation7 + $0x1], 1 }
 0x67b   :  { %2614 = vsyncpa [#allocation8], 1 }
 0x67c   :  { %2616 = vsyncpa [#allocation8 + $0x1], 1 }

</bundles_post_ra>
